<compile_context>
chip_gen: v5e
topology: v5e:2x2
jax: 0.10.0
libtpu: 0.0.40
codegen_flags: <defaults>
</compile_context>

<pallas_src>
import functools

import jax
import jax.numpy as jnp
from jax.experimental import pallas as pl
from jax.experimental.pallas import tpu as pltpu

EMBED_DIM = 128          # module-level `embed_dim`
NUM_HEADS = 4            # module-level `num_heads`
NUM_LAYERS = 2           # module-level `num_layers`
FFN_DIM = 2048           # nn.TransformerDecoderLayer default dim_feedforward
LN_EPS = 1e-5            # nn.LayerNorm default eps
FFN_CHUNK = 512          # FFN 2048-dim processed in 4 chunks

# Row layout of the packed per-layer vector tensor (L, 16, 128), all f32:
_ROW_BQ, _ROW_BK, _ROW_BV = 0, 1, 2            # self-attn qkv biases (q pre-scaled)
_ROW_BO_SA = 3                                  # self-attn out-proj bias
_ROW_BQ_CA, _ROW_BK_CA, _ROW_BV_CA, _ROW_BO_CA = 4, 5, 6, 7   # cross-attn biases
_ROW_B2 = 8                                     # FFN second linear bias
_ROW_LN1G, _ROW_LN1B = 9, 10
_ROW_LN2G, _ROW_LN2B = 11, 12
_ROW_LN3G, _ROW_LN3B = 13, 14
_N_VEC_ROWS = 16                                # padded to a multiple of 8 sublanes


# ----------------------------------------------------------------------------
# Fused kernel: one grid step == one decoder layer (+ final fc on last step)
# ----------------------------------------------------------------------------
def _fused_decoder_kernel(
    # shared inputs (constant block across the grid)
    x_emb_ref, mem_ref,
    # per-layer stacked parameters (leading dim = layer), weights in bf16
    w_qkv_ref, wo_sa_ref, wq_ca_ref, wkv_ca_ref, wo_ca_ref,
    w1_ref, b1_ref, w2_ref, vec_ref,
    # shared final projection (padded to 128 output lanes)
    fc_w_ref, fc_b_ref,
    # output
    out_ref,
    # scratch: activation carried across layers
    x_carry,
    *, num_heads, head_dim, batch):

    layer = pl.program_id(0)

    @pl.when(layer == 0)
    def _():
        x_carry[...] = x_emb_ref[...]

    x = x_carry[...]                     # (T, E) f32 activation carried across layers
    T, E = x.shape
    vec = vec_ref[0]                     # (16, E) f32 packed per-layer vectors

    def row(i):                          # (1, E) broadcastable bias / LN param
        return vec[i:i + 1, :]

    # Block-diagonal additive batch mask, generated on the VPU: flattened row t
    # has batch t % B; only same-batch query/key pairs may attend.
    def batch_bias(nk):
        rq = jax.lax.broadcasted_iota(jnp.int32, (T, nk), 0) % batch
        rk = jax.lax.broadcasted_iota(jnp.int32, (T, nk), 1) % batch
        return jnp.where(rq == rk, 0.0, -1e9)

    def add_layernorm(res, y, g, b):
        # residual add + LayerNorm, all statistics in f32
        z = res + y
        mean = jnp.mean(z, axis=-1, keepdims=True)
        c = z - mean
        var = jnp.mean(c * c, axis=-1, keepdims=True)
        return c * jax.lax.rsqrt(var + LN_EPS) * g + b

    def mha(q, k, v, bias, wo_ref, bo):
        # q: (Tq, E), k/v: (Tk, E) f32; heads are contiguous Dh-lane slices.
        # Softmax scale is pre-folded into the Q projection.  bf16 operands feed
        # every MXU dot; accumulation and softmax stay f32.
        ohs = []
        for h in range(num_heads):
            lo = h * head_dim
            qh = q[:, lo:lo + head_dim].astype(jnp.bfloat16)
            kh = k[:, lo:lo + head_dim].astype(jnp.bfloat16)
            vh = v[:, lo:lo + head_dim].astype(jnp.bfloat16)
            s = jax.lax.dot_general(
                qh, kh,
                dimension_numbers=(((1,), (1,)), ((), ())),
                preferred_element_type=jnp.float32) + bias
            s = s - jnp.max(s, axis=-1, keepdims=True)
            p = jnp.exp(s)
            p = p * pl.reciprocal(jnp.sum(p, axis=-1, keepdims=True), approx=True)
            ohs.append(jnp.dot(p.astype(jnp.bfloat16), vh,
                               preferred_element_type=jnp.float32))     # (Tq, Dh)
        # Single (T,E)@(E,E) out-projection instead of num_heads K=Dh matmuls.
        o = jnp.concatenate(ohs, axis=-1).astype(jnp.bfloat16)          # (Tq, E)
        return jnp.dot(o, wo_ref[0], preferred_element_type=jnp.float32) + bo

    # ---- self attention (fused QKV projection, bf16 weights) ----
    qkv = jnp.dot(x.astype(jnp.bfloat16), w_qkv_ref[0],
                  preferred_element_type=jnp.float32)                   # (T, 3E)
    sa = mha(qkv[:, :E] + row(_ROW_BQ),
             qkv[:, E:2 * E] + row(_ROW_BK),
             qkv[:, 2 * E:] + row(_ROW_BV),
             batch_bias(T), wo_sa_ref, row(_ROW_BO_SA))
    x = add_layernorm(x, sa, row(_ROW_LN1G), row(_ROW_LN1B))

    # ---- cross attention (fused KV projection of memory) ----
    mem = mem_ref[...]
    qc = jnp.dot(x.astype(jnp.bfloat16), wq_ca_ref[0],
                 preferred_element_type=jnp.float32) + row(_ROW_BQ_CA)
    kv = jnp.dot(mem.astype(jnp.bfloat16), wkv_ca_ref[0],
                 preferred_element_type=jnp.float32)                    # (MB, 2E)
    ca = mha(qc,
             kv[:, :E] + row(_ROW_BK_CA),
             kv[:, E:] + row(_ROW_BV_CA),
             batch_bias(mem.shape[0]), wo_ca_ref, row(_ROW_BO_CA))
    x = add_layernorm(x, ca, row(_ROW_LN2G), row(_ROW_LN2B))

    # ---- FFN (ReLU), chunked along the 2048 dim; intermediate never leaves chip ----
    x_b = x.astype(jnp.bfloat16)
    ff = jnp.zeros((T, E), jnp.float32)
    for lo in range(0, FFN_DIM, FFN_CHUNK):
        h_c = (jnp.dot(x_b, w1_ref[0, :, lo:lo + FFN_CHUNK],
                       preferred_element_type=jnp.float32)
               + b1_ref[0, :, lo:lo + FFN_CHUNK])
        h_c = jnp.maximum(h_c, 0.0).astype(jnp.bfloat16)
        ff = ff + jnp.dot(h_c, w2_ref[0, lo:lo + FFN_CHUNK, :],
                          preferred_element_type=jnp.float32)
    ff = ff + row(_ROW_B2)
    x = add_layernorm(x, ff, row(_ROW_LN3G), row(_ROW_LN3B))

    x_carry[...] = x

    # ---- final fc on the last layer, lane-dense (padded to 128 lanes) ----
    @pl.when(layer == pl.num_programs(0) - 1)
    def _():
        out_ref[...] = (jnp.dot(x.astype(jnp.bfloat16), fc_w_ref[...],
                                preferred_element_type=jnp.float32)
                        + fc_b_ref[...])


# ----------------------------------------------------------------------------
# Wrapper: one pallas_call for the whole forward (embedding gather stays in JAX)
# ----------------------------------------------------------------------------
def transformer_decoder_forward(src, memory, params, *, output_dim):
    # src: (S, B) int32 token ids; memory: (M, B, E) float32 (batch_first=False)
    S, B = src.shape
    M = memory.shape[0]
    E, H, L, F = EMBED_DIM, NUM_HEADS, NUM_LAYERS, FFN_DIM
    Dh = E // H
    T, MB = S * B, M * B
    P_out = params["fc_w"].shape[1]      # lane-dense padded output width

    # TODO(synk): embedding gather (token-id lookup) kept in plain JAX; it is a
    # scatter/gather glue op, not on the matmul hot path.
    x = jnp.take(params["embedding"], src, axis=0).reshape(T, E)
    mem = memory.reshape(MB, E)

    def shared(shape):
        nd = len(shape)
        return pl.BlockSpec(shape, lambda l, _nd=nd: (0,) * _nd)

    def per_layer(shape):
        nd = len(shape)
        return pl.BlockSpec((1,) + shape, lambda l, _nd=nd: (l,) + (0,) * _nd)

    kernel = functools.partial(
        _fused_decoder_kernel, num_heads=H, head_dim=Dh, batch=B)

    out = pl.pallas_call(
        kernel,
        out_shape=jax.ShapeDtypeStruct((T, P_out), jnp.float32),
        grid=(L,),
        in_specs=[
            shared((T, E)), shared((MB, E)),
            per_layer((E, 3 * E)),                      # w_qkv  (bf16)
            per_layer((E, E)),                          # wo_sa  (bf16)
            per_layer((E, E)),                          # wq_ca  (bf16)
            per_layer((E, 2 * E)),                      # wkv_ca (bf16)
            per_layer((E, E)),                          # wo_ca  (bf16)
            per_layer((E, F)),                          # w1     (bf16)
            per_layer((1, F)),                          # b1     (f32)
            per_layer((F, E)),                          # w2     (bf16)
            per_layer((_N_VEC_ROWS, E)),                # packed vectors (f32)
            shared((E, P_out)), shared((1, P_out)),     # fc_w (bf16), fc_b (f32)
        ],
        out_specs=pl.BlockSpec((T, P_out), lambda l: (0, 0)),
        scratch_shapes=[pltpu.VMEM((T, E), jnp.float32)],
        # Layer axis is a sequential carry.  Per-layer bf16 weights are ~1.3 MB
        # (double-buffered ~2.6 MB), far below the scoped-VMEM default on
        # v5e/v6e/v7x, so no vmem_limit override is needed.
        compiler_params=pltpu.CompilerParams(
            dimension_semantics=("arbitrary",)),
    )(
        x, mem,
        params["w_qkv"], params["wo_sa"], params["wq_ca"],
        params["wkv_ca"], params["wo_ca"],
        params["w1"], params["b1"], params["w2"], params["vec"],
        params["fc_w"], params["fc_b"],
    )

    return out[:, :output_dim].reshape(S, B, output_dim)


# ----------------------------------------------------------------------------
# Deterministic parameter init.  Produces the *prepared* layout the kernel
# consumes (bf16 weights, packed per-layer vectors, softmax scale folded into
# the Q projection, fc padded to 128 lanes) so no per-call prep is needed.
# Convention: y = x @ w + b, i.e. w is transposed relative to PyTorch's
# (out, in) in_proj_weight / Linear.weight — transpose when importing weights.
# ----------------------------------------------------------------------------
def init_params(key, vocab_size, output_dim):
    E, F, L, H = EMBED_DIM, FFN_DIM, NUM_LAYERS, NUM_HEADS
    Dh = E // H
    scale = 1.0 / float(Dh) ** 0.5
    P_out = max(128, ((output_dim + 127) // 128) * 128)
    keys = iter(jax.random.split(key, 40))

    def rnd(shape, s=0.02):
        return s * jax.random.normal(next(keys), shape, dtype=jnp.float32)

    w_qkv = rnd((L, E, 3 * E)); b_qkv = rnd((L, 3 * E))
    wo_sa = rnd((L, E, E));     bo_sa = rnd((L, E))
    wq_ca = rnd((L, E, E));     bq_ca = rnd((L, E))
    wkv_ca = rnd((L, E, 2 * E)); bkv_ca = rnd((L, 2 * E))
    wo_ca = rnd((L, E, E));     bo_ca = rnd((L, E))
    w1 = rnd((L, E, F)); b1 = rnd((L, F))
    w2 = rnd((L, F, E)); b2 = rnd((L, E))
    ln1_g = jnp.ones((L, E), jnp.float32); ln1_b = jnp.zeros((L, E), jnp.float32)
    ln2_g = jnp.ones((L, E), jnp.float32); ln2_b = jnp.zeros((L, E), jnp.float32)
    ln3_g = jnp.ones((L, E), jnp.float32); ln3_b = jnp.zeros((L, E), jnp.float32)
    fc_w = rnd((E, output_dim)); fc_b = rnd((output_dim,))
    embedding = rnd((vocab_size, E), s=1.0)

    # Fold the 1/sqrt(head_dim) softmax scale into the Q projections (exact, free).
    w_qkv = w_qkv.at[:, :, :E].multiply(scale)
    b_qkv = b_qkv.at[:, :E].multiply(scale)
    wq_ca = wq_ca * scale
    bq_ca = bq_ca * scale

    # Pack all E-wide per-layer vectors into a single (L, 16, E) f32 tensor
    # (one DMA per layer instead of ~14 tiny ones).  Row order must match the
    # _ROW_* constants above.
    vec = jnp.stack([
        b_qkv[:, :E], b_qkv[:, E:2 * E], b_qkv[:, 2 * E:],     # rows 0-2
        bo_sa,                                                  # row 3
        bq_ca, bkv_ca[:, :E], bkv_ca[:, E:], bo_ca,             # rows 4-7
        b2,                                                     # row 8
        ln1_g, ln1_b, ln2_g, ln2_b, ln3_g, ln3_b,               # rows 9-14
        jnp.zeros((L, E), jnp.float32),                         # row 15 (pad)
    ], axis=1)

    bf = lambda a: a.astype(jnp.bfloat16)
    return dict(
        embedding=embedding,
        # bf16 matmul operands (native MXU path, half the weight DMA)
        w_qkv=bf(w_qkv), wo_sa=bf(wo_sa),
        wq_ca=bf(wq_ca), wkv_ca=bf(wkv_ca), wo_ca=bf(wo_ca),
        w1=bf(w1), w2=bf(w2),
        # small vectors stay f32 (bias / LayerNorm precision)
        b1=b1.reshape(L, 1, F), vec=vec,
        # final classifier, padded to 128 output lanes (lane-dense stores)
        fc_w=bf(jnp.pad(fc_w, ((0, 0), (0, P_out - output_dim)))),
        fc_b=jnp.pad(fc_b, (0, P_out - output_dim)).reshape(1, P_out),
    )


if __name__ == "__main__":
    key = jax.random.PRNGKey(0)
    k_param, k_src, k_mem = jax.random.split(key, 3)

    vocab_size = 32      # len(vocab)
    output_dim = 8       # len(label_encoder)
    S, B, M = 8, 2, 8    # tgt seq len, batch, memory len

    params = init_params(k_param, vocab_size, output_dim)
    src = jax.random.randint(k_src, (S, B), 0, vocab_size, dtype=jnp.int32)
    memory = jax.random.normal(k_mem, (M, B, EMBED_DIM), dtype=jnp.float32)

    fwd = jax.jit(functools.partial(transformer_decoder_forward,
                                    output_dim=output_dim))
    out = jax.block_until_ready(fwd(src, memory, params))
    assert out.shape == (S, B, output_dim), out.shape
    assert bool(jnp.all(jnp.isfinite(out))), "non-finite output"
    print("KERNEL_OK")
</pallas_src>

<mosaic_0001>
module attributes {stable_mosaic.version = 11 : i64} {
  func.func @_fused_decoder_kernel(%arg0: i32, %arg1: memref<16x128xf32, #tpu.memory_space<vmem>>, %arg2: memref<16x128xf32, #tpu.memory_space<vmem>>, %arg3: memref<1x128x384xbf16, #tpu.memory_space<vmem>>, %arg4: memref<1x128x128xbf16, #tpu.memory_space<vmem>>, %arg5: memref<1x128x128xbf16, #tpu.memory_space<vmem>>, %arg6: memref<1x128x256xbf16, #tpu.memory_space<vmem>>, %arg7: memref<1x128x128xbf16, #tpu.memory_space<vmem>>, %arg8: memref<1x128x2048xbf16, #tpu.memory_space<vmem>>, %arg9: memref<1x1x2048xf32, #tpu.memory_space<vmem>>, %arg10: memref<1x2048x128xbf16, #tpu.memory_space<vmem>>, %arg11: memref<1x16x128xf32, #tpu.memory_space<vmem>>, %arg12: memref<128x128xbf16, #tpu.memory_space<vmem>>, %arg13: memref<1x128xf32, #tpu.memory_space<vmem>>, %arg14: memref<16x128xf32, #tpu.memory_space<vmem>>, %arg15: memref<16x128xf32, #tpu.memory_space<vmem>>) attributes {dimension_semantics = [#tpu.dimension_semantics<arbitrary>], iteration_bounds = array<i64: 2>, scalar_prefetch = 0 : i64, scratch_operands = 1 : i64, tpu.core_type = #tpu.core_type<tc>, window_params = [{pipeline_mode = #tpu.pipeline_mode<synchronous>, transform_indices = @transform_0, window_bounds = array<i64: 16, 128>}, {pipeline_mode = #tpu.pipeline_mode<synchronous>, transform_indices = @transform_1, window_bounds = array<i64: 16, 128>}, {transform_indices = @transform_2, window_bounds = array<i64: 1, 128, 384>}, {transform_indices = @transform_3, window_bounds = array<i64: 1, 128, 128>}, {transform_indices = @transform_4, window_bounds = array<i64: 1, 128, 128>}, {transform_indices = @transform_5, window_bounds = array<i64: 1, 128, 256>}, {transform_indices = @transform_6, window_bounds = array<i64: 1, 128, 128>}, {transform_indices = @transform_7, window_bounds = array<i64: 1, 128, 2048>}, {transform_indices = @transform_8, window_bounds = array<i64: 1, 1, 2048>}, {transform_indices = @transform_9, window_bounds = array<i64: 1, 2048, 128>}, {transform_indices = @transform_10, window_bounds = array<i64: 1, 16, 128>}, {pipeline_mode = #tpu.pipeline_mode<synchronous>, transform_indices = @transform_11, window_bounds = array<i64: 128, 128>}, {pipeline_mode = #tpu.pipeline_mode<synchronous>, transform_indices = @transform_12, window_bounds = array<i64: 1, 128>}, {pipeline_mode = #tpu.pipeline_mode<synchronous>, transform_indices = @transform_13, window_bounds = array<i64: 16, 128>}]} {
    %c0_i32 = arith.constant 0 : i32
    %0 = arith.cmpi eq, %arg0, %c0_i32 : i32
    %1 = arith.extui %0 : i1 to i32
    %c0_i32_0 = arith.constant 0 : i32
    %2 = arith.cmpi ne, %1, %c0_i32_0 : i32
    scf.if %2 {
      %c0_149 = arith.constant 0 : index
      %c0_150 = arith.constant 0 : index
      %428 = vector.load %arg1[%c0_149, %c0_150] : memref<16x128xf32, #tpu.memory_space<vmem>>, vector<16x128xf32>
      %c0_151 = arith.constant 0 : index
      %c0_152 = arith.constant 0 : index
      %429 = vector.load %arg15[%c0_151, %c0_152] : memref<16x128xf32, #tpu.memory_space<vmem>>, vector<16x128xf32>
      tpu.vector_store %arg15[%c0_151, %c0_152], %428 {strides = array<i32>} : memref<16x128xf32, #tpu.memory_space<vmem>>, vector<16x128xf32>,
    } else {
    }
    %c0 = arith.constant 0 : index
    %c0_1 = arith.constant 0 : index
    %3 = vector.load %arg15[%c0, %c0_1] : memref<16x128xf32, #tpu.memory_space<vmem>>, vector<16x128xf32>
    %c0_2 = arith.constant 0 : index
    %c0_3 = arith.constant 0 : index
    %c0_4 = arith.constant 0 : index
    %4 = vector.load %arg11[%c0_2, %c0_3, %c0_4] : memref<1x16x128xf32, #tpu.memory_space<vmem>>, vector<1x16x128xf32>
    %5 = vector.shape_cast %4 : vector<1x16x128xf32> to vector<16x128xf32>
    %6 = arith.truncf %3 : vector<16x128xf32> to vector<16x128xbf16>
    %c0_5 = arith.constant 0 : index
    %c0_6 = arith.constant 0 : index
    %c0_7 = arith.constant 0 : index
    %7 = vector.load %arg3[%c0_5, %c0_6, %c0_7] : memref<1x128x384xbf16, #tpu.memory_space<vmem>>, vector<1x128x384xbf16>
    %8 = vector.shape_cast %7 : vector<1x128x384xbf16> to vector<128x384xbf16>
    %cst = arith.constant dense<0.000000e+00> : vector<16x384xf32>
    %9 = tpu.matmul %6, %8, %cst {dimension_numbers = #tpu.dot_dimension_numbers<[1], [0], [0], [1], [0, 0, 1, 1], [], []>} : vector<16x128xbf16>, vector<128x384xbf16>, vector<16x384xf32> -> vector<16x384xf32>
    %10 = vector.extract_strided_slice %9 {offsets = [0, 0], sizes = [16, 128], strides = [1, 1]} : vector<16x384xf32> to vector<16x128xf32>
    %11 = vector.extract_strided_slice %5 {offsets = [0, 0], sizes = [1, 128], strides = [1, 1]} : vector<16x128xf32> to vector<1x128xf32>
    %12 = vector.broadcast %11 : vector<1x128xf32> to vector<16x128xf32>
    %13 = arith.addf %10, %12 : vector<16x128xf32>
    %14 = vector.extract_strided_slice %9 {offsets = [0, 128], sizes = [16, 128], strides = [1, 1]} : vector<16x384xf32> to vector<16x128xf32>
    %15 = vector.extract_strided_slice %5 {offsets = [1, 0], sizes = [1, 128], strides = [1, 1]} : vector<16x128xf32> to vector<1x128xf32>
    %16 = vector.broadcast %15 : vector<1x128xf32> to vector<16x128xf32>
    %17 = arith.addf %14, %16 : vector<16x128xf32>
    %18 = vector.extract_strided_slice %9 {offsets = [0, 256], sizes = [16, 128], strides = [1, 1]} : vector<16x384xf32> to vector<16x128xf32>
    %19 = vector.extract_strided_slice %5 {offsets = [2, 0], sizes = [1, 128], strides = [1, 1]} : vector<16x128xf32> to vector<1x128xf32>
    %20 = vector.broadcast %19 : vector<1x128xf32> to vector<16x128xf32>
    %21 = arith.addf %18, %20 : vector<16x128xf32>
    %22 = tpu.iota {dimensions = array<i32: 0>} : vector<16x16xi32>
    %c2_i32 = arith.constant 2 : i32
    %c0_i32_8 = arith.constant 0 : i32
    %23 = arith.cmpi eq, %c2_i32, %c0_i32_8 : i32
    %c1_i32 = arith.constant 1 : i32
    %24 = arith.select %23, %c1_i32, %c2_i32 : i32
    %25 = vector.broadcast %24 : i32 to vector<16x16xi32>
    %26 = arith.remsi %22, %25 : vector<16x16xi32>
    %c0_i32_9 = arith.constant 0 : i32
    %27 = vector.broadcast %c0_i32_9 : i32 to vector<16x16xi32>
    %28 = arith.cmpi ne, %26, %27 : vector<16x16xi32>
    %c0_i32_10 = arith.constant 0 : i32
    %29 = vector.broadcast %c0_i32_10 : i32 to vector<16x16xi32>
    %30 = arith.cmpi slt, %26, %29 : vector<16x16xi32>
    %c0_i32_11 = arith.constant 0 : i32
    %31 = arith.cmpi slt, %24, %c0_i32_11 : i32
    %32 = vector.broadcast %31 : i1 to vector<16x16xi1>
    %33 = vector.broadcast %32 : vector<16x16xi1> to vector<16x16xi1>
    %34 = arith.xori %30, %33 : vector<16x16xi1>
    %35 = arith.andi %34, %28 : vector<16x16xi1>
    %36 = vector.broadcast %24 : i32 to vector<16x16xi32>
    %37 = arith.addi %26, %36 : vector<16x16xi32>
    %38 = arith.select %35, %37, %26 : vector<16x16xi1>, vector<16x16xi32>
    %39 = tpu.iota {dimensions = array<i32: 1>} : vector<16x16xi32>
    %c2_i32_12 = arith.constant 2 : i32
    %c0_i32_13 = arith.constant 0 : i32
    %40 = arith.cmpi eq, %c2_i32_12, %c0_i32_13 : i32
    %c1_i32_14 = arith.constant 1 : i32
    %41 = arith.select %40, %c1_i32_14, %c2_i32_12 : i32
    %42 = vector.broadcast %41 : i32 to vector<16x16xi32>
    %43 = arith.remsi %39, %42 : vector<16x16xi32>
    %c0_i32_15 = arith.constant 0 : i32
    %44 = vector.broadcast %c0_i32_15 : i32 to vector<16x16xi32>
    %45 = arith.cmpi ne, %43, %44 : vector<16x16xi32>
    %c0_i32_16 = arith.constant 0 : i32
    %46 = vector.broadcast %c0_i32_16 : i32 to vector<16x16xi32>
    %47 = arith.cmpi slt, %43, %46 : vector<16x16xi32>
    %c0_i32_17 = arith.constant 0 : i32
    %48 = arith.cmpi slt, %41, %c0_i32_17 : i32
    %49 = vector.broadcast %48 : i1 to vector<16x16xi1>
    %50 = vector.broadcast %49 : vector<16x16xi1> to vector<16x16xi1>
    %51 = arith.xori %47, %50 : vector<16x16xi1>
    %52 = arith.andi %51, %45 : vector<16x16xi1>
    %53 = vector.broadcast %41 : i32 to vector<16x16xi32>
    %54 = arith.addi %43, %53 : vector<16x16xi32>
    %55 = arith.select %52, %54, %43 : vector<16x16xi1>, vector<16x16xi32>
    %56 = arith.cmpi eq, %38, %55 : vector<16x16xi32>
    %cst_18 = arith.constant 0.000000e+00 : f32
    %cst_19 = arith.constant -1.000000e+09 : f32
    %57 = vector.broadcast %cst_18 : f32 to vector<16x16xf32>
    %58 = vector.broadcast %cst_19 : f32 to vector<16x16xf32>
    %59 = arith.select %56, %57, %58 : vector<16x16xi1>, vector<16x16xf32>
    %60 = vector.extract_strided_slice %5 {offsets = [3, 0], sizes = [1, 128], strides = [1, 1]} : vector<16x128xf32> to vector<1x128xf32>
    %61 = vector.extract_strided_slice %13 {offsets = [0, 0], sizes = [16, 32], strides = [1, 1]} : vector<16x128xf32> to vector<16x32xf32>
    %62 = arith.truncf %61 : vector<16x32xf32> to vector<16x32xbf16>
    %63 = vector.extract_strided_slice %17 {offsets = [0, 0], sizes = [16, 32], strides = [1, 1]} : vector<16x128xf32> to vector<16x32xf32>
    %64 = arith.truncf %63 : vector<16x32xf32> to vector<16x32xbf16>
    %65 = vector.extract_strided_slice %21 {offsets = [0, 0], sizes = [16, 32], strides = [1, 1]} : vector<16x128xf32> to vector<16x32xf32>
    %66 = arith.truncf %65 : vector<16x32xf32> to vector<16x32xbf16>
    %cst_20 = arith.constant dense<0.000000e+00> : vector<16x16xf32>
    %67 = tpu.matmul %62, %64, %cst_20 {dimension_numbers = #tpu.dot_dimension_numbers<[1], [1], [0], [0], [0, 0, 1, 0], [], []>} : vector<16x32xbf16>, vector<16x32xbf16>, vector<16x16xf32> -> vector<16x16xf32>
    %68 = arith.addf %67, %59 : vector<16x16xf32>
    %cst_21 = arith.constant dense<0xFF800000> : vector<16xf32>
    %69 = vector.multi_reduction <maximumf>, %68, %cst_21 [1] : vector<16x16xf32> to vector<16xf32>
    %70 = vector.shape_cast %69 : vector<16xf32> to vector<16x1xf32>
    %71 = vector.broadcast %70 : vector<16x1xf32> to vector<16x16xf32>
    %72 = arith.subf %68, %71 : vector<16x16xf32>
    %73 = math.exp %72 : vector<16x16xf32>
    %cst_22 = arith.constant dense<0.000000e+00> : vector<16xf32>
    %74 = vector.multi_reduction <add>, %73, %cst_22 [1] : vector<16x16xf32> to vector<16xf32>
    %75 = vector.shape_cast %74 : vector<16xf32> to vector<16x1xf32>
    %76 = tpu.reciprocal %75 {approx = true} : vector<16x1xf32> -> vector<16x1xf32>
    %77 = vector.broadcast %76 : vector<16x1xf32> to vector<16x16xf32>
    %78 = arith.mulf %73, %77 : vector<16x16xf32>
    %79 = arith.truncf %78 : vector<16x16xf32> to vector<16x16xbf16>
    %cst_23 = arith.constant dense<0.000000e+00> : vector<16x32xf32>
    %80 = tpu.matmul %79, %66, %cst_23 {dimension_numbers = #tpu.dot_dimension_numbers<[1], [0], [0], [1], [0, 0, 1, 1], [], []>} : vector<16x16xbf16>, vector<16x32xbf16>, vector<16x32xf32> -> vector<16x32xf32>
    %81 = vector.extract_strided_slice %13 {offsets = [0, 32], sizes = [16, 32], strides = [1, 1]} : vector<16x128xf32> to vector<16x32xf32>
    %82 = arith.truncf %81 : vector<16x32xf32> to vector<16x32xbf16>
    %83 = vector.extract_strided_slice %17 {offsets = [0, 32], sizes = [16, 32], strides = [1, 1]} : vector<16x128xf32> to vector<16x32xf32>
    %84 = arith.truncf %83 : vector<16x32xf32> to vector<16x32xbf16>
    %85 = vector.extract_strided_slice %21 {offsets = [0, 32], sizes = [16, 32], strides = [1, 1]} : vector<16x128xf32> to vector<16x32xf32>
    %86 = arith.truncf %85 : vector<16x32xf32> to vector<16x32xbf16>
    %cst_24 = arith.constant dense<0.000000e+00> : vector<16x16xf32>
    %87 = tpu.matmul %82, %84, %cst_24 {dimension_numbers = #tpu.dot_dimension_numbers<[1], [1], [0], [0], [0, 0, 1, 0], [], []>} : vector<16x32xbf16>, vector<16x32xbf16>, vector<16x16xf32> -> vector<16x16xf32>
    %88 = arith.addf %87, %59 : vector<16x16xf32>
    %cst_25 = arith.constant dense<0xFF800000> : vector<16xf32>
    %89 = vector.multi_reduction <maximumf>, %88, %cst_25 [1] : vector<16x16xf32> to vector<16xf32>
    %90 = vector.shape_cast %89 : vector<16xf32> to vector<16x1xf32>
    %91 = vector.broadcast %90 : vector<16x1xf32> to vector<16x16xf32>
    %92 = arith.subf %88, %91 : vector<16x16xf32>
    %93 = math.exp %92 : vector<16x16xf32>
    %cst_26 = arith.constant dense<0.000000e+00> : vector<16xf32>
    %94 = vector.multi_reduction <add>, %93, %cst_26 [1] : vector<16x16xf32> to vector<16xf32>
    %95 = vector.shape_cast %94 : vector<16xf32> to vector<16x1xf32>
    %96 = tpu.reciprocal %95 {approx = true} : vector<16x1xf32> -> vector<16x1xf32>
    %97 = vector.broadcast %96 : vector<16x1xf32> to vector<16x16xf32>
    %98 = arith.mulf %93, %97 : vector<16x16xf32>
    %99 = arith.truncf %98 : vector<16x16xf32> to vector<16x16xbf16>
    %cst_27 = arith.constant dense<0.000000e+00> : vector<16x32xf32>
    %100 = tpu.matmul %99, %86, %cst_27 {dimension_numbers = #tpu.dot_dimension_numbers<[1], [0], [0], [1], [0, 0, 1, 1], [], []>} : vector<16x16xbf16>, vector<16x32xbf16>, vector<16x32xf32> -> vector<16x32xf32>
    %101 = vector.extract_strided_slice %13 {offsets = [0, 64], sizes = [16, 32], strides = [1, 1]} : vector<16x128xf32> to vector<16x32xf32>
    %102 = arith.truncf %101 : vector<16x32xf32> to vector<16x32xbf16>
    %103 = vector.extract_strided_slice %17 {offsets = [0, 64], sizes = [16, 32], strides = [1, 1]} : vector<16x128xf32> to vector<16x32xf32>
    %104 = arith.truncf %103 : vector<16x32xf32> to vector<16x32xbf16>
    %105 = vector.extract_strided_slice %21 {offsets = [0, 64], sizes = [16, 32], strides = [1, 1]} : vector<16x128xf32> to vector<16x32xf32>
    %106 = arith.truncf %105 : vector<16x32xf32> to vector<16x32xbf16>
    %cst_28 = arith.constant dense<0.000000e+00> : vector<16x16xf32>
    %107 = tpu.matmul %102, %104, %cst_28 {dimension_numbers = #tpu.dot_dimension_numbers<[1], [1], [0], [0], [0, 0, 1, 0], [], []>} : vector<16x32xbf16>, vector<16x32xbf16>, vector<16x16xf32> -> vector<16x16xf32>
    %108 = arith.addf %107, %59 : vector<16x16xf32>
    %cst_29 = arith.constant dense<0xFF800000> : vector<16xf32>
    %109 = vector.multi_reduction <maximumf>, %108, %cst_29 [1] : vector<16x16xf32> to vector<16xf32>
    %110 = vector.shape_cast %109 : vector<16xf32> to vector<16x1xf32>
    %111 = vector.broadcast %110 : vector<16x1xf32> to vector<16x16xf32>
    %112 = arith.subf %108, %111 : vector<16x16xf32>
    %113 = math.exp %112 : vector<16x16xf32>
    %cst_30 = arith.constant dense<0.000000e+00> : vector<16xf32>
    %114 = vector.multi_reduction <add>, %113, %cst_30 [1] : vector<16x16xf32> to vector<16xf32>
    %115 = vector.shape_cast %114 : vector<16xf32> to vector<16x1xf32>
    %116 = tpu.reciprocal %115 {approx = true} : vector<16x1xf32> -> vector<16x1xf32>
    %117 = vector.broadcast %116 : vector<16x1xf32> to vector<16x16xf32>
    %118 = arith.mulf %113, %117 : vector<16x16xf32>
    %119 = arith.truncf %118 : vector<16x16xf32> to vector<16x16xbf16>
    %cst_31 = arith.constant dense<0.000000e+00> : vector<16x32xf32>
    %120 = tpu.matmul %119, %106, %cst_31 {dimension_numbers = #tpu.dot_dimension_numbers<[1], [0], [0], [1], [0, 0, 1, 1], [], []>} : vector<16x16xbf16>, vector<16x32xbf16>, vector<16x32xf32> -> vector<16x32xf32>
    %121 = vector.extract_strided_slice %13 {offsets = [0, 96], sizes = [16, 32], strides = [1, 1]} : vector<16x128xf32> to vector<16x32xf32>
    %122 = arith.truncf %121 : vector<16x32xf32> to vector<16x32xbf16>
    %123 = vector.extract_strided_slice %17 {offsets = [0, 96], sizes = [16, 32], strides = [1, 1]} : vector<16x128xf32> to vector<16x32xf32>
    %124 = arith.truncf %123 : vector<16x32xf32> to vector<16x32xbf16>
    %125 = vector.extract_strided_slice %21 {offsets = [0, 96], sizes = [16, 32], strides = [1, 1]} : vector<16x128xf32> to vector<16x32xf32>
    %126 = arith.truncf %125 : vector<16x32xf32> to vector<16x32xbf16>
    %cst_32 = arith.constant dense<0.000000e+00> : vector<16x16xf32>
    %127 = tpu.matmul %122, %124, %cst_32 {dimension_numbers = #tpu.dot_dimension_numbers<[1], [1], [0], [0], [0, 0, 1, 0], [], []>} : vector<16x32xbf16>, vector<16x32xbf16>, vector<16x16xf32> -> vector<16x16xf32>
    %128 = arith.addf %127, %59 : vector<16x16xf32>
    %cst_33 = arith.constant dense<0xFF800000> : vector<16xf32>
    %129 = vector.multi_reduction <maximumf>, %128, %cst_33 [1] : vector<16x16xf32> to vector<16xf32>
    %130 = vector.shape_cast %129 : vector<16xf32> to vector<16x1xf32>
    %131 = vector.broadcast %130 : vector<16x1xf32> to vector<16x16xf32>
    %132 = arith.subf %128, %131 : vector<16x16xf32>
    %133 = math.exp %132 : vector<16x16xf32>
    %cst_34 = arith.constant dense<0.000000e+00> : vector<16xf32>
    %134 = vector.multi_reduction <add>, %133, %cst_34 [1] : vector<16x16xf32> to vector<16xf32>
    %135 = vector.shape_cast %134 : vector<16xf32> to vector<16x1xf32>
    %136 = tpu.reciprocal %135 {approx = true} : vector<16x1xf32> -> vector<16x1xf32>
    %137 = vector.broadcast %136 : vector<16x1xf32> to vector<16x16xf32>
    %138 = arith.mulf %133, %137 : vector<16x16xf32>
    %139 = arith.truncf %138 : vector<16x16xf32> to vector<16x16xbf16>
    %cst_35 = arith.constant dense<0.000000e+00> : vector<16x32xf32>
    %140 = tpu.matmul %139, %126, %cst_35 {dimension_numbers = #tpu.dot_dimension_numbers<[1], [0], [0], [1], [0, 0, 1, 1], [], []>} : vector<16x16xbf16>, vector<16x32xbf16>, vector<16x32xf32> -> vector<16x32xf32>
    %141 = tpu.concatenate %80, %100, %120, %140 in 1 : vector<16x32xf32>, vector<16x32xf32>, vector<16x32xf32>, vector<16x32xf32> -> vector<16x128xf32>
    %142 = arith.truncf %141 : vector<16x128xf32> to vector<16x128xbf16>
    %c0_36 = arith.constant 0 : index
    %c0_37 = arith.constant 0 : index
    %c0_38 = arith.constant 0 : index
    %143 = vector.load %arg4[%c0_36, %c0_37, %c0_38] : memref<1x128x128xbf16, #tpu.memory_space<vmem>>, vector<1x128x128xbf16>
    %144 = vector.shape_cast %143 : vector<1x128x128xbf16> to vector<128x128xbf16>
    %cst_39 = arith.constant dense<0.000000e+00> : vector<16x128xf32>
    %145 = tpu.matmul %142, %144, %cst_39 {dimension_numbers = #tpu.dot_dimension_numbers<[1], [0], [0], [1], [0, 0, 1, 1], [], []>} : vector<16x128xbf16>, vector<128x128xbf16>, vector<16x128xf32> -> vector<16x128xf32>
    %146 = vector.broadcast %60 : vector<1x128xf32> to vector<16x128xf32>
    %147 = arith.addf %145, %146 : vector<16x128xf32>
    %148 = vector.extract_strided_slice %5 {offsets = [9, 0], sizes = [1, 128], strides = [1, 1]} : vector<16x128xf32> to vector<1x128xf32>
    %149 = vector.extract_strided_slice %5 {offsets = [10, 0], sizes = [1, 128], strides = [1, 1]} : vector<16x128xf32> to vector<1x128xf32>
    %150 = arith.addf %3, %147 : vector<16x128xf32>
    %cst_40 = arith.constant dense<0.000000e+00> : vector<16xf32>
    %151 = vector.multi_reduction <add>, %150, %cst_40 [1] : vector<16x128xf32> to vector<16xf32>
    %152 = vector.shape_cast %151 : vector<16xf32> to vector<16x1xf32>
    %cst_41 = arith.constant 1.280000e+02 : f32
    %153 = vector.broadcast %cst_41 : f32 to vector<16x1xf32>
    %154 = arith.divf %152, %153 : vector<16x1xf32>
    %155 = vector.broadcast %154 : vector<16x1xf32> to vector<16x128xf32>
    %156 = arith.subf %150, %155 : vector<16x128xf32>
    %157 = arith.mulf %156, %156 : vector<16x128xf32>
    %cst_42 = arith.constant dense<0.000000e+00> : vector<16xf32>
    %158 = vector.multi_reduction <add>, %157, %cst_42 [1] : vector<16x128xf32> to vector<16xf32>
    %159 = vector.shape_cast %158 : vector<16xf32> to vector<16x1xf32>
    %cst_43 = arith.constant 1.280000e+02 : f32
    %160 = vector.broadcast %cst_43 : f32 to vector<16x1xf32>
    %161 = arith.divf %159, %160 : vector<16x1xf32>
    %cst_44 = arith.constant 9.99999974E-6 : f32
    %162 = vector.broadcast %cst_44 : f32 to vector<16x1xf32>
    %163 = arith.addf %161, %162 : vector<16x1xf32>
    %164 = math.rsqrt %163 : vector<16x1xf32>
    %165 = vector.broadcast %164 : vector<16x1xf32> to vector<16x128xf32>
    %166 = arith.mulf %156, %165 : vector<16x128xf32>
    %167 = vector.broadcast %148 : vector<1x128xf32> to vector<16x128xf32>
    %168 = arith.mulf %166, %167 : vector<16x128xf32>
    %169 = vector.broadcast %149 : vector<1x128xf32> to vector<16x128xf32>
    %170 = arith.addf %168, %169 : vector<16x128xf32>
    %c0_45 = arith.constant 0 : index
    %c0_46 = arith.constant 0 : index
    %171 = vector.load %arg2[%c0_45, %c0_46] : memref<16x128xf32, #tpu.memory_space<vmem>>, vector<16x128xf32>
    %172 = arith.truncf %170 : vector<16x128xf32> to vector<16x128xbf16>
    %c0_47 = arith.constant 0 : index
    %c0_48 = arith.constant 0 : index
    %c0_49 = arith.constant 0 : index
    %173 = vector.load %arg5[%c0_47, %c0_48, %c0_49] : memref<1x128x128xbf16, #tpu.memory_space<vmem>>, vector<1x128x128xbf16>
    %174 = vector.shape_cast %173 : vector<1x128x128xbf16> to vector<128x128xbf16>
    %cst_50 = arith.constant dense<0.000000e+00> : vector<16x128xf32>
    %175 = tpu.matmul %172, %174, %cst_50 {dimension_numbers = #tpu.dot_dimension_numbers<[1], [0], [0], [1], [0, 0, 1, 1], [], []>} : vector<16x128xbf16>, vector<128x128xbf16>, vector<16x128xf32> -> vector<16x128xf32>
    %176 = vector.extract_strided_slice %5 {offsets = [4, 0], sizes = [1, 128], strides = [1, 1]} : vector<16x128xf32> to vector<1x128xf32>
    %177 = vector.broadcast %176 : vector<1x128xf32> to vector<16x128xf32>
    %178 = arith.addf %175, %177 : vector<16x128xf32>
    %179 = arith.truncf %171 : vector<16x128xf32> to vector<16x128xbf16>
    %c0_51 = arith.constant 0 : index
    %c0_52 = arith.constant 0 : index
    %c0_53 = arith.constant 0 : index
    %180 = vector.load %arg6[%c0_51, %c0_52, %c0_53] : memref<1x128x256xbf16, #tpu.memory_space<vmem>>, vector<1x128x256xbf16>
    %181 = vector.shape_cast %180 : vector<1x128x256xbf16> to vector<128x256xbf16>
    %cst_54 = arith.constant dense<0.000000e+00> : vector<16x256xf32>
    %182 = tpu.matmul %179, %181, %cst_54 {dimension_numbers = #tpu.dot_dimension_numbers<[1], [0], [0], [1], [0, 0, 1, 1], [], []>} : vector<16x128xbf16>, vector<128x256xbf16>, vector<16x256xf32> -> vector<16x256xf32>
    %183 = vector.extract_strided_slice %182 {offsets = [0, 0], sizes = [16, 128], strides = [1, 1]} : vector<16x256xf32> to vector<16x128xf32>
    %184 = vector.extract_strided_slice %5 {offsets = [5, 0], sizes = [1, 128], strides = [1, 1]} : vector<16x128xf32> to vector<1x128xf32>
    %185 = vector.broadcast %184 : vector<1x128xf32> to vector<16x128xf32>
    %186 = arith.addf %183, %185 : vector<16x128xf32>
    %187 = vector.extract_strided_slice %182 {offsets = [0, 128], sizes = [16, 128], strides = [1, 1]} : vector<16x256xf32> to vector<16x128xf32>
    %188 = vector.extract_strided_slice %5 {offsets = [6, 0], sizes = [1, 128], strides = [1, 1]} : vector<16x128xf32> to vector<1x128xf32>
    %189 = vector.broadcast %188 : vector<1x128xf32> to vector<16x128xf32>
    %190 = arith.addf %187, %189 : vector<16x128xf32>
    %191 = tpu.iota {dimensions = array<i32: 0>} : vector<16x16xi32>
    %c2_i32_55 = arith.constant 2 : i32
    %c0_i32_56 = arith.constant 0 : i32
    %192 = arith.cmpi eq, %c2_i32_55, %c0_i32_56 : i32
    %c1_i32_57 = arith.constant 1 : i32
    %193 = arith.select %192, %c1_i32_57, %c2_i32_55 : i32
    %194 = vector.broadcast %193 : i32 to vector<16x16xi32>
    %195 = arith.remsi %191, %194 : vector<16x16xi32>
    %c0_i32_58 = arith.constant 0 : i32
    %196 = vector.broadcast %c0_i32_58 : i32 to vector<16x16xi32>
    %197 = arith.cmpi ne, %195, %196 : vector<16x16xi32>
    %c0_i32_59 = arith.constant 0 : i32
    %198 = vector.broadcast %c0_i32_59 : i32 to vector<16x16xi32>
    %199 = arith.cmpi slt, %195, %198 : vector<16x16xi32>
    %c0_i32_60 = arith.constant 0 : i32
    %200 = arith.cmpi slt, %193, %c0_i32_60 : i32
    %201 = vector.broadcast %200 : i1 to vector<16x16xi1>
    %202 = vector.broadcast %201 : vector<16x16xi1> to vector<16x16xi1>
    %203 = arith.xori %199, %202 : vector<16x16xi1>
    %204 = arith.andi %203, %197 : vector<16x16xi1>
    %205 = vector.broadcast %193 : i32 to vector<16x16xi32>
    %206 = arith.addi %195, %205 : vector<16x16xi32>
    %207 = arith.select %204, %206, %195 : vector<16x16xi1>, vector<16x16xi32>
    %208 = tpu.iota {dimensions = array<i32: 1>} : vector<16x16xi32>
    %c2_i32_61 = arith.constant 2 : i32
    %c0_i32_62 = arith.constant 0 : i32
    %209 = arith.cmpi eq, %c2_i32_61, %c0_i32_62 : i32
    %c1_i32_63 = arith.constant 1 : i32
    %210 = arith.select %209, %c1_i32_63, %c2_i32_61 : i32
    %211 = vector.broadcast %210 : i32 to vector<16x16xi32>
    %212 = arith.remsi %208, %211 : vector<16x16xi32>
    %c0_i32_64 = arith.constant 0 : i32
    %213 = vector.broadcast %c0_i32_64 : i32 to vector<16x16xi32>
    %214 = arith.cmpi ne, %212, %213 : vector<16x16xi32>
    %c0_i32_65 = arith.constant 0 : i32
    %215 = vector.broadcast %c0_i32_65 : i32 to vector<16x16xi32>
    %216 = arith.cmpi slt, %212, %215 : vector<16x16xi32>
    %c0_i32_66 = arith.constant 0 : i32
    %217 = arith.cmpi slt, %210, %c0_i32_66 : i32
    %218 = vector.broadcast %217 : i1 to vector<16x16xi1>
    %219 = vector.broadcast %218 : vector<16x16xi1> to vector<16x16xi1>
    %220 = arith.xori %216, %219 : vector<16x16xi1>
    %221 = arith.andi %220, %214 : vector<16x16xi1>
    %222 = vector.broadcast %210 : i32 to vector<16x16xi32>
    %223 = arith.addi %212, %222 : vector<16x16xi32>
    %224 = arith.select %221, %223, %212 : vector<16x16xi1>, vector<16x16xi32>
    %225 = arith.cmpi eq, %207, %224 : vector<16x16xi32>
    %cst_67 = arith.constant 0.000000e+00 : f32
    %cst_68 = arith.constant -1.000000e+09 : f32
    %226 = vector.broadcast %cst_67 : f32 to vector<16x16xf32>
    %227 = vector.broadcast %cst_68 : f32 to vector<16x16xf32>
    %228 = arith.select %225, %226, %227 : vector<16x16xi1>, vector<16x16xf32>
    %229 = vector.extract_strided_slice %5 {offsets = [7, 0], sizes = [1, 128], strides = [1, 1]} : vector<16x128xf32> to vector<1x128xf32>
    %230 = vector.extract_strided_slice %178 {offsets = [0, 0], sizes = [16, 32], strides = [1, 1]} : vector<16x128xf32> to vector<16x32xf32>
    %231 = arith.truncf %230 : vector<16x32xf32> to vector<16x32xbf16>
    %232 = vector.extract_strided_slice %186 {offsets = [0, 0], sizes = [16, 32], strides = [1, 1]} : vector<16x128xf32> to vector<16x32xf32>
    %233 = arith.truncf %232 : vector<16x32xf32> to vector<16x32xbf16>
    %234 = vector.extract_strided_slice %190 {offsets = [0, 0], sizes = [16, 32], strides = [1, 1]} : vector<16x128xf32> to vector<16x32xf32>
    %235 = arith.truncf %234 : vector<16x32xf32> to vector<16x32xbf16>
    %cst_69 = arith.constant dense<0.000000e+00> : vector<16x16xf32>
    %236 = tpu.matmul %231, %233, %cst_69 {dimension_numbers = #tpu.dot_dimension_numbers<[1], [1], [0], [0], [0, 0, 1, 0], [], []>} : vector<16x32xbf16>, vector<16x32xbf16>, vector<16x16xf32> -> vector<16x16xf32>
    %237 = arith.addf %236, %228 : vector<16x16xf32>
    %cst_70 = arith.constant dense<0xFF800000> : vector<16xf32>
    %238 = vector.multi_reduction <maximumf>, %237, %cst_70 [1] : vector<16x16xf32> to vector<16xf32>
    %239 = vector.shape_cast %238 : vector<16xf32> to vector<16x1xf32>
    %240 = vector.broadcast %239 : vector<16x1xf32> to vector<16x16xf32>
    %241 = arith.subf %237, %240 : vector<16x16xf32>
    %242 = math.exp %241 : vector<16x16xf32>
    %cst_71 = arith.constant dense<0.000000e+00> : vector<16xf32>
    %243 = vector.multi_reduction <add>, %242, %cst_71 [1] : vector<16x16xf32> to vector<16xf32>
    %244 = vector.shape_cast %243 : vector<16xf32> to vector<16x1xf32>
    %245 = tpu.reciprocal %244 {approx = true} : vector<16x1xf32> -> vector<16x1xf32>
    %246 = vector.broadcast %245 : vector<16x1xf32> to vector<16x16xf32>
    %247 = arith.mulf %242, %246 : vector<16x16xf32>
    %248 = arith.truncf %247 : vector<16x16xf32> to vector<16x16xbf16>
    %cst_72 = arith.constant dense<0.000000e+00> : vector<16x32xf32>
    %249 = tpu.matmul %248, %235, %cst_72 {dimension_numbers = #tpu.dot_dimension_numbers<[1], [0], [0], [1], [0, 0, 1, 1], [], []>} : vector<16x16xbf16>, vector<16x32xbf16>, vector<16x32xf32> -> vector<16x32xf32>
    %250 = vector.extract_strided_slice %178 {offsets = [0, 32], sizes = [16, 32], strides = [1, 1]} : vector<16x128xf32> to vector<16x32xf32>
    %251 = arith.truncf %250 : vector<16x32xf32> to vector<16x32xbf16>
    %252 = vector.extract_strided_slice %186 {offsets = [0, 32], sizes = [16, 32], strides = [1, 1]} : vector<16x128xf32> to vector<16x32xf32>
    %253 = arith.truncf %252 : vector<16x32xf32> to vector<16x32xbf16>
    %254 = vector.extract_strided_slice %190 {offsets = [0, 32], sizes = [16, 32], strides = [1, 1]} : vector<16x128xf32> to vector<16x32xf32>
    %255 = arith.truncf %254 : vector<16x32xf32> to vector<16x32xbf16>
    %cst_73 = arith.constant dense<0.000000e+00> : vector<16x16xf32>
    %256 = tpu.matmul %251, %253, %cst_73 {dimension_numbers = #tpu.dot_dimension_numbers<[1], [1], [0], [0], [0, 0, 1, 0], [], []>} : vector<16x32xbf16>, vector<16x32xbf16>, vector<16x16xf32> -> vector<16x16xf32>
    %257 = arith.addf %256, %228 : vector<16x16xf32>
    %cst_74 = arith.constant dense<0xFF800000> : vector<16xf32>
    %258 = vector.multi_reduction <maximumf>, %257, %cst_74 [1] : vector<16x16xf32> to vector<16xf32>
    %259 = vector.shape_cast %258 : vector<16xf32> to vector<16x1xf32>
    %260 = vector.broadcast %259 : vector<16x1xf32> to vector<16x16xf32>
    %261 = arith.subf %257, %260 : vector<16x16xf32>
    %262 = math.exp %261 : vector<16x16xf32>
    %cst_75 = arith.constant dense<0.000000e+00> : vector<16xf32>
    %263 = vector.multi_reduction <add>, %262, %cst_75 [1] : vector<16x16xf32> to vector<16xf32>
    %264 = vector.shape_cast %263 : vector<16xf32> to vector<16x1xf32>
    %265 = tpu.reciprocal %264 {approx = true} : vector<16x1xf32> -> vector<16x1xf32>
    %266 = vector.broadcast %265 : vector<16x1xf32> to vector<16x16xf32>
    %267 = arith.mulf %262, %266 : vector<16x16xf32>
    %268 = arith.truncf %267 : vector<16x16xf32> to vector<16x16xbf16>
    %cst_76 = arith.constant dense<0.000000e+00> : vector<16x32xf32>
    %269 = tpu.matmul %268, %255, %cst_76 {dimension_numbers = #tpu.dot_dimension_numbers<[1], [0], [0], [1], [0, 0, 1, 1], [], []>} : vector<16x16xbf16>, vector<16x32xbf16>, vector<16x32xf32> -> vector<16x32xf32>
    %270 = vector.extract_strided_slice %178 {offsets = [0, 64], sizes = [16, 32], strides = [1, 1]} : vector<16x128xf32> to vector<16x32xf32>
    %271 = arith.truncf %270 : vector<16x32xf32> to vector<16x32xbf16>
    %272 = vector.extract_strided_slice %186 {offsets = [0, 64], sizes = [16, 32], strides = [1, 1]} : vector<16x128xf32> to vector<16x32xf32>
    %273 = arith.truncf %272 : vector<16x32xf32> to vector<16x32xbf16>
    %274 = vector.extract_strided_slice %190 {offsets = [0, 64], sizes = [16, 32], strides = [1, 1]} : vector<16x128xf32> to vector<16x32xf32>
    %275 = arith.truncf %274 : vector<16x32xf32> to vector<16x32xbf16>
    %cst_77 = arith.constant dense<0.000000e+00> : vector<16x16xf32>
    %276 = tpu.matmul %271, %273, %cst_77 {dimension_numbers = #tpu.dot_dimension_numbers<[1], [1], [0], [0], [0, 0, 1, 0], [], []>} : vector<16x32xbf16>, vector<16x32xbf16>, vector<16x16xf32> -> vector<16x16xf32>
    %277 = arith.addf %276, %228 : vector<16x16xf32>
    %cst_78 = arith.constant dense<0xFF800000> : vector<16xf32>
    %278 = vector.multi_reduction <maximumf>, %277, %cst_78 [1] : vector<16x16xf32> to vector<16xf32>
    %279 = vector.shape_cast %278 : vector<16xf32> to vector<16x1xf32>
    %280 = vector.broadcast %279 : vector<16x1xf32> to vector<16x16xf32>
    %281 = arith.subf %277, %280 : vector<16x16xf32>
    %282 = math.exp %281 : vector<16x16xf32>
    %cst_79 = arith.constant dense<0.000000e+00> : vector<16xf32>
    %283 = vector.multi_reduction <add>, %282, %cst_79 [1] : vector<16x16xf32> to vector<16xf32>
    %284 = vector.shape_cast %283 : vector<16xf32> to vector<16x1xf32>
    %285 = tpu.reciprocal %284 {approx = true} : vector<16x1xf32> -> vector<16x1xf32>
    %286 = vector.broadcast %285 : vector<16x1xf32> to vector<16x16xf32>
    %287 = arith.mulf %282, %286 : vector<16x16xf32>
    %288 = arith.truncf %287 : vector<16x16xf32> to vector<16x16xbf16>
    %cst_80 = arith.constant dense<0.000000e+00> : vector<16x32xf32>
    %289 = tpu.matmul %288, %275, %cst_80 {dimension_numbers = #tpu.dot_dimension_numbers<[1], [0], [0], [1], [0, 0, 1, 1], [], []>} : vector<16x16xbf16>, vector<16x32xbf16>, vector<16x32xf32> -> vector<16x32xf32>
    %290 = vector.extract_strided_slice %178 {offsets = [0, 96], sizes = [16, 32], strides = [1, 1]} : vector<16x128xf32> to vector<16x32xf32>
    %291 = arith.truncf %290 : vector<16x32xf32> to vector<16x32xbf16>
    %292 = vector.extract_strided_slice %186 {offsets = [0, 96], sizes = [16, 32], strides = [1, 1]} : vector<16x128xf32> to vector<16x32xf32>
    %293 = arith.truncf %292 : vector<16x32xf32> to vector<16x32xbf16>
    %294 = vector.extract_strided_slice %190 {offsets = [0, 96], sizes = [16, 32], strides = [1, 1]} : vector<16x128xf32> to vector<16x32xf32>
    %295 = arith.truncf %294 : vector<16x32xf32> to vector<16x32xbf16>
    %cst_81 = arith.constant dense<0.000000e+00> : vector<16x16xf32>
    %296 = tpu.matmul %291, %293, %cst_81 {dimension_numbers = #tpu.dot_dimension_numbers<[1], [1], [0], [0], [0, 0, 1, 0], [], []>} : vector<16x32xbf16>, vector<16x32xbf16>, vector<16x16xf32> -> vector<16x16xf32>
    %297 = arith.addf %296, %228 : vector<16x16xf32>
    %cst_82 = arith.constant dense<0xFF800000> : vector<16xf32>
    %298 = vector.multi_reduction <maximumf>, %297, %cst_82 [1] : vector<16x16xf32> to vector<16xf32>
    %299 = vector.shape_cast %298 : vector<16xf32> to vector<16x1xf32>
    %300 = vector.broadcast %299 : vector<16x1xf32> to vector<16x16xf32>
    %301 = arith.subf %297, %300 : vector<16x16xf32>
    %302 = math.exp %301 : vector<16x16xf32>
    %cst_83 = arith.constant dense<0.000000e+00> : vector<16xf32>
    %303 = vector.multi_reduction <add>, %302, %cst_83 [1] : vector<16x16xf32> to vector<16xf32>
    %304 = vector.shape_cast %303 : vector<16xf32> to vector<16x1xf32>
    %305 = tpu.reciprocal %304 {approx = true} : vector<16x1xf32> -> vector<16x1xf32>
    %306 = vector.broadcast %305 : vector<16x1xf32> to vector<16x16xf32>
    %307 = arith.mulf %302, %306 : vector<16x16xf32>
    %308 = arith.truncf %307 : vector<16x16xf32> to vector<16x16xbf16>
    %cst_84 = arith.constant dense<0.000000e+00> : vector<16x32xf32>
    %309 = tpu.matmul %308, %295, %cst_84 {dimension_numbers = #tpu.dot_dimension_numbers<[1], [0], [0], [1], [0, 0, 1, 1], [], []>} : vector<16x16xbf16>, vector<16x32xbf16>, vector<16x32xf32> -> vector<16x32xf32>
    %310 = tpu.concatenate %249, %269, %289, %309 in 1 : vector<16x32xf32>, vector<16x32xf32>, vector<16x32xf32>, vector<16x32xf32> -> vector<16x128xf32>
    %311 = arith.truncf %310 : vector<16x128xf32> to vector<16x128xbf16>
    %c0_85 = arith.constant 0 : index
    %c0_86 = arith.constant 0 : index
    %c0_87 = arith.constant 0 : index
    %312 = vector.load %arg7[%c0_85, %c0_86, %c0_87] : memref<1x128x128xbf16, #tpu.memory_space<vmem>>, vector<1x128x128xbf16>
    %313 = vector.shape_cast %312 : vector<1x128x128xbf16> to vector<128x128xbf16>
    %cst_88 = arith.constant dense<0.000000e+00> : vector<16x128xf32>
    %314 = tpu.matmul %311, %313, %cst_88 {dimension_numbers = #tpu.dot_dimension_numbers<[1], [0], [0], [1], [0, 0, 1, 1], [], []>} : vector<16x128xbf16>, vector<128x128xbf16>, vector<16x128xf32> -> vector<16x128xf32>
    %315 = vector.broadcast %229 : vector<1x128xf32> to vector<16x128xf32>
    %316 = arith.addf %314, %315 : vector<16x128xf32>
    %317 = vector.extract_strided_slice %5 {offsets = [11, 0], sizes = [1, 128], strides = [1, 1]} : vector<16x128xf32> to vector<1x128xf32>
    %318 = vector.extract_strided_slice %5 {offsets = [12, 0], sizes = [1, 128], strides = [1, 1]} : vector<16x128xf32> to vector<1x128xf32>
    %319 = arith.addf %170, %316 : vector<16x128xf32>
    %cst_89 = arith.constant dense<0.000000e+00> : vector<16xf32>
    %320 = vector.multi_reduction <add>, %319, %cst_89 [1] : vector<16x128xf32> to vector<16xf32>
    %321 = vector.shape_cast %320 : vector<16xf32> to vector<16x1xf32>
    %cst_90 = arith.constant 1.280000e+02 : f32
    %322 = vector.broadcast %cst_90 : f32 to vector<16x1xf32>
    %323 = arith.divf %321, %322 : vector<16x1xf32>
    %324 = vector.broadcast %323 : vector<16x1xf32> to vector<16x128xf32>
    %325 = arith.subf %319, %324 : vector<16x128xf32>
    %326 = arith.mulf %325, %325 : vector<16x128xf32>
    %cst_91 = arith.constant dense<0.000000e+00> : vector<16xf32>
    %327 = vector.multi_reduction <add>, %326, %cst_91 [1] : vector<16x128xf32> to vector<16xf32>
    %328 = vector.shape_cast %327 : vector<16xf32> to vector<16x1xf32>
    %cst_92 = arith.constant 1.280000e+02 : f32
    %329 = vector.broadcast %cst_92 : f32 to vector<16x1xf32>
    %330 = arith.divf %328, %329 : vector<16x1xf32>
    %cst_93 = arith.constant 9.99999974E-6 : f32
    %331 = vector.broadcast %cst_93 : f32 to vector<16x1xf32>
    %332 = arith.addf %330, %331 : vector<16x1xf32>
    %333 = math.rsqrt %332 : vector<16x1xf32>
    %334 = vector.broadcast %333 : vector<16x1xf32> to vector<16x128xf32>
    %335 = arith.mulf %325, %334 : vector<16x128xf32>
    %336 = vector.broadcast %317 : vector<1x128xf32> to vector<16x128xf32>
    %337 = arith.mulf %335, %336 : vector<16x128xf32>
    %338 = vector.broadcast %318 : vector<1x128xf32> to vector<16x128xf32>
    %339 = arith.addf %337, %338 : vector<16x128xf32>
    %340 = arith.truncf %339 : vector<16x128xf32> to vector<16x128xbf16>
    %cst_94 = arith.constant 0.000000e+00 : f32
    %341 = vector.broadcast %cst_94 : f32 to vector<16x128xf32>
    %c0_95 = arith.constant 0 : index
    %c0_96 = arith.constant 0 : index
    %c0_97 = arith.constant 0 : index
    %342 = vector.load %arg8[%c0_95, %c0_96, %c0_97] : memref<1x128x2048xbf16, #tpu.memory_space<vmem>>, vector<1x128x512xbf16>
    %343 = vector.shape_cast %342 : vector<1x128x512xbf16> to vector<128x512xbf16>
    %cst_98 = arith.constant dense<0.000000e+00> : vector<16x512xf32>
    %344 = tpu.matmul %340, %343, %cst_98 {dimension_numbers = #tpu.dot_dimension_numbers<[1], [0], [0], [1], [0, 0, 1, 1], [], []>} : vector<16x128xbf16>, vector<128x512xbf16>, vector<16x512xf32> -> vector<16x512xf32>
    %c0_99 = arith.constant 0 : index
    %c0_100 = arith.constant 0 : index
    %c0_101 = arith.constant 0 : index
    %345 = vector.load %arg9[%c0_99, %c0_100, %c0_101] : memref<1x1x2048xf32, #tpu.memory_space<vmem>>, vector<1x1x512xf32>
    %346 = vector.shape_cast %345 : vector<1x1x512xf32> to vector<1x512xf32>
    %347 = vector.broadcast %346 : vector<1x512xf32> to vector<16x512xf32>
    %348 = arith.addf %344, %347 : vector<16x512xf32>
    %cst_102 = arith.constant 0.000000e+00 : f32
    %349 = vector.broadcast %cst_102 : f32 to vector<16x512xf32>
    %350 = arith.maximumf %348, %349 : vector<16x512xf32>
    %351 = arith.truncf %350 : vector<16x512xf32> to vector<16x512xbf16>
    %c0_103 = arith.constant 0 : index
    %c0_104 = arith.constant 0 : index
    %c0_105 = arith.constant 0 : index
    %352 = vector.load %arg10[%c0_103, %c0_104, %c0_105] : memref<1x2048x128xbf16, #tpu.memory_space<vmem>>, vector<1x512x128xbf16>
    %353 = vector.shape_cast %352 : vector<1x512x128xbf16> to vector<512x128xbf16>
    %cst_106 = arith.constant dense<0.000000e+00> : vector<16x128xf32>
    %354 = tpu.matmul %351, %353, %cst_106 {dimension_numbers = #tpu.dot_dimension_numbers<[1], [0], [0], [1], [0, 0, 1, 1], [], []>} : vector<16x512xbf16>, vector<512x128xbf16>, vector<16x128xf32> -> vector<16x128xf32>
    %355 = arith.addf %341, %354 : vector<16x128xf32>
    %c0_107 = arith.constant 0 : index
    %c0_108 = arith.constant 0 : index
    %c512 = arith.constant 512 : index
    %356 = vector.load %arg8[%c0_107, %c0_108, %c512] : memref<1x128x2048xbf16, #tpu.memory_space<vmem>>, vector<1x128x512xbf16>
    %357 = vector.shape_cast %356 : vector<1x128x512xbf16> to vector<128x512xbf16>
    %cst_109 = arith.constant dense<0.000000e+00> : vector<16x512xf32>
    %358 = tpu.matmul %340, %357, %cst_109 {dimension_numbers = #tpu.dot_dimension_numbers<[1], [0], [0], [1], [0, 0, 1, 1], [], []>} : vector<16x128xbf16>, vector<128x512xbf16>, vector<16x512xf32> -> vector<16x512xf32>
    %c0_110 = arith.constant 0 : index
    %c0_111 = arith.constant 0 : index
    %c512_112 = arith.constant 512 : index
    %359 = vector.load %arg9[%c0_110, %c0_111, %c512_112] : memref<1x1x2048xf32, #tpu.memory_space<vmem>>, vector<1x1x512xf32>
    %360 = vector.shape_cast %359 : vector<1x1x512xf32> to vector<1x512xf32>
    %361 = vector.broadcast %360 : vector<1x512xf32> to vector<16x512xf32>
    %362 = arith.addf %358, %361 : vector<16x512xf32>
    %cst_113 = arith.constant 0.000000e+00 : f32
    %363 = vector.broadcast %cst_113 : f32 to vector<16x512xf32>
    %364 = arith.maximumf %362, %363 : vector<16x512xf32>
    %365 = arith.truncf %364 : vector<16x512xf32> to vector<16x512xbf16>
    %c0_114 = arith.constant 0 : index
    %c512_115 = arith.constant 512 : index
    %c0_116 = arith.constant 0 : index
    %366 = vector.load %arg10[%c0_114, %c512_115, %c0_116] : memref<1x2048x128xbf16, #tpu.memory_space<vmem>>, vector<1x512x128xbf16>
    %367 = vector.shape_cast %366 : vector<1x512x128xbf16> to vector<512x128xbf16>
    %cst_117 = arith.constant dense<0.000000e+00> : vector<16x128xf32>
    %368 = tpu.matmul %365, %367, %cst_117 {dimension_numbers = #tpu.dot_dimension_numbers<[1], [0], [0], [1], [0, 0, 1, 1], [], []>} : vector<16x512xbf16>, vector<512x128xbf16>, vector<16x128xf32> -> vector<16x128xf32>
    %369 = arith.addf %355, %368 : vector<16x128xf32>
    %c0_118 = arith.constant 0 : index
    %c0_119 = arith.constant 0 : index
    %c1024 = arith.constant 1024 : index
    %370 = vector.load %arg8[%c0_118, %c0_119, %c1024] : memref<1x128x2048xbf16, #tpu.memory_space<vmem>>, vector<1x128x512xbf16>
    %371 = vector.shape_cast %370 : vector<1x128x512xbf16> to vector<128x512xbf16>
    %cst_120 = arith.constant dense<0.000000e+00> : vector<16x512xf32>
    %372 = tpu.matmul %340, %371, %cst_120 {dimension_numbers = #tpu.dot_dimension_numbers<[1], [0], [0], [1], [0, 0, 1, 1], [], []>} : vector<16x128xbf16>, vector<128x512xbf16>, vector<16x512xf32> -> vector<16x512xf32>
    %c0_121 = arith.constant 0 : index
    %c0_122 = arith.constant 0 : index
    %c1024_123 = arith.constant 1024 : index
    %373 = vector.load %arg9[%c0_121, %c0_122, %c1024_123] : memref<1x1x2048xf32, #tpu.memory_space<vmem>>, vector<1x1x512xf32>
    %374 = vector.shape_cast %373 : vector<1x1x512xf32> to vector<1x512xf32>
    %375 = vector.broadcast %374 : vector<1x512xf32> to vector<16x512xf32>
    %376 = arith.addf %372, %375 : vector<16x512xf32>
    %cst_124 = arith.constant 0.000000e+00 : f32
    %377 = vector.broadcast %cst_124 : f32 to vector<16x512xf32>
    %378 = arith.maximumf %376, %377 : vector<16x512xf32>
    %379 = arith.truncf %378 : vector<16x512xf32> to vector<16x512xbf16>
    %c0_125 = arith.constant 0 : index
    %c1024_126 = arith.constant 1024 : index
    %c0_127 = arith.constant 0 : index
    %380 = vector.load %arg10[%c0_125, %c1024_126, %c0_127] : memref<1x2048x128xbf16, #tpu.memory_space<vmem>>, vector<1x512x128xbf16>
    %381 = vector.shape_cast %380 : vector<1x512x128xbf16> to vector<512x128xbf16>
    %cst_128 = arith.constant dense<0.000000e+00> : vector<16x128xf32>
    %382 = tpu.matmul %379, %381, %cst_128 {dimension_numbers = #tpu.dot_dimension_numbers<[1], [0], [0], [1], [0, 0, 1, 1], [], []>} : vector<16x512xbf16>, vector<512x128xbf16>, vector<16x128xf32> -> vector<16x128xf32>
    %383 = arith.addf %369, %382 : vector<16x128xf32>
    %c0_129 = arith.constant 0 : index
    %c0_130 = arith.constant 0 : index
    %c1536 = arith.constant 1536 : index
    %384 = vector.load %arg8[%c0_129, %c0_130, %c1536] : memref<1x128x2048xbf16, #tpu.memory_space<vmem>>, vector<1x128x512xbf16>
    %385 = vector.shape_cast %384 : vector<1x128x512xbf16> to vector<128x512xbf16>
    %cst_131 = arith.constant dense<0.000000e+00> : vector<16x512xf32>
    %386 = tpu.matmul %340, %385, %cst_131 {dimension_numbers = #tpu.dot_dimension_numbers<[1], [0], [0], [1], [0, 0, 1, 1], [], []>} : vector<16x128xbf16>, vector<128x512xbf16>, vector<16x512xf32> -> vector<16x512xf32>
    %c0_132 = arith.constant 0 : index
    %c0_133 = arith.constant 0 : index
    %c1536_134 = arith.constant 1536 : index
    %387 = vector.load %arg9[%c0_132, %c0_133, %c1536_134] : memref<1x1x2048xf32, #tpu.memory_space<vmem>>, vector<1x1x512xf32>
    %388 = vector.shape_cast %387 : vector<1x1x512xf32> to vector<1x512xf32>
    %389 = vector.broadcast %388 : vector<1x512xf32> to vector<16x512xf32>
    %390 = arith.addf %386, %389 : vector<16x512xf32>
    %cst_135 = arith.constant 0.000000e+00 : f32
    %391 = vector.broadcast %cst_135 : f32 to vector<16x512xf32>
    %392 = arith.maximumf %390, %391 : vector<16x512xf32>
    %393 = arith.truncf %392 : vector<16x512xf32> to vector<16x512xbf16>
    %c0_136 = arith.constant 0 : index
    %c1536_137 = arith.constant 1536 : index
    %c0_138 = arith.constant 0 : index
    %394 = vector.load %arg10[%c0_136, %c1536_137, %c0_138] : memref<1x2048x128xbf16, #tpu.memory_space<vmem>>, vector<1x512x128xbf16>
    %395 = vector.shape_cast %394 : vector<1x512x128xbf16> to vector<512x128xbf16>
    %cst_139 = arith.constant dense<0.000000e+00> : vector<16x128xf32>
    %396 = tpu.matmul %393, %395, %cst_139 {dimension_numbers = #tpu.dot_dimension_numbers<[1], [0], [0], [1], [0, 0, 1, 1], [], []>} : vector<16x512xbf16>, vector<512x128xbf16>, vector<16x128xf32> -> vector<16x128xf32>
    %397 = arith.addf %383, %396 : vector<16x128xf32>
    %398 = vector.extract_strided_slice %5 {offsets = [8, 0], sizes = [1, 128], strides = [1, 1]} : vector<16x128xf32> to vector<1x128xf32>
    %399 = vector.broadcast %398 : vector<1x128xf32> to vector<16x128xf32>
    %400 = arith.addf %397, %399 : vector<16x128xf32>
    %401 = vector.extract_strided_slice %5 {offsets = [13, 0], sizes = [1, 128], strides = [1, 1]} : vector<16x128xf32> to vector<1x128xf32>
    %402 = vector.extract_strided_slice %5 {offsets = [14, 0], sizes = [1, 128], strides = [1, 1]} : vector<16x128xf32> to vector<1x128xf32>
    %403 = arith.addf %339, %400 : vector<16x128xf32>
    %cst_140 = arith.constant dense<0.000000e+00> : vector<16xf32>
    %404 = vector.multi_reduction <add>, %403, %cst_140 [1] : vector<16x128xf32> to vector<16xf32>
    %405 = vector.shape_cast %404 : vector<16xf32> to vector<16x1xf32>
    %cst_141 = arith.constant 1.280000e+02 : f32
    %406 = vector.broadcast %cst_141 : f32 to vector<16x1xf32>
    %407 = arith.divf %405, %406 : vector<16x1xf32>
    %408 = vector.broadcast %407 : vector<16x1xf32> to vector<16x128xf32>
    %409 = arith.subf %403, %408 : vector<16x128xf32>
    %410 = arith.mulf %409, %409 : vector<16x128xf32>
    %cst_142 = arith.constant dense<0.000000e+00> : vector<16xf32>
    %411 = vector.multi_reduction <add>, %410, %cst_142 [1] : vector<16x128xf32> to vector<16xf32>
    %412 = vector.shape_cast %411 : vector<16xf32> to vector<16x1xf32>
    %cst_143 = arith.constant 1.280000e+02 : f32
    %413 = vector.broadcast %cst_143 : f32 to vector<16x1xf32>
    %414 = arith.divf %412, %413 : vector<16x1xf32>
    %cst_144 = arith.constant 9.99999974E-6 : f32
    %415 = vector.broadcast %cst_144 : f32 to vector<16x1xf32>
    %416 = arith.addf %414, %415 : vector<16x1xf32>
    %417 = math.rsqrt %416 : vector<16x1xf32>
    %418 = vector.broadcast %417 : vector<16x1xf32> to vector<16x128xf32>
    %419 = arith.mulf %409, %418 : vector<16x128xf32>
    %420 = vector.broadcast %401 : vector<1x128xf32> to vector<16x128xf32>
    %421 = arith.mulf %419, %420 : vector<16x128xf32>
    %422 = vector.broadcast %402 : vector<1x128xf32> to vector<16x128xf32>
    %423 = arith.addf %421, %422 : vector<16x128xf32>
    %c0_145 = arith.constant 0 : index
    %c0_146 = arith.constant 0 : index
    %424 = vector.load %arg15[%c0_145, %c0_146] : memref<16x128xf32, #tpu.memory_space<vmem>>, vector<16x128xf32>
    tpu.vector_store %arg15[%c0_145, %c0_146], %423 {strides = array<i32>} : memref<16x128xf32, #tpu.memory_space<vmem>>, vector<16x128xf32>,
    %c1_i32_147 = arith.constant 1 : i32
    %425 = arith.cmpi eq, %arg0, %c1_i32_147 : i32
    %426 = arith.extui %425 : i1 to i32
    %c0_i32_148 = arith.constant 0 : i32
    %427 = arith.cmpi ne, %426, %c0_i32_148 : i32
    scf.if %427 {
      %428 = arith.truncf %423 : vector<16x128xf32> to vector<16x128xbf16>
      %c0_149 = arith.constant 0 : index
      %c0_150 = arith.constant 0 : index
      %429 = vector.load %arg12[%c0_149, %c0_150] : memref<128x128xbf16, #tpu.memory_space<vmem>>, vector<128x128xbf16>
      %cst_151 = arith.constant dense<0.000000e+00> : vector<16x128xf32>
      %430 = tpu.matmul %428, %429, %cst_151 {dimension_numbers = #tpu.dot_dimension_numbers<[1], [0], [0], [1], [0, 0, 1, 1], [], []>} : vector<16x128xbf16>, vector<128x128xbf16>, vector<16x128xf32> -> vector<16x128xf32>
      %c0_152 = arith.constant 0 : index
      %c0_153 = arith.constant 0 : index
      %431 = vector.load %arg13[%c0_152, %c0_153] : memref<1x128xf32, #tpu.memory_space<vmem>>, vector<1x128xf32>
      %432 = vector.broadcast %431 : vector<1x128xf32> to vector<16x128xf32>
      %433 = arith.addf %430, %432 : vector<16x128xf32>
      %c0_154 = arith.constant 0 : index
      %c0_155 = arith.constant 0 : index
      %434 = vector.load %arg14[%c0_154, %c0_155] : memref<16x128xf32, #tpu.memory_space<vmem>>, vector<16x128xf32>
      tpu.vector_store %arg14[%c0_154, %c0_155], %433 {strides = array<i32>} : memref<16x128xf32, #tpu.memory_space<vmem>>, vector<16x128xf32>,
    } else {
    }
    return
  }
  func.func @transform_0(%arg0: i32) -> (i32, i32) {
    %c0_i32 = arith.constant 0 : i32
    %c0_i32_0 = arith.constant 0 : i32
    %c0_i32_1 = arith.constant 0 : i32
    return %c0_i32, %c0_i32_0 : i32, i32
  }
  func.func @transform_1(%arg0: i32) -> (i32, i32) {
    %c0_i32 = arith.constant 0 : i32
    %c0_i32_0 = arith.constant 0 : i32
    %c0_i32_1 = arith.constant 0 : i32
    return %c0_i32, %c0_i32_0 : i32, i32
  }
  func.func @transform_2(%arg0: i32) -> (i32, i32, i32) {
    %c0_i32 = arith.constant 0 : i32
    %c0_i32_0 = arith.constant 0 : i32
    %c0_i32_1 = arith.constant 0 : i32
    return %arg0, %c0_i32, %c0_i32_0 : i32, i32, i32
  }
  func.func @transform_3(%arg0: i32) -> (i32, i32, i32) {
    %c0_i32 = arith.constant 0 : i32
    %c0_i32_0 = arith.constant 0 : i32
    %c0_i32_1 = arith.constant 0 : i32
    return %arg0, %c0_i32, %c0_i32_0 : i32, i32, i32
  }
  func.func @transform_4(%arg0: i32) -> (i32, i32, i32) {
    %c0_i32 = arith.constant 0 : i32
    %c0_i32_0 = arith.constant 0 : i32
    %c0_i32_1 = arith.constant 0 : i32
    return %arg0, %c0_i32, %c0_i32_0 : i32, i32, i32
  }
  func.func @transform_5(%arg0: i32) -> (i32, i32, i32) {
    %c0_i32 = arith.constant 0 : i32
    %c0_i32_0 = arith.constant 0 : i32
    %c0_i32_1 = arith.constant 0 : i32
    return %arg0, %c0_i32, %c0_i32_0 : i32, i32, i32
  }
  func.func @transform_6(%arg0: i32) -> (i32, i32, i32) {
    %c0_i32 = arith.constant 0 : i32
    %c0_i32_0 = arith.constant 0 : i32
    %c0_i32_1 = arith.constant 0 : i32
    return %arg0, %c0_i32, %c0_i32_0 : i32, i32, i32
  }
  func.func @transform_7(%arg0: i32) -> (i32, i32, i32) {
    %c0_i32 = arith.constant 0 : i32
    %c0_i32_0 = arith.constant 0 : i32
    %c0_i32_1 = arith.constant 0 : i32
    return %arg0, %c0_i32, %c0_i32_0 : i32, i32, i32
  }
  func.func @transform_8(%arg0: i32) -> (i32, i32, i32) {
    %c0_i32 = arith.constant 0 : i32
    %c0_i32_0 = arith.constant 0 : i32
    %c0_i32_1 = arith.constant 0 : i32
    return %arg0, %c0_i32, %c0_i32_0 : i32, i32, i32
  }
  func.func @transform_9(%arg0: i32) -> (i32, i32, i32) {
    %c0_i32 = arith.constant 0 : i32
    %c0_i32_0 = arith.constant 0 : i32
    %c0_i32_1 = arith.constant 0 : i32
    return %arg0, %c0_i32, %c0_i32_0 : i32, i32, i32
  }
  func.func @transform_10(%arg0: i32) -> (i32, i32, i32) {
    %c0_i32 = arith.constant 0 : i32
    %c0_i32_0 = arith.constant 0 : i32
    %c0_i32_1 = arith.constant 0 : i32
    return %arg0, %c0_i32, %c0_i32_0 : i32, i32, i32
  }
  func.func @transform_11(%arg0: i32) -> (i32, i32) {
    %c0_i32 = arith.constant 0 : i32
    %c0_i32_0 = arith.constant 0 : i32
    %c0_i32_1 = arith.constant 0 : i32
    return %c0_i32, %c0_i32_0 : i32, i32
  }
  func.func @transform_12(%arg0: i32) -> (i32, i32) {
    %c0_i32 = arith.constant 0 : i32
    %c0_i32_0 = arith.constant 0 : i32
    %c0_i32_1 = arith.constant 0 : i32
    return %c0_i32, %c0_i32_0 : i32, i32
  }
  func.func @transform_13(%arg0: i32) -> (i32, i32) {
    %c0_i32 = arith.constant 0 : i32
    %c0_i32_0 = arith.constant 0 : i32
    %c0_i32_1 = arith.constant 0 : i32
    return %c0_i32, %c0_i32_0 : i32, i32
  }
}

</mosaic_0001>

<bundles_post_ra>
// kernel: transformer_decoder_forward.1
= control target key start
LH: loop header
LB: loop body
LE: loop exit
PB: predicated region body
PF: predicated region fallthrough
CT: control target
= control target key end

     0   :  { %s8245_s0 = inlined_call_operand.vmem [shape: f32[16,128], index: 0, kind: input, shape index: {}]   ;;  %s8246_s1 = inlined_call_operand.hbm [shape: f32[16,128], index: 1, kind: input, shape index: {}]   ;;  %s8247_s2 = inlined_call_operand.hbm [shape: bf16[2,128,384], index: 2, kind: input, shape index: {}]   ;;  %s8248_s3 = inlined_call_operand.vmem [shape: bf16[2,128,128], index: 3, kind: input, shape index: {}]   ;;  %s8249_s4 = inlined_call_operand.hbm [shape: bf16[2,128,128], index: 4, kind: input, shape index: {}]   ;;  %s8250_s5 = inlined_call_operand.hbm [shape: bf16[2,128,256], index: 5, kind: input, shape index: {}]   ;;  %s8251_s6 = inlined_call_operand.hbm [shape: bf16[2,128,128], index: 6, kind: input, shape index: {}]   ;;  %s8252_s7 = inlined_call_operand.hbm [shape: bf16[2,128,2048], index: 7, kind: input, shape index: {}]   ;;  %s8253_s8 = inlined_call_operand.vmem [shape: f32[2,1,2048], index: 8, kind: input, shape index: {}]   ;;  %s8254_s9 = inlined_call_operand.hbm [shape: bf16[2,2048,128], index: 9, kind: input, shape index: {}]   ;;  %s8255_s10 = inlined_call_operand.hbm [shape: f32[2,16,128], index: 10, kind: input, shape index: {}]   ;;  %s8256_s11 = inlined_call_operand.vmem [shape: bf16[128,128], index: 11, kind: input, shape index: {}]   ;;  %s8257_s12 = inlined_call_operand.vmem [shape: f32[1,128], index: 12, kind: input, shape index: {}]   ;;  %s8258_s13 = inlined_call_operand.hbm [shape: f32[16,128], index: 13, kind: output, shape index: {}]  }
   0x1   :  { %8274 = sst [smem:[#allocation28_spill]] %s8245_s0 }
   0x2   :  { %8275 = sst [smem:[#allocation29_spill]] %s8246_s1 }
   0x3   :  { %8276 = sst [smem:[#allocation30_spill]] %s8247_s2 }
   0x4   :  { %8277 = sst [smem:[#allocation31_spill]] %s8248_s3 }
   0x5   :  { %8278 = sst [smem:[#allocation32_spill]] %s8249_s4 }
   0x6   :  { %8279 = sst [smem:[#allocation33_spill]] %s8250_s5 }
   0x7   :  { %8280 = sst [smem:[#allocation34_spill]] %s8252_s7 }
   0x8   :  { %8281 = sst [smem:[#allocation35_spill]] %s8253_s8 }
   0x9   :  { %8282 = sst [smem:[#allocation36_spill]] %s8256_s11 }
   0xa   :  { %8283 = sst [smem:[#allocation37_spill]] %s8257_s12 }
   0xb   :  { %8284 = sst [smem:[#allocation38_spill]] %s8258_s13 }
   0xc   :  { %18 = vsyncpa [#allocation4], 0 }
   0xd   :  { %19 = vsyncpa [#allocation7], 0 }
   0xe   :  { %21 = vsyncpa [#allocation7 + $0x1], 0 }
   0xf   :  { %22 = vsyncpa [#allocation10], 0 }
  0x10   :  { %24 = vsyncpa [#allocation10 + $0x1], 0 }
  0x11   :  { %25 = vsyncpa [#allocation13], 0 }
  0x12   :  { %27 = vsyncpa [#allocation13 + $0x1], 0 }
  0x13   :  { %28 = vsyncpa [#allocation16], 0 }
  0x14   :  { %30 = vsyncpa [#allocation16 + $0x1], 0 }
  0x15   :  { %31 = vsyncpa [#allocation5], 0  ;;  %s7120_s25 = smov 0   ;;  %s7122_s26 = smov 0  }
  0x16   :  { %s7124_s27 = smov 0   ;;  %s7126_s28 = smov 0  }
  0x17 LB: > { %8285 = sst [smem:[#allocation24_spill]] %s7028_s27  ;;  %s7141_s29 = sadd.s32 1, %s7032_s28   ;;  %s7032_s28 = sphi %s7126_s28, %s8313_s28   ;;  %s7028_s27 = sphi %s7124_s27, %s8315_s27   ;;  %s7024_s26 = sphi %s7122_s26, %s8317_s26   ;;  %s7020_s25 = sphi %s7120_s25, %s8316_s25  }
  0x18   : > { %8286 = sst [smem:[#allocation25_spill]] %s7141_s29  ;;  %s86_s30 = sadd.s32 1, %s7028_s27 }
  0x19   : > { %s83_s14 = ssub.s32 %s7032_s28, %s7141_s29  ;;  %p93_p0 = scmp.ne.s32.totalorder %s7028_s27, %s7024_s26 }
  0x1a   : > { %p84_p1 = scmp.eq.s32.totalorder %s83_s14, 0  ;;  %p94_p2 = scmp.eq.s32.totalorder %s7032_s28, 0 }
  0x1b   : > { %p6546_p3 = scmp.lt.s32.totalorder %s7032_s28, 2  ;;  %s7154_s16 = sand.u32 1, %s7032_s28  }
  0x1c   : > { %s7151_s15 = scalar_select %p84_p1, %s7028_s27, %s86_s30  }
  0x1d   : > { %p95_p4 = por %p94_p2, %p93_p0  ;;  %s7157_s17 = sand.u32 1, %s7028_s27  }
  0x1e   : > { %8287 = sst [smem:[#allocation26_spill]] %s7151_s15  ;;  %s6494_s18 = smul.u32 192, %s7157_s17 }
  0x1f   : > { %p7160_p5 = pnand %p6546_p3, %p95_p4  ;;  %s6495_s20 = smul.u32 192, %s7032_s28 }
  0x20   : > { %s8289_s2 = sld [smem:[#allocation30_spill]]  ;;  %s421_s24 = scalar_lea.vmem [#allocation6], %s6494_s18 }
  0x21   : > { %s429_s30 = sshll.u32 %s421_s24, 4  ;;  %p7171_p7 = pneg %p7160_p5  ;;  %s430_s30 = int_to_ptr.vmem [resolvable:$true] %s429_s30 }
  0x26   : > { %s426_s23 = scalar_lea.hbm %s8289_s2, %s6495_s20  ;;  %s6717_s21 = scalar_lea.hbm %s8289_s2, 384 }
  0x27   : > { %s427_s14 = sshll.u32 %s426_s23, 4  ;;  %s428_s14 = int_to_ptr.hbm [resolvable:$true] %s427_s14 }
  0x28   : > { %s6710_s27 = sshra.s32 %s428_s14, 4  ;;  %s6711_s27 = int_to_ptr.hbm [resolvable:$true] %s6710_s27 }
  0x29   : > { %s6712_s29 = scalar_lea.hbm %s6711_s27, 192  ;;  %p6718_p10 = scmp.lt.s32.totalorder %s6711_s27, %s8289_s2 }
  0x2a   : > { %p6713_p6 = scmp.ne.s32.totalorder %s6711_s27, %s6712_s29  ;;  %p6719_p11 = scmp.lt.s32.totalorder %s6717_s21, %s6712_s29 }
  0x2c   : > { %p6715_p8 = pnand %p7171_p7, %p6713_p6  ;;  %p6720_p12 = por %p6719_p11, %p6718_p10 }
  0x2e   : > { %p6716_p9 = pneg %p6715_p8 }
  0x30   : > { %p6721_p13 = pnand %p6720_p12, %p6716_p9 }
  0x32   : > { %6724 = shalt.err (!%p6721_p13)
}
  0x33   : > { %s7034_s24 = smov 192   ;;  %s7035_s15 = smov 12  }
  0x34   : > { %s8291_s12 = scalar_lea.sflag [#allocation7], %s7154_s16  ;;  %s4799_s20 = sshll.u32 %s7157_s17, 7 }
  0x35   : > { %6526 = dma.hbm_to_vmem [thread:$0]  (!%p7160_p5), %s428_s14, 3072, %s430_s30, %s8291_s12, %s7034_s24, %s7034_s24, %s7035_s15  }
  0x36   : > { %s6160_s18 = sshll.u32 %s7032_s28, 7  ;;  %s8292_s5 = sld [smem:[#allocation33_spill]] }
  0x37   : > { %s473_s29 = scalar_lea.vmem [#allocation9], %s4799_s20  ;;  %s8264_s2 = scalar_lea.sflag [#allocation10], %s7154_s16 }
  0x38   : > { %s481_s21 = sshll.u32 %s473_s29, 4  ;;  %s482_s21 = int_to_ptr.vmem [resolvable:$true] %s481_s21 }
  0x3c   : > { %s478_s27 = scalar_lea.hbm %s8292_s5, %s6160_s18  ;;  %s6747_s30 = scalar_lea.hbm %s8292_s5, 256 }
  0x3d   : > { %s479_s23 = sshll.u32 %s478_s27, 4  ;;  %s480_s23 = int_to_ptr.hbm [resolvable:$true] %s479_s23 }
  0x3e   : > { %s6740_s0 = sshra.s32 %s480_s23, 4  ;;  %s6741_s0 = int_to_ptr.hbm [resolvable:$true] %s6740_s0 }
  0x3f   : > { %s6742_s8 = scalar_lea.hbm %s6741_s0, 128  ;;  %p6748_p3 = scmp.lt.s32.totalorder %s6741_s0, %s8292_s5 }
  0x40   : > { %p6743_p0 = scmp.ne.s32.totalorder %s6741_s0, %s6742_s8  ;;  %p6749_p4 = scmp.lt.s32.totalorder %s6747_s30, %s6742_s8 }
  0x42   : > { %p6745_p1 = pnand %p6743_p0, %p7171_p7  ;;  %p6750_p6 = por %p6749_p4, %p6748_p3 }
  0x44   : > { %p6746_p2 = pneg %p6745_p1 }
  0x46   : > { %p6751_p8 = pnand %p6750_p6, %p6746_p2 }
  0x48   : > { %6754 = shalt.err (!%p6751_p8)
}
  0x49   : > { %s8265_s24 = smov 128   ;;  %s8271_s20 = smov 8  }
  0x4a   : > { %6532 = dma.hbm_to_vmem [thread:$0]  (!%p7160_p5), %s480_s23, 2048, %s482_s21, %s8264_s2, %s8265_s24, %s8265_s24, %s8271_s20  }
  0x4b   : > { %s4805_s18 = sshll.u32 %s7157_s17, 10  ;;  %s6162_s0 = sshll.u32 %s7032_s28, 10 }
  0x4c   : > { %s8293_s7 = sld [smem:[#allocation34_spill]]  ;;  %s517_s29 = scalar_lea.vmem [#allocation12], %s4805_s18 }
  0x4d   : > { %s525_s12 = sshll.u32 %s517_s29, 4  ;;  %s8267_s30 = scalar_lea.sflag [#allocation13], %s7154_s16  ;;  %s526_s12 = int_to_ptr.vmem [resolvable:$true] %s525_s12 }
  0x52   : > { %s522_s27 = scalar_lea.hbm %s8293_s7, %s6162_s0  ;;  %s6777_s2 = scalar_lea.hbm %s8293_s7, 2048 }
  0x53   : > { %s523_s15 = sshll.u32 %s522_s27, 4  ;;  %s524_s15 = int_to_ptr.hbm [resolvable:$true] %s523_s15 }
  0x54   : > { %s6770_s14 = sshra.s32 %s524_s15, 4  ;;  %s6771_s14 = int_to_ptr.hbm [resolvable:$true] %s6770_s14 }
  0x55   : > { %s6772_s11 = scalar_lea.hbm %s6771_s14, 1024  ;;  %p6778_p12 = scmp.lt.s32.totalorder %s6771_s14, %s8293_s7 }
  0x56   : > { %p6773_p9 = scmp.ne.s32.totalorder %s6771_s14, %s6772_s11  ;;  %p6779_p13 = scmp.lt.s32.totalorder %s6777_s2, %s6772_s11 }
  0x58   : > { %p6775_p10 = pnand %p6773_p9, %p7171_p7  ;;  %p6780_p0 = por %p6779_p13, %p6778_p12 }
  0x5a   : > { %p6776_p11 = pneg %p6775_p10 }
  0x5c   : > { %p6781_p1 = pnand %p6780_p0, %p6776_p11 }
  0x5e   : > { %6784 = shalt.err (!%p6781_p1)
}
  0x5f   : > { %s7038_s22 = smov 1024   ;;  %s8268_s27 = smov 64  }
  0x60   : > { %6538 = dma.hbm_to_vmem [thread:$0]  (!%p7160_p5), %s524_s15, 16384, %s526_s12, %s8267_s30, %s7038_s22, %s7038_s22, %s8268_s27  }
  0x61   : > { %s551_s2 = scalar_lea.hbm %s8254_s9, %s6162_s0  ;;  %s546_s11 = scalar_lea.vmem [#allocation14], %s4805_s18 }
  0x62   : > { %s552_s14 = sshll.u32 %s551_s2, 4  ;;  %s554_s21 = sshll.u32 %s546_s11, 4  ;;  %s7230_s14 = int_to_ptr.hbm [resolvable:$true] %s552_s14  ;;  %s7232_s21 = int_to_ptr.vmem [resolvable:$true] %s554_s21 }
  0x63   : > { %s7235_s23 = sadd.s32 4294967295, %s7032_s28   ;;  %p99_p3 = scmp.ne.s32.totalorder %s7024_s26, %s7020_s25 }
  0x64   : > { %p100_p2 = scmp.eq.s32.totalorder %s7235_s23, 0  ;;  %p4792_p4 = scmp.ge.s32.totalorder %s7032_s28, 1 }
  0x65   : > { %p381_p6 = scmp.lt.s32.totalorder %s7032_s28, 3  ;;  %p4793_p8 = scmp.ne.s32.totalorder %s7235_s23, 0 }
  0x66   : > { %p7245_p9 = por %p100_p2, %p99_p3  ;;  %s8296_s1 = sld [smem:[#allocation29_spill]] }
  0x67   : > { %p7252_p10 = pnand %p4792_p4, %p381_p6  ;;  %s8270_s25 = sshll.u32 %s7157_s17, 6 }
  0x68   : > { %s8294_s18 = scalar_select %p7245_p9, 1, 0 }
  0x69   : > { %p6519_p11 = pneg %p7252_p10  ;;  %s7040_s22 = smov [#allocation3]  }
  0x6a   : > { %8295 = sst [smem:[#allocation27_spill]] %s8294_s18  ;;  %s397_s29 = sshll.u32 %s7040_s22, 4  ;;  %s398_s29 = int_to_ptr.vmem [resolvable:$true] %s397_s29 }
  0x6b   : > { %p6520_p12 = pnand %p6519_p11, %p100_p2  ;;  %s6159_s24 = sshll.u32 %s7032_s28, 6 }
  0x6c   : > { %s395_s15 = sshll.u32 %s8296_s1, 4  ;;  %s8298_s4 = sld [smem:[#allocation32_spill]]  ;;  %s396_s15 = int_to_ptr.hbm [resolvable:$true] %s395_s15 }
  0x6d   : > { %s451_s12 = scalar_lea.vmem [#allocation8], %s8270_s25  ;;  %s8299_s1 = smov 128  }
  0x6e   : > { %s459_s30 = sshll.u32 %s451_s12, 4  ;;  %s460_s30 = int_to_ptr.vmem [resolvable:$true] %s459_s30 }
  0x6f   : > { %6522 = dma.hbm_to_vmem [thread:$0]  (!%p6520_p12), %s396_s15, 256, %s398_s29, [#allocation4], %s8299_s1, %s8299_s1, %s8271_s20  }
  0x72   : > { %s456_s0 = scalar_lea.hbm %s8298_s4, %s6159_s24  ;;  %s6837_s11 = scalar_lea.hbm %s8298_s4, 128 }
  0x73   : > { %s457_s27 = sshll.u32 %s456_s0, 4  ;;  %s458_s27 = int_to_ptr.hbm [resolvable:$true] %s457_s27 }
  0x74   : > { %s6830_s5 = sshra.s32 %s458_s27, 4  ;;  %s6831_s5 = int_to_ptr.hbm [resolvable:$true] %s6830_s5 }
  0x75   : > { %s6832_s22 = scalar_lea.hbm %s6831_s5, 64  ;;  %p6838_p3 = scmp.lt.s32.totalorder %s6831_s5, %s8298_s4 }
  0x76   : > { %p6833_p13 = scmp.ne.s32.totalorder %s6831_s5, %s6832_s22  ;;  %p6839_p4 = scmp.lt.s32.totalorder %s6837_s11, %s6832_s22 }
  0x78   : > { %p6835_p0 = pnand %p6833_p13, %p7171_p7  ;;  %p6840_p6 = por %p6839_p4, %p6838_p3 }
  0x7a   : > { %p6836_p1 = pneg %p6835_p0 }
  0x7c   : > { %p6841_p11 = pnand %p6840_p6, %p6836_p1 }
  0x7e   : > { %6844 = shalt.err (!%p6841_p11)
}
  0x7f   : > { %s7041_s15 = smov 4   ;;  %s8300_s29 = smov 64  }
  0x80   : > { %s8301_s0 = scalar_lea.sflag [#allocation7], %s7154_s16  ;;  %s500_s25 = scalar_lea.hbm %s8251_s6, %s6159_s24 }
  0x81   : > { %6529 = dma.hbm_to_vmem [thread:$0]  (!%p7160_p5), %s458_s27, 1024, %s460_s30, %s8301_s0, %s8300_s29, %s8300_s29, %s7041_s15  }
  0x82   : > { %s8302_s5 = sshll.u32 %s7157_s17, 6  ;;  %s501_s12 = sshll.u32 %s500_s25, 4  ;;  %s502_s12 = int_to_ptr.hbm [resolvable:$true] %s501_s12 }
  0x83   : > { %s495_s22 = scalar_lea.vmem [#allocation11], %s8302_s5  ;;  %s6860_s20 = sshra.s32 %s502_s12, 4  ;;  %s6861_s20 = int_to_ptr.hbm [resolvable:$true] %s6860_s20 }
  0x84   : > { %s503_s11 = sshll.u32 %s495_s22, 4  ;;  %s6862_s4 = scalar_lea.hbm %s6861_s20, 64  ;;  %s504_s11 = int_to_ptr.vmem [resolvable:$true] %s503_s11 }
  0x85   : > { %p6863_p12 = scmp.ne.s32.totalorder %s6861_s20, %s6862_s4  ;;  %s6867_s30 = scalar_lea.hbm %s8251_s6, 128 }
  0x86   : > { %p6868_p1 = scmp.lt.s32.totalorder %s6861_s20, %s8251_s6  ;;  %p6869_p3 = scmp.lt.s32.totalorder %s6867_s30, %s6862_s4 }
  0x87   : > { %p6865_p13 = pnand %p6863_p12, %p7171_p7 }
  0x88   : > { %p6870_p4 = por %p6869_p3, %p6868_p1 }
  0x89   : > { %p6866_p0 = pneg %p6865_p13 }
  0x8b   : > { %p6871_p6 = pnand %p6870_p4, %p6866_p0 }
  0x8d   : > { %6874 = shalt.err (!%p6871_p6)
}
  0x8e   : > { %s8303_s24 = scalar_lea.sflag [#allocation10], %s7154_s16  ;;  %s6890_s3 = sshra.s32 %s7230_s14, 4  ;;  %s6891_s3 = int_to_ptr.hbm [resolvable:$true] %s6890_s3 }
  0x8f   : > { %6535 = dma.hbm_to_vmem [thread:$0]  (!%p7160_p5), %s502_s12, 1024, %s504_s11, %s8303_s24, %s8300_s29, %s8300_s29, %s7041_s15  }
  0x90   : > { %s6892_s18 = scalar_lea.hbm %s6891_s3, 1024  ;;  %s6897_s7 = scalar_lea.hbm %s8254_s9, 2048 }
  0x91   : > { %p6893_p11 = scmp.ne.s32.totalorder %s6891_s3, %s6892_s18  ;;  %p6898_p0 = scmp.lt.s32.totalorder %s6891_s3, %s8254_s9 }
  0x92   : > { %p6899_p1 = scmp.lt.s32.totalorder %s6897_s7, %s6892_s18 }
  0x93   : > { %p6895_p12 = pnand %p6893_p11, %p7171_p7 }
  0x94   : > { %p6900_p3 = por %p6899_p1, %p6898_p0 }
  0x95   : > { %p6896_p13 = pneg %p6895_p12 }
  0x97   : > { %p6901_p4 = pnand %p6900_p3, %p6896_p13 }
  0x99   : > { %6904 = shalt.err (!%p6901_p4)
}
  0x9a   : > { %s8304_s5 = scalar_lea.sflag [#allocation13], %s7154_s16  ;;  %s4811_s22 = sshll.u32 %s7157_s17, 4 }
  0x9b   : > { %6541 = dma.hbm_to_vmem [thread:$0]  (!%p7160_p5), %s7230_s14, 16384, %s7232_s21, %s8304_s5, %s8300_s29, %s8300_s29, %s7041_s15  }
  0x9c   : > { %s6164_s11 = sshll.u32 %s7032_s28, 4  ;;  %s568_s24 = scalar_lea.vmem [#allocation15], %s4811_s22 }
  0x9d   : > { %s573_s27 = scalar_lea.hbm %s8255_s10, %s6164_s11  ;;  %s576_s3 = sshll.u32 %s568_s24, 4  ;;  %s577_s3 = int_to_ptr.vmem [resolvable:$true] %s576_s3 }
  0x9e   : > { %s574_s0 = sshll.u32 %s573_s27, 4  ;;  %s565_s18 = scalar_lea.sflag [#allocation16], %s7157_s17  ;;  %s575_s0 = int_to_ptr.hbm [resolvable:$true] %s574_s0 }
  0x9f   : > { %s6920_s16 = sshra.s32 %s575_s0, 4  ;;  %s6927_s28 = scalar_lea.hbm %s8255_s10, 32  ;;  %s6921_s16 = int_to_ptr.hbm [resolvable:$true] %s6920_s16 }
  0xa0   : > { %s6922_s4 = scalar_lea.hbm %s6921_s16, 16  ;;  %p6928_p13 = scmp.lt.s32.totalorder %s6921_s16, %s8255_s10 }
  0xa1   : > { %p6923_p6 = scmp.ne.s32.totalorder %s6921_s16, %s6922_s4  ;;  %p6929_p0 = scmp.lt.s32.totalorder %s6927_s28, %s6922_s4 }
  0xa3   : > { %p6925_p11 = pnand %p6923_p6, %p7171_p7  ;;  %p6930_p1 = por %p6929_p0, %p6928_p13 }
  0xa5   : > { %p6926_p12 = pneg %p6925_p11 }
  0xa7   : > { %p6931_p3 = pnand %p6930_p1, %p6926_p12 }
  0xa9   : > { %6934 = shalt.err (!%p6931_p3)
}
  0xaa   : > { %s8305_s17 = smov 8   ;;  %588 = sbr.rel (%p7252_p10) target bundleno = 4321 (0x10e1), region = 72 }
  0xab   : > { %6544 = dma.hbm_to_vmem [thread:$0]  (!%p7160_p5), %s575_s0, 256, %s577_s3, %s565_s18, %s8299_s1, %s8299_s1, %s8305_s17  }
  0xaf   : > { %6995 = dma.done.wait (%p100_p2), [#allocation4], 256  }
  0xb0   : > { %6997 = vsyncadd (%p100_p2), [#allocation4], 4294967040  ;;  %s595_s20 = sand.u32 1, %s7235_s23   ;;  %s597_s7 = sand.u32 1, %s7024_s26  }
  0xb1   : > { %s6496_s2 = smul.u32 192, %s597_s7  ;;  %s596_s19 = scalar_lea.sflag [#allocation7], %s595_s20 }
  0xb3   : > { %s7350_s25 = scalar_lea.vmem [#allocation6], %s6496_s2 }
  0xb4   : > { %6999 = dma.done.wait (%p7245_p9), %s596_s19, 4096  }
  0xb5   : > { %7001 = vsyncadd (%p7245_p9), %s596_s19, 4294963200  ;;  %s4816_s1 = sshll.u32 %s597_s7, 6  ;;  %s4817_s8 = sshll.u32 %s597_s7, 7 }
  0xb6   : > { %s7356_s5 = scalar_lea.vmem [#allocation8], %s4816_s1  ;;  %s616_s22 = scalar_lea.sflag [#allocation10], %s595_s20 }
  0xb7   : > { %s7358_s11 = scalar_lea.vmem [#allocation9], %s4817_s8 }
  0xb8   : > { %7003 = dma.done.wait (%p7245_p9), %s616_s22, 3072  }
  0xb9   : > { %7005 = vsyncadd (%p7245_p9), %s616_s22, 4294964224  ;;  %s4819_s12 = sshll.u32 %s597_s7, 10  ;;  %s7364_s30 = scalar_lea.vmem [#allocation11], %s4816_s1 }
  0xba   : > { %s636_s27 = scalar_lea.sflag [#allocation13], %s595_s20  ;;  %s7366_s0 = scalar_lea.vmem [#allocation12], %s4819_s12 }
  0xbb   : > { %7007 = dma.done.wait (%p7245_p9), %s636_s27, 32768  }
  0xbc   : > { %7009 = vsyncadd (%p7245_p9), %s636_s27, 4294934528  ;;  %s4821_s24 = sshll.u32 %s597_s7, 4  ;;  %s7372_s3 = scalar_lea.vmem [#allocation14], %s4819_s12 }
  0xbd   : > { %s656_s18 = scalar_lea.sflag [#allocation16], %s597_s7  ;;  %s7374_s16 = scalar_lea.vmem [#allocation15], %s4821_s24 }
  0xbe   : > { %7011 = dma.done.wait (%p7245_p9), %s656_s18, 256  }
  0xbf   : > { %7013 = vsyncadd (%p7245_p9), %s656_s18, 4294967040  ;;  %p737_p5 = scmp.lt.s32.totalorder %s7235_s23, 1  ;;  %s8307_s29 = sld [smem:[#allocation31_spill]] }
  0xc0   : > { %s8308_s2 = sld [smem:[#allocation35_spill]] }
  0xc1   : > { %s738_s4 = scalar_select %p737_p5, %s7235_s23, 1 }
  0xc2   : > { %750 = sbr.rel (%p4793_p8) target bundleno = 203 (0xcb), region = 108  ;;  %s8309_s8 = sld [smem:[#allocation28_spill]] (!%p4793_p8) }
  0xc3   : > { %s6165_s14 = sshll.u32 %s738_s4, 6  ;;  %s4824_s21 = sshll.u32 %s738_s4, 4 }
  0xc5   : > { %s7385_s17 = scalar_lea.vmem %s8307_s29, %s6165_s14 }
  0xc6   : > { %s7390_s19 = scalar_lea.vmem %s8308_s2, %s4824_s21 }
  0xc8   : > { %v751_v0 = vld [vmem:[%s8309_s8] sm:$0xff]  ;;  %v752_v1 = vld [vmem:[%s8309_s8 + $0x8] sm:$0xff] }
  0xc9   : > { %753 = vst [vmem:[#allocation2] sm:$0xff] %v751_v0 }
  0xca   : > { %754 = vst [vmem:[#allocation2 + $0x8] sm:$0xff] %v752_v1 }
  0xcb PF: > { %v4912_v2 = vld [vmem:[%s7350_s25 + $0xa8] sm:$0xf]  ;;  %v6188_v3 = vld [vmem:[%s7350_s25 + $0xb0] sm:$0xf0]  ;;  %v6187_v4 = vld [vmem:[%s7350_s25 + $0xac] sm:$0xf] }
  0xcc   : > { %v4913_v5 = vor.u32 %v6188_v3, %v4912_v2  ;;  %v4914_v6 = vld [vmem:[%s7350_s25 + $0xb4] sm:$0xf0]  ;;  %v4900_v7 = vld [vmem:[%s7350_s25 + $0x90] sm:$0xf]  ;;  %v6185_v8 = vld [vmem:[%s7350_s25 + $0x98] sm:$0xf0] }
  0xcd   : > { %v4917_v9 = vor.u32 %v6187_v4, %v4914_v6  ;;  %v6184_v10 = vld [vmem:[%s7350_s25 + $0x94] sm:$0xf]  ;;  %v4902_v11 = vld [vmem:[%s7350_s25 + $0x9c] sm:$0xf0]  ;;  %v4901_v12 = vor.u32 %v6185_v8, %v4900_v7  ;;  %v4888_v14 = vld [vmem:[%s7350_s25 + $0x78] sm:$0xf] }
  0xce   : > { %920 = vmatpush.bf16.msra.mxu0 %v4913_v5  ;;  %v4905_v13 = vor.u32 %v6184_v10, %v4902_v11  ;;  %v6182_v15 = vld [vmem:[%s7350_s25 + $0x80] sm:$0xf0]  ;;  %v6181_v16 = vld [vmem:[%s7350_s25 + $0x7c] sm:$0xf]  ;;  %v4890_v17 = vld [vmem:[%s7350_s25 + $0x84] sm:$0xf0] }
  0xcf   : > { %934 = vmatpush.bf16.msra.mxu1 %v4917_v9  ;;  %v4889_v18 = vor.u32 %v6182_v15, %v4888_v14  ;;  %v4893_v19 = vor.u32 %v6181_v16, %v4890_v17  ;;  %v4876_v20 = vld [vmem:[%s7350_s25 + $0x60] sm:$0xf]  ;;  %v6179_v21 = vld [vmem:[%s7350_s25 + $0x68] sm:$0xf0]  ;;  %v6178_v22 = vld [vmem:[%s7350_s25 + $0x64] sm:$0xf] }
  0xd0   : > { %v4878_v23 = vld [vmem:[%s7350_s25 + $0x6c] sm:$0xf0]  ;;  %v4877_v24 = vor.u32 %v6179_v21, %v4876_v20  ;;  %v4864_v25 = vld [vmem:[%s7350_s25 + $0x48] sm:$0xf]  ;;  %v6189_v27 = vld [vmem:[%s7350_s25 + $0xb8] sm:$0xf0] }
  0xd1   : > { %v4920_v26 = vld [vmem:[%s7350_s25 + $0xb0] sm:$0xf]  ;;  %v4881_v28 = vor.u32 %v6178_v22, %v4878_v23  ;;  %v6176_v29 = vld [vmem:[%s7350_s25 + $0x50] sm:$0xf0]  ;;  %v4908_v31 = vld [vmem:[%s7350_s25 + $0x98] sm:$0xf] }
  0xd2   : > { %921 = vmatpush.bf16.msra.mxu0 %v4901_v12  ;;  %v4921_v30 = vor.u32 %v6189_v27, %v4920_v26  ;;  %v6186_v32 = vld [vmem:[%s7350_s25 + $0xa0] sm:$0xf0]  ;;  %v6175_v33 = vld [vmem:[%s7350_s25 + $0x4c] sm:$0xf]  ;;  %v4866_v34 = vld [vmem:[%s7350_s25 + $0x54] sm:$0xf0]  ;;  %v4865_v36 = vor.u32 %v6176_v29, %v4864_v25 }
  0xd3   : > { %935 = vmatpush.bf16.msra.mxu1 %v4905_v13  ;;  %v4909_v35 = vor.u32 %v6186_v32, %v4908_v31  ;;  %v4896_v37 = vld [vmem:[%s7350_s25 + $0x80] sm:$0xf]  ;;  %v6183_v38 = vld [vmem:[%s7350_s25 + $0x88] sm:$0xf0]  ;;  %v4869_v39 = vor.u32 %v6175_v33, %v4866_v34  ;;  %v4852_v40 = vld [vmem:[%s7350_s25 + $0x30] sm:$0xf] }
  0xd4   : > { %948 = vmatpush.bf16.msra.mxu2 %v4921_v30  ;;  %v6173_v41 = vld [vmem:[%s7350_s25 + $0x38] sm:$0xf0]  ;;  %v6172_v42 = vld [vmem:[%s7350_s25 + $0x34] sm:$0xf]  ;;  %v4854_v43 = vld [vmem:[%s7350_s25 + $0x3c] sm:$0xf0]  ;;  %v4897_v44 = vor.u32 %v6183_v38, %v4896_v37 }
  0xd5   : > { %v4853_v45 = vor.u32 %v6173_v41, %v4852_v40  ;;  %v4884_v46 = vld [vmem:[%s7350_s25 + $0x68] sm:$0xf]  ;;  %v6180_v47 = vld [vmem:[%s7350_s25 + $0x70] sm:$0xf0]  ;;  %v4857_v48 = vor.u32 %v6172_v42, %v4854_v43  ;;  %v4840_v49 = vld [vmem:[%s7350_s25 + $0x18] sm:$0xf] }
  0xd6   : > { %922 = vmatpush.bf16.msra.mxu0 %v4889_v18  ;;  %v6170_v50 = vld [vmem:[%s7350_s25 + $0x20] sm:$0xf0]  ;;  %v6169_v51 = vld [vmem:[%s7350_s25 + $0x1c] sm:$0xf]  ;;  %v4842_v52 = vld [vmem:[%s7350_s25 + $0x24] sm:$0xf0]  ;;  %v4885_v53 = vor.u32 %v6180_v47, %v4884_v46 }
  0xd7   : > { %936 = vmatpush.bf16.msra.mxu1 %v4893_v19  ;;  %v4841_v54 = vor.u32 %v6170_v50, %v4840_v49  ;;  %v4872_v55 = vld [vmem:[%s7350_s25 + $0x50] sm:$0xf]  ;;  %v6177_v56 = vld [vmem:[%s7350_s25 + $0x58] sm:$0xf0]  ;;  %v4845_v57 = vor.u32 %v6169_v51, %v4842_v52  ;;  %v4828_v58 = vld [vmem:[%s7350_s25] sm:$0xf] }
  0xd8   : > { %949 = vmatpush.bf16.msra.mxu2 %v4909_v35  ;;  %v6167_v59 = vld [vmem:[%s7350_s25 + $0x8] sm:$0xf0]  ;;  %v6166_v60 = vld [vmem:[%s7350_s25 + $0x4] sm:$0xf]  ;;  %v4830_v61 = vld [vmem:[%s7350_s25 + $0xc] sm:$0xf0]  ;;  %v4873_v63 = vor.u32 %v6177_v56, %v4872_v55  ;;  %v971_v35 = vlaneseq }
  0xd9   : > { %v7442_v62 = vld [vmem:[#allocation2] sm:$0xff]  ;;  %v4829_v0 = vor.u32 %v6167_v59, %v4828_v58  ;;  %v7444_v1 = vld [vmem:[#allocation2 + $0x8] sm:$0xff]  ;;  %v4860_v2 = vld [vmem:[%s7350_s25 + $0x38] sm:$0xf]  ;;  %v4833_v4 = vor.u32 %v6166_v60, %v4830_v61  ;;  %vm1019_vm0 = vcmask 261120   ;;  %s7043_s27 = smov 64  }
  0xda   : > { %923 = vmatpush.bf16.msra.mxu0 %v4877_v24  ;;  %v6174_v3 = vld [vmem:[%s7350_s25 + $0x40] sm:$0xf0]  ;;  %v759_v5 = vpack.c.bf16 %v7444_v1, %v7442_v62  ;;  %v4848_v7 = vld [vmem:[%s7350_s25 + $0x20] sm:$0xf]  ;;  %v6171_v8 = vld [vmem:[%s7350_s25 + $0x28] sm:$0xf0] }
  0xdb   : > { %937 = vmatpush.bf16.msra.mxu1 %v4881_v28  ;;  %v4861_v6 = vor.u32 %v6174_v3, %v4860_v2  ;;  %v4849_v9 = vor.u32 %v6171_v8, %v4848_v7  ;;  %v4836_v10 = vld [vmem:[%s7350_s25 + $0x8] sm:$0xf]  ;;  %v6168_v11 = vld [vmem:[%s7350_s25 + $0x10] sm:$0xf0]  ;;  %s7042_s25 = smov 96   ;;  %s7044_s24 = smov 32  }
  0xdc   : > { %950 = vmatpush.bf16.msra.mxu2 %v4897_v44  ;;  %v4837_v12 = vor.u32 %v6168_v11, %v4836_v10  ;;  %v7455_v14 = vld [vmem:[%s7374_s16] sm:$0xff]  ;;  %v999_v37 = vand.u32 127, %v971_v35  ;;  %v7045_v41 = vmov -1e+09   ;;  %vm1040_vm2 = vcmask 130048   ;;  %p6122_p7 = scmp.ne.s32.totalorder %s7235_s23, 1 }
  0xdd   : > { %v965_v16 = vperm.slane %v7455_v14, 1  ;;  %v962_v20 = vperm.slane %v7455_v14, 0  ;;  %v968_v28 = vperm.slane %v7455_v14, 2  ;;  %vm1311_vm4 = vcmask 523264   ;;  %s8311_s1 = sld [smem:[#allocation37_spill]] (!%p6122_p7) }
  0xde   : > { %924 = vmatpush.bf16.msra.mxu0 %v4865_v36  ;;  %v972_v36 = vshrl.u32 %v971_v35, 7  ;;  %vm1314_vm5 = vcmask 785408  }
  0xdf   : > { %938 = vmatpush.bf16.msra.mxu1 %v4869_v39  ;;  %v1004_v39 = vand.u32 1, %v999_v37 }
  0xe0   : > { %951 = vmatpush.bf16.msra.mxu2 %v4885_v53  ;;  %v978_v38 = vand.u32 1, %v972_v36  ;;  %v973_v40 = vadd.s32 8, %v972_v36 }
  0xe2   : > { %925 = vmatpush.bf16.msra.mxu0 %v4853_v45  ;;  %vm1012_vm1 = vcmp.eq.s32.totalorder %v978_v38, %v1004_v39  ;;  %v985_v43 = vand.u32 1, %v973_v40 }
  0xe3   : > { %939 = vmatpush.bf16.msra.mxu1 %v4857_v48  ;;  %v7474_v42 = vsel %vm1012_vm1, 0.0, %v7045_v41 }
  0xe4   : > { %952 = vmatpush.bf16.msra.mxu2 %v4873_v63  ;;  %vm1013_vm3 = vcmp.eq.s32.totalorder %v985_v43, %v1004_v39 }
  0xe5   : > { %v7478_v47 = vsel %vm1013_vm3, 0.0, %v7045_v41 }
  0xe6   : > { %926 = vmatpush.bf16.msra.mxu0 %v4841_v54 }
  0xe7   : > { %940 = vmatpush.bf16.msra.mxu1 %v4845_v57 }
  0xe8   : > { %953 = vmatpush.bf16.msra.mxu2 %v4861_v6 }
  0xea   : > { %927 = vmatpush.bf16.msra.mxu0 %v4829_v0 }
  0xeb   : > { %941 = vmatpush.bf16.msra.mxu1 %v4833_v4 }
  0xec   : > { %954 = vmatpush.bf16.msra.mxu2 %v4849_v9 }
  0xed   : > { %928 = vmatmul.bf16.vlgmr.msra.gmra.mxu0 %v759_v5 }
  0xee   : > { %942 = vmatmul.bf16.vlgmr.msra.gmra.mxu1 %v759_v5 }
  0xf0   : > { %955 = vmatpush.bf16.msra.mxu2 %v4837_v12 }
  0xf3   : > { %956 = vmatmul.bf16.vlgmr.msra.gmra.mxu2 %v759_v5 }
 0x16a   : > { %v929_v15 = vpop.f32.mrf.mxu0 }
 0x16b   : > { %v943_v13 = vpop.f32.mrf.mxu1  ;;  %v963_v24 = vadd.f32 %v962_v20, %v929_v15 }
 0x16c   : > { %v966_v18 = vadd.f32 %v965_v16, %v943_v13 }
 0x172   : > { %v931_v22 = vpop.f32.mrf.mxu0 }
 0x173   : > { %v945_v17 = vpop.f32.mrf.mxu1  ;;  %v964_v25 = vadd.f32 %v962_v20, %v931_v22 }
 0x174   : > { %v967_v19 = vadd.f32 %v965_v16, %v945_v17 }
 0x175   : > { %v1016_v27 = vpack.c.bf16 %v964_v25, %v963_v24 }
 0x176   : > { %v7459_v21 = vpack.c.bf16 %v967_v19, %v966_v18  ;;  %v957_v26 = vpop.f32.mrf.mxu2 }
 0x177   : > { %v969_v29 = vadd.f32 %v968_v28, %v957_v26 }
 0x178   : > { %1085 = vrot.lane.b32.xlu2 %v7459_v21, %s7042_s25  ;;  %v1024_v23 = vsel %vm1019_vm0, %v7459_v21, 0 }
 0x179   : > { %1033 = vmatpush.bf16.xpose.msra.mxu3 %v1024_v23 }
 0x17e   : > { %v959_v30 = vpop.f32.mrf.mxu2 }
 0x17f   : > { %v970_v31 = vadd.f32 %v968_v28, %v959_v30 }
 0x180   : > { %1082 = vrot.lane.b32.xlu2 %v1016_v27, %s7042_s25  ;;  %4922 = vmatmul.msk.bf16.vlgmr.msra.gmra.mxu3 %vm1019_vm0, %v1016_v27 }
 0x181   : > { %v7468_v32 = vpack.c.bf16 %v970_v31, %v969_v29 }
 0x183   : > { %1074 = vmatpush.bf16.msrb.mxu3 %v7468_v32 }
 0x188   : > { %1151 = vrot.lane.b32.xlu2 %v1016_v27, %s7043_s27 }
 0x190   : > { %1218 = vrot.lane.b32.xlu2 %v1016_v27, %s7044_s24 }
 0x1d2   : > { %v1086_v33 = vpop.permute.xlu2 %1085 }
 0x1d3   : > { %v1091_v34 = vsel %vm1019_vm0, %v1086_v33, 0 }
 0x1d4   : > { %1100 = vmatpush.bf16.xpose.msra.mxu3 %v1091_v34 }
 0x1da   : > { %v1083_v61 = vpop.permute.xlu2 %1082 }
 0x1e2   : > { %v1152_v2 = vpop.permute.xlu2 %1151 }
 0x1ea   : > { %v1219_v16 = vpop.permute.xlu2 %1218 }
 0x203   : > { %v1035_v44 = vpop.f32.mrf.mxu3 }
 0x204   : > { %v1036_v45 = vadd.f32 %v1035_v44, %v7474_v42 }
 0x206   : > { %v1041_v46 = vsel %vm1040_vm2, %v1036_v45, -inf }
 0x207   : > { %1042 = vmax.xlane.f32.xlu0 %v1041_v46 }
 0x20b   : > { %v1037_v48 = vpop.f32.mrf.mxu3 }
 0x20c   : > { %v1038_v49 = vadd.f32 %v1037_v48, %v7478_v47 }
 0x20e   : > { %v1044_v50 = vsel %vm1040_vm2, %v1038_v49, -inf }
 0x20f   : > { %1045 = vmax.xlane.f32.xlu0 %v1044_v50 }
 0x223   : > { %1153 = vrot.lane.b32.xlu0 %v7459_v21, %s7043_s27 }
 0x27a   : > { %v1043_v51 = vpop.xlane.xlu0 %1042 }
 0x27b   : > { %v1047_v52 = vsub.f32 %v1036_v45, %v1043_v51 }
 0x27d   : > { %v1049_v53 = vmul.f32 1.442695, %v1047_v52 }
 0x27f   : > { %6628 = vpow2.f32 %v1049_v53 }
 0x282   : > { %v1046_v54 = vpop.xlane.xlu0 %1045 }
 0x283   : > { %v1048_v55 = vsub.f32 %v1038_v49, %v1046_v54 }
 0x285   : > { %v6629_v56 = vpop.eup %6628  ;;  %v1051_v57 = vmul.f32 1.442695, %v1048_v55 }
 0x286   : > { %v1053_v58 = vsel %vm1040_vm2, %v6629_v56, 0.0 }
 0x287   : > { %6630 = vpow2.f32 %v1051_v57  ;;  %1054 = vadd.xlane.f32.xlu1 %v1053_v58 }
 0x28d   : > { %v6631_v59 = vpop.eup %6630 }
 0x28e   : > { %v1056_v60 = vsel %vm1040_vm2, %v6631_v59, 0.0 }
 0x28f   : > { %1057 = vadd.xlane.f32.xlu1 %v1056_v60 }
 0x295   : > { %v1154_v63 = vpop.permute.xlu0 %1153 }
 0x296   : > { %v1159_v0 = vsel %vm1019_vm0, %v1154_v63, 0 }
 0x297   : > { %1168 = vmatpush.bf16.xpose.msrb.mxu2 %v1159_v0 }
 0x29e   : > { %4926 = vmatmul.msk.bf16.vlgmr.msrb.gmra.mxu2 %vm1019_vm0, %v1152_v2 }
 0x2a8   : > { %1220 = vrot.lane.b32.xlu1 %v7459_v21, %s7044_s24 }
 0x2fa   : > { %v1055_v3 = vpop.xlane.xlu1 %1054 }
 0x2fb   : > { %6632 = vrcp.f32 %v1055_v3 }
 0x301   : > { %v6633_v5 = vpop.eup %6632 }
 0x302   : > { %v1058_v4 = vpop.xlane.xlu1 %1057  ;;  %v1061_v7 = vmul.f32 %v6633_v5, %v6629_v56 }
 0x303   : > { %6634 = vrcp.f32 %v1058_v4 }
 0x309   : > { %v6635_v6 = vpop.eup %6634 }
 0x30a   : > { %v1062_v8 = vmul.f32 %v6635_v6, %v6631_v59 }
 0x30c   : > { %v1063_v9 = vpack.c.bf16 %v1062_v8, %v1061_v7 }
 0x30e   : > { %4923 = vmatmul.msk.bf16.vlgmr.msrb.gmra.mxu3 %vm1040_vm2, %v1063_v9 }
 0x31a   : > { %v1221_v10 = vpop.permute.xlu1 %1220 }
 0x31b   : > { %v1226_v11 = vsel %vm1019_vm0, %v1221_v10, 0 }
 0x31c   : > { %1235 = vmatpush.bf16.xpose.msrb.mxu3 %v1226_v11 }
 0x31e   : > { %4924 = vmatmul.msk.bf16.vlgmr.msra.gmra.mxu3 %vm1019_vm0, %v1083_v61 }
 0x321   : > { %v1170_v12 = vpop.f32.mrf.mxu2 }
 0x322   : > { %v1171_v13 = vadd.f32 %v1170_v12, %v7474_v42 }
 0x324   : > { %v1175_v15 = vsel %vm1040_vm2, %v1171_v13, -inf }
 0x325   : > { %1176 = vmax.xlane.f32.xlu1 %v1175_v15 }
 0x329   : > { %v1172_v27 = vpop.f32.mrf.mxu2 }
 0x32a   : > { %v1173_v28 = vadd.f32 %v1172_v27, %v7478_v47 }
 0x32c   : > { %v1178_v33 = vsel %vm1040_vm2, %v1173_v28, -inf }
 0x32e   : > { %4928 = vmatmul.msk.bf16.vlgmr.msrb.gmra.mxu3 %vm1019_vm0, %v1219_v16 }
 0x391   : > { %v7496_v17 = vpop.f32.mrf.mxu3 }
 0x398   : > { %v1177_v18 = vpop.xlane.xlu1 %1176 }
 0x399   : > { %v1181_v19 = vsub.f32 %v1171_v13, %v1177_v18  ;;  %v7498_v20 = vpop.f32.mrf.mxu3 }
 0x39b   : > { %v1183_v21 = vmul.f32 1.442695, %v1181_v19 }
 0x39d   : > { %6636 = vpow2.f32 %v1183_v21 }
 0x3a1   : > { %v1102_v22 = vpop.f32.mrf.mxu3 }
 0x3a2   : > { %v1103_v23 = vadd.f32 %v1102_v22, %v7474_v42 }
 0x3a3   : > { %v7501_v24 = vpop.eup %6636 }
 0x3a4   : > { %v1107_v25 = vsel %vm1040_vm2, %v1103_v23, -inf  ;;  %v1187_v26 = vsel %vm1040_vm2, %v7501_v24, 0.0 }
 0x3a5   : > { %1108 = vmax.xlane.f32.xlu2 %v1107_v25  ;;  %1188 = vadd.xlane.f32.xlu1 %v1187_v26 }
 0x3a9   : > { %v1104_v29 = vpop.f32.mrf.mxu3 }
 0x3aa   : > { %v1105_v30 = vadd.f32 %v1104_v29, %v7478_v47 }
 0x3ac   : > { %v1110_v31 = vsel %vm1040_vm2, %v1105_v30, -inf }
 0x3ad   : > { %1111 = vmax.xlane.f32.xlu0 %v1110_v31  ;;  %1179 = vmax.xlane.f32.xlu2 %v1178_v33 }
 0x3b1   : > { %v1237_v34 = vpop.f32.mrf.mxu3 }
 0x3b2   : > { %v1238_v35 = vadd.f32 %v1237_v34, %v7474_v42  ;;  %v6197_v34 = vld [vmem:[%s7385_s17 + $0x38] sm:$0xff] }
 0x3b3   : > { %1383 = vmatpush.bf16.msrb.mxu1 %v6197_v34  ;;  %v5012_v34 = vld [vmem:[%s7358_s11 + $0x20] sm:$0xf] }
 0x3b4   : > { %v1242_v36 = vsel %vm1040_vm2, %v1238_v35, -inf }
 0x3b5   : > { %1243 = vmax.xlane.f32.xlu0 %v1242_v36 }
 0x3b9   : > { %v1239_v37 = vpop.f32.mrf.mxu3 }
 0x3ba   : > { %v1240_v38 = vadd.f32 %v1239_v37, %v7478_v47 }
 0x3bc   : > { %v1245_v39 = vsel %vm1040_vm2, %v1240_v38, -inf }
 0x3bd   : > { %1246 = vmax.xlane.f32.xlu2 %v1245_v39 }
 0x3d5   : > { %1131 = vrot.lane.b32.xlu2 %v7468_v32, %s7042_s25 }
 0x418   : > { %v1109_v40 = vpop.xlane.xlu2 %1108  ;;  %v1189_v6 = vpop.xlane.xlu1 %1188 }
 0x419   : > { %v1113_v41 = vsub.f32 %v1103_v23, %v1109_v40 }
 0x41b   : > { %v1115_v43 = vmul.f32 1.442695, %v1113_v41 }
 0x41d   : > { %6638 = vpow2.f32 %v1115_v43 }
 0x420   : > { %v1180_v44 = vpop.xlane.xlu2 %1179  ;;  %v1112_v45 = vpop.xlane.xlu0 %1111 }
 0x421   : > { %v1182_v46 = vsub.f32 %v1173_v28, %v1180_v44  ;;  %v1114_v50 = vsub.f32 %v1105_v30, %v1112_v45  ;;  %v6194_v45 = vld [vmem:[%s7385_s17 + $0x20] sm:$0xff] }
 0x423   : > { %v6639_v48 = vpop.eup %6638  ;;  %v1185_v49 = vmul.f32 1.442695, %v1182_v46  ;;  %v1117_v52 = vmul.f32 1.442695, %v1114_v50  ;;  %v6193_v46 = vld [vmem:[%s7385_s17 + $0x18] sm:$0xff]  ;;  %v6190_v50 = vld [vmem:[%s7385_s17] sm:$0xff] }
 0x424   : > { %v1119_v51 = vsel %vm1040_vm2, %v6639_v48, 0.0 }
 0x425   : > { %6640 = vpow2.f32 %v1185_v49  ;;  %1120 = vadd.xlane.f32.xlu1 %v1119_v51  ;;  %v6191_v49 = vld [vmem:[%s7385_s17 + $0x8] sm:$0xff] }
 0x426   : > { %6642 = vpow2.f32 %v1117_v52 }
 0x428   : > { %v1244_v53 = vpop.xlane.xlu0 %1243 }
 0x429   : > { %v1248_v54 = vsub.f32 %v1238_v35, %v1244_v53  ;;  %v6196_v35 = vld [vmem:[%s7385_s17 + $0x30] sm:$0xff] }
 0x42a   : > { %1384 = vmatpush.bf16.msrb.mxu1 %v6196_v35  ;;  %v6211_v35 = vld [vmem:[%s7358_s11 + $0x24] sm:$0xf0] }
 0x42b   : > { %v6641_v55 = vpop.eup %6640  ;;  %v1250_v56 = vmul.f32 1.442695, %v1248_v54 }
 0x42c   : > { %v1190_v57 = vsel %vm1040_vm2, %v6641_v55, 0.0  ;;  %v6643_v59 = vpop.eup %6642 }
 0x42d   : > { %6644 = vpow2.f32 %v1250_v56  ;;  %1191 = vadd.xlane.f32.xlu0 %v1190_v57  ;;  %v1122_v0 = vsel %vm1040_vm2, %v6643_v59, 0.0 }
 0x430   : > { %v1247_v58 = vpop.xlane.xlu2 %1246 }
 0x431   : > { %v1249_v60 = vsub.f32 %v1240_v38, %v1247_v58 }
 0x433   : > { %v6645_v61 = vpop.eup %6644  ;;  %v1252_v63 = vmul.f32 1.442695, %v1249_v60 }
 0x434   : > { %v1254_v2 = vsel %vm1040_vm2, %v6645_v61, 0.0 }
 0x435   : > { %6646 = vpow2.f32 %v1252_v63  ;;  %1123 = vadd.xlane.f32.xlu0 %v1122_v0  ;;  %1255 = vadd.xlane.f32.xlu1 %v1254_v2 }
 0x438   : > { %v1132_v3 = vpop.permute.xlu2 %1131 }
 0x439   : > { %1144 = vmatpush.bf16.msrb.mxu0 %v1132_v3 }
 0x43b   : > { %v6647_v4 = vpop.eup %6646 }
 0x43c   : > { %v1257_v5 = vsel %vm1040_vm2, %v6647_v4, 0.0 }
 0x43d   : > { %1258 = vadd.xlane.f32.xlu0 %v1257_v5 }
 0x44e   : > { %1198 = vrot.lane.b32.xlu1 %v7468_v32, %s7043_s27 }
 0x451   : > { %1265 = vrot.lane.b32.xlu0 %v7468_v32, %s7044_s24 }
 0x498   : > { %v1121_v8 = vpop.xlane.xlu1 %1120 }
 0x499   : > { %6648 = vrcp.f32 %v1121_v8 }
 0x49f   : > { %v6649_v10 = vpop.eup %6648 }
 0x4a0   : > { %v1192_v7 = vpop.xlane.xlu0 %1191  ;;  %v1127_v12 = vmul.f32 %v6649_v10, %v6639_v48  ;;  %v6192_v48 = vld [vmem:[%s7385_s17 + $0x10] sm:$0xff]  ;;  %v7046_v10 = vmov 128.0  }
 0x4a8   : > { %v1124_v9 = vpop.xlane.xlu0 %1123  ;;  %v1256_v18 = vpop.xlane.xlu1 %1255 }
 0x4a9   : > { %6650 = vrcp.f32 %v1124_v9 }
 0x4aa   : > { %6652 = vrcp.f32 %v1192_v7 }
 0x4ab   : > { %6654 = vrcp.f32 %v1189_v6 }
 0x4af   : > { %v6651_v11 = vpop.eup %6650 }
 0x4b0   : > { %v1128_v13 = vmul.f32 %v6651_v11, %v6643_v59  ;;  %v1259_v16 = vpop.xlane.xlu0 %1258  ;;  %v6653_v32 = vpop.eup %6652 }
 0x4b1   : > { %6656 = vrcp.f32 %v1259_v16  ;;  %v6655_v19 = vpop.eup %6654  ;;  %v1196_v22 = vmul.f32 %v6653_v32, %v6641_v55  ;;  %v5044_v16 = vld [vmem:[%s7358_s11 + $0x60] sm:$0xf] }
 0x4b2   : > { %v1129_v15 = vpack.c.bf16 %v1128_v13, %v1127_v12  ;;  %6658 = vrcp.f32 %v1256_v18  ;;  %v1195_v25 = vmul.f32 %v6655_v19, %v7501_v24  ;;  %v6195_v24 = vld [vmem:[%s7385_s17 + $0x28] sm:$0xff]  ;;  %v5052_v13 = vld [vmem:[%s7358_s11 + $0x70] sm:$0xf] }
 0x4b3   : > { %1385 = vmatpush.bf16.msrb.mxu1 %v6195_v24  ;;  %6660 = vrcp.f32 %v7046_v10 }
 0x4b4   : > { %4925 = vmatmul.msk.bf16.vlgmr.msrb.gmra.mxu0 %vm1040_vm2, %v1129_v15  ;;  %v1197_v28 = vpack.c.bf16 %v1196_v22, %v1195_v25  ;;  %v6221_v15 = vld [vmem:[%s7358_s11 + $0x74] sm:$0xf0]  ;;  %v5028_v25 = vld [vmem:[%s7358_s11 + $0x40] sm:$0xf] }
 0x4b5   : > { %v5053_v18 = vor.u32 %v6221_v15, %v5052_v13 }
 0x4b7   : > { %v6657_v21 = vpop.eup %6656  ;;  %1386 = vmatpush.bf16.msrb.mxu1 %v6194_v45  ;;  %1631 = vmatpush.bf16.msra.mxu3 %v5053_v18  ;;  %v758_v18 = vld [vmem:[%s7374_s16 + $0x8] sm:$0xff] }
 0x4b8   : > { %v6659_v23 = vpop.eup %6658  ;;  %v1263_v27 = vmul.f32 %v6657_v21, %v6647_v4  ;;  %v5036_v21 = vld [vmem:[%s7358_s11 + $0x50] sm:$0xf] }
 0x4b9   : > { %v1262_v29 = vmul.f32 %v6659_v23, %v6645_v61  ;;  %v6661_v11 = vpop.eup %6660 }
 0x4ba   : > { %v1404_v12 = vmul.f32 128.0, %v6661_v11  ;;  %vm1408_vm6 = vweird.f32 %v6661_v11 }
 0x4bb   : > { %v1264_v31 = vpack.c.bf16 %v1263_v27, %v1262_v29  ;;  %1387 = vmatpush.bf16.msrb.mxu1 %v6193_v46  ;;  %v5020_v29 = vld [vmem:[%s7358_s11 + $0x30] sm:$0xf] }
 0x4bc   : > { %v1405_v32 = vsub.f32 1.0, %v1404_v12 }
 0x4be   : > { %v1406_v22 = vmul.f32 %v6661_v11, %v1405_v32 }
 0x4bf   : > { %1388 = vmatpush.bf16.msrb.mxu1 %v6192_v48 }
 0x4c0   : > { %v1199_v26 = vpop.permute.xlu1 %1198  ;;  %v1407_v27 = vadd.f32 %v6661_v11, %v1406_v22 }
 0x4c1   : > { %1211 = vmatpush.bf16.msra.mxu2 %v1199_v26  ;;  %v6215_v26 = vld [vmem:[%s7358_s11 + $0x44] sm:$0xf0] }
 0x4c3   : > { %v1266_v30 = vpop.permute.xlu0 %1265  ;;  %1389 = vmatpush.bf16.msrb.mxu1 %v6191_v49  ;;  %v4996_v49 = vld [vmem:[%s7358_s11] sm:$0xf] }
 0x4c4   : > { %4927 = vmatmul.msk.bf16.vlgmr.msra.gmra.mxu2 %vm1040_vm2, %v1197_v28  ;;  %1278 = vmatpush.bf16.msra.mxu0 %v1266_v30  ;;  %v5029_v28 = vor.u32 %v6215_v26, %v5028_v25  ;;  %v6213_v30 = vld [vmem:[%s7358_s11 + $0x34] sm:$0xf0]  ;;  %v1449_v25 = vperm.slane %v758_v18, 2 }
 0x4c7   : > { %4929 = vmatmul.msk.bf16.vlgmr.msra.gmra.mxu0 %vm1040_vm2, %v1264_v31  ;;  %1390 = vmatpush.bf16.msrb.mxu1 %v6190_v50  ;;  %v7561_v31 = vsel %vm1408_vm6, %v6661_v11, %v1407_v27  ;;  %v6207_v50 = vld [vmem:[%s7358_s11 + $0x4] sm:$0xf0] }
 0x531   : > { %v1146_v33 = vpop.f32.mrf.mxu0 }
 0x539   : > { %v1148_v37 = vpop.f32.mrf.mxu0 }
 0x53a   : > { %v6603_v41 = vpack.i.bf16 %v1148_v37, %v1146_v33  ;;  %v5021_v33 = vor.u32 %v6213_v30, %v5020_v29  ;;  %v5013_v37 = vor.u32 %v6211_v35, %v5012_v34 }
 0x544   : > { %v1280_v40 = vpop.f32.mrf.mxu0 }
 0x547   : > { %v1213_v36 = vpop.f32.mrf.mxu2 }
 0x54c   : > { %v1282_v43 = vpop.f32.mrf.mxu0 }
 0x54d   : > { %v6608_v44 = vpack.i.bf16 %v1282_v43, %v1280_v40  ;;  %v6209_v40 = vld [vmem:[%s7358_s11 + $0x14] sm:$0xf0] }
 0x54f   : > { %v1215_v38 = vpop.f32.mrf.mxu2 }
 0x550   : > { %v6598_v39 = vpack.i.bf16 %v1215_v38, %v1213_v36 }
 0x552   : > { %6599 = vrot.lane.b32.xlu2 %v6598_v39, %s7043_s27  ;;  %v5004_v39 = vld [vmem:[%s7358_s11 + $0x10] sm:$0xf] }
 0x553   : > { %v5005_v43 = vor.u32 %v6209_v40, %v5004_v39  ;;  %v1471_v39 = vperm.slane %v7455_v14, 4 }
 0x55a   : > { %6604 = vrot.lane.b32.xlu2 %v6603_v41, %s7044_s24 }
 0x562   : > { %6609 = vrot.lane.b32.xlu2 %v6608_v44, %s7042_s25 }
 0x5ac   : > { %v6600_v51 = vpop.permute.xlu2 %6599 }
 0x5ad   : > { %v6602_v57 = vunpack.i.h.bf16 %v6600_v51  ;;  %v6601_v58 = vunpack.i.l.bf16 %v6600_v51  ;;  %v4997_v51 = vor.u32 %v6207_v50, %v4996_v49 }
 0x5b4   : > { %v6605_v52 = vpop.permute.xlu2 %6604 }
 0x5b5   : > { %v6607_v53 = vunpack.i.h.bf16 %v6605_v52  ;;  %v6606_v54 = vunpack.i.l.bf16 %v6605_v52  ;;  %v1452_v52 = vld [vmem:[#allocation3] sm:$0xff] }
 0x5b7   : > { %v1310_v55 = vsel %vm1019_vm0, %v7498_v20, %v6607_v53  ;;  %v1309_v56 = vsel %vm1019_vm0, %v7496_v17, %v6606_v54  ;;  %v1334_v17 = vperm.slane %v7455_v14, 3  ;;  %v1453_v53 = vld [vmem:[#allocation3 + $0x8] sm:$0xff] }
 0x5b8   : > { %v1312_v63 = vsel %vm1311_vm4, %v1309_v56, %v6601_v58  ;;  %v1313_v0 = vsel %vm1311_vm4, %v1310_v55, %v6602_v57  ;;  %v7571_v54 = vpack.c.bf16 %v1453_v53, %v1452_v52  ;;  %v6205_v55 = vld [vmem:[%s7356_s5 + $0x38] sm:$0xff]  ;;  %v6204_v56 = vld [vmem:[%s7356_s5 + $0x30] sm:$0xff]  ;;  %v6203_v57 = vld [vmem:[%s7356_s5 + $0x28] sm:$0xff] }
 0x5b9   : > { %1520 = vmatpush.bf16.msrb.mxu2 %v6205_v55  ;;  %v6202_v58 = vld [vmem:[%s7356_s5 + $0x20] sm:$0xff]  ;;  %v6220_v55 = vld [vmem:[%s7358_s11 + $0x74] sm:$0xf] }
 0x5bc   : > { %v6610_v59 = vpop.permute.xlu2 %6609 }
 0x5bd   : > { %v6612_v60 = vunpack.i.h.bf16 %v6610_v59  ;;  %v6611_v61 = vunpack.i.l.bf16 %v6610_v59  ;;  %1521 = vmatpush.bf16.msrb.mxu2 %v6204_v56  ;;  %v6201_v59 = vld [vmem:[%s7356_s5 + $0x18] sm:$0xff] }
 0x5be   : > { %v5054_v56 = vld [vmem:[%s7358_s11 + $0x78] sm:$0xf0] }
 0x5bf   : > { %v1315_v2 = vsel %vm1314_vm5, %v1312_v63, %v6611_v61  ;;  %v1316_v3 = vsel %vm1314_vm5, %v1313_v0, %v6612_v60  ;;  %v6200_v60 = vld [vmem:[%s7356_s5 + $0x10] sm:$0xff]  ;;  %v6199_v61 = vld [vmem:[%s7356_s5 + $0x8] sm:$0xff] }
 0x5c0   : > { %v1317_v20 = vpack.c.bf16 %v1316_v3, %v1315_v2  ;;  %v6198_v2 = vld [vmem:[%s7356_s5] sm:$0xff] }
 0x5c1   : > { %1522 = vmatpush.bf16.msrb.mxu2 %v6203_v57  ;;  %v5057_v57 = vor.u32 %v6220_v55, %v5054_v56  ;;  %v1662_v55 = vperm.slane %v7455_v14, 6 }
 0x5c2   : > { %1391 = vmatmul.bf16.vlgmr.msrb.gmra.mxu1 %v1317_v20 }
 0x5c3   : > { %1645 = vmatpush.bf16.msrb.mxu0 %v5057_v57 }
 0x5c5   : > { %1523 = vmatpush.bf16.msrb.mxu2 %v6202_v58 }
 0x5c9   : > { %1524 = vmatpush.bf16.msrb.mxu2 %v6201_v59 }
 0x5cd   : > { %1525 = vmatpush.bf16.msrb.mxu2 %v6200_v60 }
 0x5d1   : > { %1526 = vmatpush.bf16.msrb.mxu2 %v6199_v61 }
 0x5d5   : > { %1527 = vmatpush.bf16.msrb.mxu2 %v6198_v2 }
 0x63f   : > { %v1392_v4 = vpop.f32.mrf.mxu1 }
 0x640   : > { %v1393_v5 = vadd.f32 %v1392_v4, %v1334_v17 }
 0x642   : > { %v1397_v6 = vadd.f32 %v1393_v5, %v7442_v62  ;;  %v6219_v62 = vld [vmem:[%s7358_s11 + $0x64] sm:$0xf0] }
 0x643   : > { %v5045_v19 = vor.u32 %v6219_v62, %v5044_v16 }
 0x644   : > { %1399 = vadd.xlane.f32.xlu0 %v1397_v6 }
 0x645   : > { %1632 = vmatpush.bf16.msra.mxu3 %v5045_v19  ;;  %v1446_v19 = vperm.slane %v758_v18, 1  ;;  %v6208_v18 = vld [vmem:[%s7358_s11 + $0x14] sm:$0xf] }
 0x647   : > { %v1394_v7 = vpop.f32.mrf.mxu1 }
 0x648   : > { %v1395_v8 = vadd.f32 %v1394_v7, %v1334_v17 }
 0x64a   : > { %v1398_v9 = vadd.f32 %v1395_v8, %v7444_v1  ;;  %v6217_v1 = vld [vmem:[%s7358_s11 + $0x54] sm:$0xf0] }
 0x64b   : > { %v5037_v23 = vor.u32 %v6217_v1, %v5036_v21 }
 0x64c   : > { %1401 = vadd.xlane.f32.xlu1 %v1398_v9 }
 0x64d   : > { %1633 = vmatpush.bf16.msra.mxu3 %v5037_v23 }
 0x651   : > { %1634 = vmatpush.bf16.msra.mxu3 %v5029_v28 }
 0x655   : > { %1635 = vmatpush.bf16.msra.mxu3 %v5021_v33  ;;  %v1659_v33 = vperm.slane %v7455_v14, 5 }
 0x659   : > { %1636 = vmatpush.bf16.msra.mxu3 %v5013_v37 }
 0x65d   : > { %1637 = vmatpush.bf16.msra.mxu3 %v5005_v43 }
 0x661   : > { %1638 = vmatpush.bf16.msra.mxu3 %v4997_v51 }
 0x664   : > { %1639 = vmatmul.bf16.vlgmr.msra.gmra.mxu3 %v7571_v54 }
 0x6b7   : > { %v1400_v36 = vpop.xlane.xlu0 %1399 }
 0x6b8   : > { %v1410_v24 = vmul.f32 %v7561_v31, %v1400_v36 }
 0x6ba   : > { %v1412_v38 = vsub.f32 %v1397_v6, %v1410_v24 }
 0x6bc   : > { %v1414_v41 = vmul.f32 %v1412_v38, %v1412_v38 }
 0x6be   : > { %1416 = vadd.xlane.f32.xlu2 %v1414_v41 }
 0x6bf   : > { %v1402_v44 = vpop.xlane.xlu1 %1401 }
 0x6c0   : > { %v1411_v45 = vmul.f32 %v7561_v31, %v1402_v44 }
 0x6c2   : > { %v1413_v46 = vsub.f32 %v1398_v9, %v1411_v45 }
 0x6c4   : > { %v1415_v48 = vmul.f32 %v1413_v46, %v1413_v46 }
 0x6c6   : > { %1418 = vadd.xlane.f32.xlu0 %v1415_v48 }
 0x6e7   : > { %v1640_v30 = vpop.f32.mrf.mxu3 }
 0x6e8   : > { %v1660_v34 = vadd.f32 %v1659_v33, %v1640_v30 }
 0x6ef   : > { %v1642_v35 = vpop.f32.mrf.mxu3 }
 0x6f0   : > { %v1661_v36 = vadd.f32 %v1659_v33, %v1642_v35 }
 0x6f2   : > { %v1666_v24 = vpack.c.bf16 %v1661_v36, %v1660_v34 }
 0x6f4   : > { %1732 = vrot.lane.b32.xlu1 %v1666_v24, %s7042_s25  ;;  %1800 = vrot.lane.b32.xlu0 %v1666_v24, %s7043_s27  ;;  %v1672_v37 = vsel %vm1019_vm0, %v1666_v24, 0 }
 0x6f5   : > { %1681 = vmatpush.bf16.xpose.msra.mxu1 %v1672_v37 }
 0x6fc   : > { %1867 = vrot.lane.b32.xlu1 %v1666_v24, %s7044_s24 }
 0x731   : > { %v1417_v63 = vpop.xlane.xlu2 %1416 }
 0x732   : > { %v1420_v0 = vmul.f32 %v1417_v63, %v7561_v31 }
 0x734   : > { %v1422_v3 = vadd.f32 1e-05, %v1420_v0 }
 0x736   : > { %6662 = vrsqrt.f32 %v1422_v3  ;;  %vm1430_vm8 = vweird.f32 %v1422_v3 }
 0x739   : > { %v1419_v20 = vpop.xlane.xlu0 %1418 }
 0x73a   : > { %v1421_v17 = vmul.f32 %v1419_v20, %v7561_v31  ;;  %v5046_v20 = vld [vmem:[%s7358_s11 + $0x68] sm:$0xf0] }
 0x73c   : > { %v6663_v4 = vpop.eup %6662  ;;  %v1423_v5 = vadd.f32 1e-05, %v1421_v17 }
 0x73d   : > { %v1425_v6 = vmul.f32 %v6663_v4, %v1422_v3  ;;  %vm1431_vm7 = vweird.f32 %v6663_v4  ;;  %v6218_v3 = vld [vmem:[%s7358_s11 + $0x64] sm:$0xf] }
 0x73e   : > { %6664 = vrsqrt.f32 %v1423_v5  ;;  %vm1432_vm9 = vmor %vm1430_vm8, %vm1431_vm7  ;;  %vm1440_vm11 = vweird.f32 %v1423_v5  ;;  %v5049_v17 = vor.u32 %v6218_v3, %v5046_v20 }
 0x73f   : > { %v1426_v7 = vmul.f32 %v6663_v4, %v1425_v6 }
 0x740   : > { %1646 = vmatpush.bf16.msrb.mxu0 %v5049_v17 }
 0x741   : > { %v1427_v8 = vmul.f32 0.5, %v1426_v7  ;;  %v6214_v7 = vld [vmem:[%s7358_s11 + $0x44] sm:$0xf] }
 0x743   : > { %v1428_v9 = vsub.f32 1.5, %v1427_v8  ;;  %v5030_v8 = vld [vmem:[%s7358_s11 + $0x48] sm:$0xf0] }
 0x744   : > { %v6665_v10 = vpop.eup %6664 }
 0x745   : > { %v1429_v11 = vmul.f32 %v6663_v4, %v1428_v9  ;;  %v1435_v12 = vmul.f32 %v6665_v10, %v1423_v5  ;;  %vm1441_vm10 = vweird.f32 %v6665_v10  ;;  %v5038_v5 = vld [vmem:[%s7358_s11 + $0x58] sm:$0xf0]  ;;  %v5033_v9 = vor.u32 %v6214_v7, %v5030_v8 }
 0x746   : > { %vm1442_vm12 = vmor %vm1440_vm11, %vm1441_vm10 }
 0x747   : > { %v1436_v13 = vmul.f32 %v6665_v10, %v1435_v12  ;;  %v1433_v15 = vsel %vm1432_vm9, %v6663_v4, %v1429_v11  ;;  %v6216_v4 = vld [vmem:[%s7358_s11 + $0x54] sm:$0xf]  ;;  %v5022_v11 = vld [vmem:[%s7358_s11 + $0x38] sm:$0xf0] }
 0x748   : > { %v1444_v32 = vmul.f32 %v1433_v15, %v1412_v38  ;;  %v5041_v6 = vor.u32 %v6216_v4, %v5038_v5  ;;  %v5014_v15 = vld [vmem:[%s7358_s11 + $0x28] sm:$0xf0] }
 0x749   : > { %v1437_v16 = vmul.f32 0.5, %v1436_v13  ;;  %v6210_v13 = vld [vmem:[%s7358_s11 + $0x24] sm:$0xf] }
 0x74a   : > { %v1447_v23 = vmul.f32 %v1446_v19, %v1444_v32  ;;  %1647 = vmatpush.bf16.msrb.mxu0 %v5041_v6 }
 0x74b   : > { %v1438_v62 = vsub.f32 1.5, %v1437_v16  ;;  %v5017_v16 = vor.u32 %v6210_v13, %v5014_v15 }
 0x74c   : > { %v7585_v27 = vadd.f32 %v1449_v25, %v1447_v23 }
 0x74d   : > { %v1439_v21 = vmul.f32 %v6665_v10, %v1438_v62  ;;  %v5006_v62 = vld [vmem:[%s7358_s11 + $0x18] sm:$0xf0] }
 0x74e   : > { %1648 = vmatpush.bf16.msrb.mxu0 %v5033_v9  ;;  %v5009_v32 = vor.u32 %v6208_v18, %v5006_v62 }
 0x74f   : > { %v1443_v1 = vsel %vm1442_vm12, %v6665_v10, %v1439_v21  ;;  %v6212_v10 = vld [vmem:[%s7358_s11 + $0x34] sm:$0xf]  ;;  %v4998_v21 = vld [vmem:[%s7358_s11 + $0x8] sm:$0xf0] }
 0x750   : > { %v1445_v22 = vmul.f32 %v1443_v1, %v1413_v46  ;;  %v5025_v12 = vor.u32 %v6212_v10, %v5022_v11 }
 0x752   : > { %v1448_v26 = vmul.f32 %v1446_v19, %v1445_v22  ;;  %1649 = vmatpush.bf16.msrb.mxu0 %v5025_v12  ;;  %v6206_v19 = vld [vmem:[%s7358_s11 + $0x4] sm:$0xf] }
 0x753   : > { %v5001_v1 = vor.u32 %v6206_v19, %v4998_v21 }
 0x754   : > { %v7587_v28 = vadd.f32 %v1449_v25, %v1448_v26 }
 0x756   : > { %v1454_v29 = vpack.c.bf16 %v7587_v28, %v7585_v27  ;;  %1650 = vmatpush.bf16.msrb.mxu0 %v5017_v16 }
 0x758   : > { %1528 = vmatmul.bf16.vlgmr.msrb.gmra.mxu2 %v1454_v29 }
 0x75a   : > { %1651 = vmatpush.bf16.msrb.mxu0 %v5009_v32 }
 0x75e   : > { %1652 = vmatpush.bf16.msrb.mxu0 %v5001_v1 }
 0x761   : > { %1653 = vmatmul.bf16.vlgmr.msrb.gmra.mxu0 %v7571_v54 }
 0x766   : > { %v1733_v45 = vpop.permute.xlu1 %1732  ;;  %v1801_v49 = vpop.permute.xlu0 %1800 }
 0x767   : > { %v1738_v46 = vsel %vm1019_vm0, %v1733_v45, 0  ;;  %v1806_v51 = vsel %vm1019_vm0, %v1801_v49, 0 }
 0x768   : > { %1747 = vmatpush.bf16.xpose.msrb.mxu3 %v1738_v46  ;;  %1815 = vmatpush.bf16.xpose.msrb.mxu1 %v1806_v51 }
 0x76e   : > { %v1868_v48 = vpop.permute.xlu1 %1867 }
 0x76f   : > { %v1873_v50 = vsel %vm1019_vm0, %v1868_v48, 0 }
 0x770   : > { %1882 = vmatpush.bf16.xpose.msra.mxu3 %v1873_v50 }
 0x7db   : > { %v1529_v38 = vpop.f32.mrf.mxu2 }
 0x7dc   : > { %v1530_v41 = vadd.f32 %v1529_v38, %v1471_v39 }
 0x7e3   : > { %v1531_v40 = vpop.f32.mrf.mxu2 }
 0x7e4   : > { %v1532_v43 = vadd.f32 %v1531_v40, %v1471_v39 }
 0x7e6   : > { %v1665_v44 = vpack.c.bf16 %v1532_v43, %v1530_v41 }
 0x7e8   : > { %1798 = vrot.lane.b32.xlu0 %v1665_v44, %s7043_s27  ;;  %1729 = vrot.lane.b32.xlu2 %v1665_v44, %s7042_s25 }
 0x7e9   : > { %5058 = vmatmul.msk.bf16.vlgmr.msra.gmra.mxu1 %vm1019_vm0, %v1665_v44 }
 0x7f0   : > { %1865 = vrot.lane.b32.xlu2 %v1665_v44, %s7044_s24 }
 0x842   : > { %v1730_v52 = vpop.permute.xlu2 %1729 }
 0x843   : > { %5060 = vmatmul.msk.bf16.vlgmr.msrb.gmra.mxu3 %vm1019_vm0, %v1730_v52 }
 0x84a   : > { %v1866_v53 = vpop.permute.xlu2 %1865 }
 0x853   : > { %5064 = vmatmul.msk.bf16.vlgmr.msra.gmra.mxu3 %vm1019_vm0, %v1866_v53 }
 0x85a   : > { %v1799_v58 = vpop.permute.xlu0 %1798 }
 0x85b   : > { %5062 = vmatmul.msk.bf16.vlgmr.msrb.gmra.mxu1 %vm1019_vm0, %v1799_v58 }
 0x866   : > { %v1683_v59 = vpop.f32.mrf.mxu1 }
 0x867   : > { %v1684_v60 = vadd.f32 %v1683_v59, %v7474_v42 }
 0x869   : > { %v1688_v61 = vsel %vm1040_vm2, %v1684_v60, -inf }
 0x86a   : > { %1689 = vmax.xlane.f32.xlu1 %v1688_v61 }
 0x86e   : > { %v1685_v63 = vpop.f32.mrf.mxu1 }
 0x86f   : > { %v7612_v0 = vadd.f32 %v1685_v63, %v7478_v47 }
 0x871   : > { %v1691_v2 = vsel %vm1040_vm2, %v7612_v0, -inf }
 0x872   : > { %1692 = vmax.xlane.f32.xlu0 %v1691_v2 }
 0x8c6   : > { %v1749_v22 = vpop.f32.mrf.mxu3 }
 0x8c7   : > { %v1750_v23 = vadd.f32 %v1749_v22, %v7474_v42 }
 0x8c9   : > { %v1754_v25 = vsel %vm1040_vm2, %v1750_v23, -inf }
 0x8ca   : > { %1755 = vmax.xlane.f32.xlu2 %v1754_v25 }
 0x8ce   : > { %v1751_v26 = vpop.f32.mrf.mxu3 }
 0x8cf   : > { %v1752_v29 = vadd.f32 %v1751_v26, %v7478_v47 }
 0x8d1   : > { %v1757_v30 = vsel %vm1040_vm2, %v1752_v29, -inf }
 0x8d2   : > { %1758 = vmax.xlane.f32.xlu1 %v1757_v30 }
 0x8d6   : > { %v1884_v33 = vpop.f32.mrf.mxu3 }
 0x8d7   : > { %v1885_v34 = vadd.f32 %v1884_v33, %v7474_v42 }
 0x8d8   : > { %v1817_v35 = vpop.f32.mrf.mxu1 }
 0x8d9   : > { %v1818_v36 = vadd.f32 %v1817_v35, %v7474_v42  ;;  %v1889_v54 = vsel %vm1040_vm2, %v1885_v34, -inf }
 0x8da   : > { %1890 = vmax.xlane.f32.xlu1 %v1889_v54 }
 0x8db   : > { %v1822_v24 = vsel %vm1040_vm2, %v1818_v36, -inf }
 0x8dc   : > { %1823 = vmax.xlane.f32.xlu0 %v1822_v24 }
 0x8dd   : > { %v1690_v37 = vpop.xlane.xlu1 %1689 }
 0x8de   : > { %v1694_v38 = vsub.f32 %v1684_v60, %v1690_v37  ;;  %v1886_v39 = vpop.f32.mrf.mxu3 }
 0x8df   : > { %v1887_v40 = vadd.f32 %v1886_v39, %v7478_v47 }
 0x8e0   : > { %v1696_v41 = vmul.f32 1.442695, %v1694_v38  ;;  %v1819_v43 = vpop.f32.mrf.mxu1 }
 0x8e1   : > { %v1820_v44 = vadd.f32 %v1819_v43, %v7478_v47  ;;  %v1892_v42 = vsel %vm1040_vm2, %v1887_v40, -inf  ;;  %v1654_v47 = vpop.f32.mrf.mxu0 }
 0x8e2   : > { %6666 = vpow2.f32 %v1696_v41  ;;  %v1663_v56 = vadd.f32 %v1662_v55, %v1654_v47 }
 0x8e3   : > { %v1825_v45 = vsel %vm1040_vm2, %v1820_v44, -inf }
 0x8e4   : > { %1826 = vmax.xlane.f32.xlu2 %v1825_v45  ;;  %1893 = vmax.xlane.f32.xlu0 %v1892_v42 }
 0x8e5   : > { %v1693_v46 = vpop.xlane.xlu0 %1692 }
 0x8e6   : > { %v1695_v48 = vsub.f32 %v7612_v0, %v1693_v46 }
 0x8e8   : > { %v6667_v49 = vpop.eup %6666  ;;  %v1698_v50 = vmul.f32 1.442695, %v1695_v48 }
 0x8e9   : > { %v1700_v51 = vsel %vm1040_vm2, %v6667_v49, 0.0  ;;  %v1656_v57 = vpop.f32.mrf.mxu0 }
 0x8ea   : > { %6668 = vpow2.f32 %v1698_v50  ;;  %v1664_v58 = vadd.f32 %v1662_v55, %v1656_v57 }
 0x8ec   : > { %1701 = vadd.xlane.f32.xlu2 %v1700_v51  ;;  %v1667_v59 = vpack.c.bf16 %v1664_v58, %v1663_v56 }
 0x8ee   : > { %1721 = vmatpush.bf16.msra.mxu2 %v1667_v59 }
 0x8f0   : > { %v6669_v52 = vpop.eup %6668 }
 0x8f1   : > { %v1703_v53 = vsel %vm1040_vm2, %v6669_v52, 0.0 }
 0x8f2   : > { %1704 = vadd.xlane.f32.xlu1 %v1703_v53 }
 0x90b   : > { %1778 = vrot.lane.b32.xlu1 %v1667_v59, %s7042_s25 }
 0x93d   : > { %v1756_v61 = vpop.xlane.xlu2 %1755 }
 0x93e   : > { %v1760_v2 = vsub.f32 %v1750_v23, %v1756_v61  ;;  %v6228_v61 = vld [vmem:[%s7364_s30 + $0x30] sm:$0xff] }
 0x940   : > { %v1762_v20 = vmul.f32 1.442695, %v1760_v2 }
 0x945   : > { %v1759_v60 = vpop.xlane.xlu1 %1758 }
 0x946   : > { %v1761_v6 = vsub.f32 %v1752_v29, %v1759_v60  ;;  %v6229_v60 = vld [vmem:[%s7364_s30 + $0x38] sm:$0xff] }
 0x947   : > { %2028 = vmatpush.bf16.msra.mxu1 %v6229_v60  ;;  %v6255_v60 = vld [vmem:[%s7366_s0 + $0x30c] sm:$0xf] }
 0x948   : > { %v1764_v10 = vmul.f32 1.442695, %v1761_v6 }
 0x94b   : > { %2029 = vmatpush.bf16.msra.mxu1 %v6228_v61 }
 0x94d   : > { %v1891_v17 = vpop.xlane.xlu1 %1890 }
 0x94e   : > { %v1895_v7 = vsub.f32 %v1885_v34, %v1891_v17 }
 0x94f   : > { %v1824_v63 = vpop.xlane.xlu0 %1823 }
 0x950   : > { %v1828_v0 = vsub.f32 %v1818_v36, %v1824_v63  ;;  %v1897_v11 = vmul.f32 1.442695, %v1895_v7 }
 0x952   : > { %v1830_v3 = vmul.f32 1.442695, %v1828_v0 }
 0x954   : > { %6670 = vpow2.f32 %v1830_v3 }
 0x955   : > { %6672 = vpow2.f32 %v1762_v20 }
 0x957   : > { %v1827_v4 = vpop.xlane.xlu2 %1826  ;;  %v1894_v12 = vpop.xlane.xlu0 %1893 }
 0x958   : > { %v1829_v5 = vsub.f32 %v1820_v44, %v1827_v4  ;;  %v1896_v18 = vsub.f32 %v1887_v40, %v1894_v12  ;;  %v6223_v12 = vld [vmem:[%s7364_s30 + $0x8] sm:$0xff] }
 0x95a   : > { %v7648_v14 = vpop.eup %6670  ;;  %v1832_v8 = vmul.f32 1.442695, %v1829_v5  ;;  %v1899_v21 = vmul.f32 1.442695, %v1896_v18 }
 0x95b   : > { %v1834_v9 = vsel %vm1040_vm2, %v7648_v14, 0.0  ;;  %v6673_v13 = vpop.eup %6672 }
 0x95c   : > { %6674 = vpow2.f32 %v1832_v8  ;;  %1835 = vadd.xlane.f32.xlu0 %v1834_v9  ;;  %v1766_v32 = vsel %vm1040_vm2, %v6673_v13, 0.0  ;;  %v6227_v8 = vld [vmem:[%s7364_s30 + $0x28] sm:$0xff]  ;;  %v6226_v9 = vld [vmem:[%s7364_s30 + $0x20] sm:$0xff] }
 0x95d   : > { %6676 = vpow2.f32 %v1764_v10  ;;  %2030 = vmatpush.bf16.msra.mxu1 %v6227_v8  ;;  %v6225_v10 = vld [vmem:[%s7364_s30 + $0x18] sm:$0xff]  ;;  %v6252_v8 = vld [vmem:[%s7366_s0 + $0x2bc] sm:$0xf0] }
 0x95e   : > { %6678 = vpow2.f32 %v1897_v11  ;;  %v6224_v11 = vld [vmem:[%s7364_s30 + $0x10] sm:$0xff] }
 0x95f   : > { %v1702_v15 = vpop.xlane.xlu2 %1701 }
 0x960   : > { %6680 = vrcp.f32 %v1702_v15 }
 0x961   : > { %2031 = vmatpush.bf16.msra.mxu1 %v6226_v9  ;;  %v6250_v9 = vld [vmem:[%s7366_s0 + $0x284] sm:$0xf] }
 0x962   : > { %v6675_v16 = vpop.eup %6674 }
 0x963   : > { %v1837_v62 = vsel %vm1040_vm2, %v6675_v16, 0.0  ;;  %v6677_v1 = vpop.eup %6676 }
 0x964   : > { %1838 = vadd.xlane.f32.xlu2 %v1837_v62  ;;  %1767 = vadd.xlane.f32.xlu0 %v1766_v32  ;;  %v6679_v22 = vpop.eup %6678  ;;  %v1769_v25 = vsel %vm1040_vm2, %v6677_v1, 0.0 }
 0x965   : > { %v1705_v19 = vpop.xlane.xlu1 %1704  ;;  %v1901_v26 = vsel %vm1040_vm2, %v6679_v22, 0.0  ;;  %2032 = vmatpush.bf16.msra.mxu1 %v6225_v10 }
 0x966   : > { %6682 = vrcp.f32 %v1705_v19  ;;  %v6681_v23 = vpop.eup %6680 }
 0x967   : > { %6684 = vpow2.f32 %v1899_v21  ;;  %v1708_v30 = vmul.f32 %v6681_v23, %v6667_v49 }
 0x969   : > { %2033 = vmatpush.bf16.msra.mxu1 %v6224_v11  ;;  %v5182_v11 = vld [vmem:[%s7366_s0 + $0x2c0] sm:$0xf0] }
 0x96c   : > { %v6683_v29 = vpop.eup %6682  ;;  %1770 = vadd.xlane.f32.xlu2 %v1769_v25  ;;  %1902 = vadd.xlane.f32.xlu0 %v1901_v26 }
 0x96d   : > { %v1709_v33 = vmul.f32 %v6683_v29, %v6669_v52  ;;  %v6685_v35 = vpop.eup %6684  ;;  %2034 = vmatpush.bf16.msra.mxu1 %v6223_v12  ;;  %v5188_v12 = vld [vmem:[%s7366_s0 + $0x288] sm:$0xf] }
 0x96e   : > { %v1904_v36 = vsel %vm1040_vm2, %v6685_v35, 0.0 }
 0x96f   : > { %v1710_v34 = vpack.c.bf16 %v1709_v33, %v1708_v30 }
 0x971   : > { %5059 = vmatmul.msk.bf16.vlgmr.msra.gmra.mxu2 %vm1040_vm2, %v1710_v34 }
 0x974   : > { %1905 = vadd.xlane.f32.xlu2 %v1904_v36 }
 0x97d   : > { %v1779_v54 = vpop.permute.xlu1 %1778 }
 0x97e   : > { %1791 = vmatpush.bf16.msra.mxu0 %v1779_v54 }
 0x980   : > { %1845 = vrot.lane.b32.xlu0 %v1667_v59, %s7043_s27 }
 0x98c   : > { %1912 = vrot.lane.b32.xlu2 %v1667_v59, %s7044_s24 }
 0x9cf   : > { %v1836_v24 = vpop.xlane.xlu0 %1835 }
 0x9d7   : > { %v1839_v37 = vpop.xlane.xlu2 %1838  ;;  %v1768_v38 = vpop.xlane.xlu0 %1767 }
 0x9d8   : > { %6686 = vrcp.f32 %v1768_v38 }
 0x9de   : > { %v6687_v40 = vpop.eup %6686 }
 0x9df   : > { %v1771_v39 = vpop.xlane.xlu2 %1770  ;;  %v1774_v43 = vmul.f32 %v6687_v40, %v6673_v13  ;;  %v1903_v46 = vpop.xlane.xlu0 %1902  ;;  %v6222_v13 = vld [vmem:[%s7364_s30] sm:$0xff]  ;;  %s8310_s30 = sld [smem:[#allocation36_spill]] (!%p6122_p7) }
 0x9e0   : > { %6688 = vrcp.f32 %v1771_v39  ;;  %2035 = vmatpush.bf16.msra.mxu1 %v6222_v13  ;;  %v6253_v13 = vld [vmem:[%s7366_s0 + $0x2c4] sm:$0xf0] }
 0x9e1   : > { %6690 = vrcp.f32 %v1839_v37 }
 0x9e2   : > { %6692 = vrcp.f32 %v1836_v24 }
 0x9e6   : > { %v6689_v41 = vpop.eup %6688 }
 0x9e7   : > { %v1775_v44 = vmul.f32 %v6689_v41, %v6677_v1  ;;  %v1906_v45 = vpop.xlane.xlu2 %1905  ;;  %v6691_v48 = vpop.eup %6690  ;;  %v5212_v41 = vld [vmem:[%s7366_s0 + $0x380] sm:$0xf] }
 0x9e8   : > { %6694 = vrcp.f32 %v1906_v45  ;;  %v6693_v49 = vpop.eup %6692  ;;  %v1843_v51 = vmul.f32 %v6691_v48, %v6675_v16  ;;  %v6261_v48 = vld [vmem:[%s7366_s0 + $0x3c4] sm:$0xf0] }
 0x9e9   : > { %v1776_v42 = vpack.c.bf16 %v1775_v44, %v1774_v43  ;;  %6696 = vrcp.f32 %v1903_v46  ;;  %v1842_v53 = vmul.f32 %v6693_v49, %v7648_v14  ;;  %v6260_v43 = vld [vmem:[%s7366_s0 + $0x3bc] sm:$0xf0]  ;;  %v6258_v44 = vld [vmem:[%s7366_s0 + $0x384] sm:$0xf]  ;;  %v5220_v46 = vld [vmem:[%s7366_s0 + $0x388] sm:$0xf] }
 0x9ea   : > { %v5213_v45 = vor.u32 %v6260_v43, %v5212_v41  ;;  %v5221_v49 = vor.u32 %v6261_v48, %v5220_v46  ;;  %v5132_v46 = vld [vmem:[%s7366_s0 + $0x100] sm:$0xf] }
 0x9eb   : > { %5061 = vmatmul.msk.bf16.vlgmr.msra.gmra.mxu0 %vm1040_vm2, %v1776_v42  ;;  %v1844_v56 = vpack.c.bf16 %v1843_v51, %v1842_v53  ;;  %v5214_v42 = vld [vmem:[%s7366_s0 + $0x3c0] sm:$0xf0]  ;;  %v5222_v51 = vld [vmem:[%s7366_s0 + $0x3c8] sm:$0xf0]  ;;  %v6256_v53 = vld [vmem:[%s7366_s0 + $0x33c] sm:$0xf0] }
 0x9ec   : > { %v6240_v48 = vld [vmem:[%s7366_s0 + $0x13c] sm:$0xf0] }
 0x9ee   : > { %v6695_v52 = vpop.eup %6694 }
 0x9ef   : > { %v1913_v50 = vpop.permute.xlu2 %1912  ;;  %v6697_v55 = vpop.eup %6696  ;;  %v1910_v57 = vmul.f32 %v6695_v52, %v6685_v35  ;;  %v6706_v35 = vld [vmem:[%s7374_s16] sm:$0xff] }
 0x9f0   : > { %1925 = vmatpush.bf16.msrb.mxu0 %v1913_v50  ;;  %v1909_v58 = vmul.f32 %v6697_v55, %v6679_v22  ;;  %v1979_v36 = vperm.slane %v6706_v35, 7  ;;  %v6259_v50 = vld [vmem:[%s7366_s0 + $0x38c] sm:$0xf]  ;;  %v5198_v55 = vld [vmem:[%s7366_s0 + $0x340] sm:$0xf0] }
 0x9f1   : > { %v5225_v52 = vor.u32 %v6259_v50, %v5222_v51  ;;  %v5134_v50 = vld [vmem:[%s7366_s0 + $0x140] sm:$0xf0]  ;;  %v5140_v51 = vld [vmem:[%s7366_s0 + $0x108] sm:$0xf] }
 0x9f2   : > { %v1846_v47 = vpop.permute.xlu0 %1845  ;;  %v1911_v59 = vpack.c.bf16 %v1910_v57, %v1909_v58  ;;  %v5204_v58 = vld [vmem:[%s7366_s0 + $0x308] sm:$0xf] }
 0x9f3   : > { %1858 = vmatpush.bf16.msrb.mxu2 %v1846_v47  ;;  %v6254_v47 = vld [vmem:[%s7366_s0 + $0x304] sm:$0xf]  ;;  %2335 = vmatpush.bf16.msrb.mxu1 %v5225_v52 }
 0x9f4   : > { %v1723_v63 = vpop.f32.mrf.mxu2  ;;  %2321 = vmatpush.bf16.msra.mxu0 %v5221_v49  ;;  %v5201_v57 = vor.u32 %v6254_v47, %v5198_v55  ;;  %v5133_v49 = vor.u32 %v6240_v48, %v5132_v46  ;;  %v6239_v47 = vld [vmem:[%s7366_s0 + $0x10c] sm:$0xf]  ;;  %v6316_v46 = vld [vmem:[%s7366_s0 + $0x2cc] sm:$0xf0]  ;;  %v6314_v48 = vld [vmem:[%s7366_s0 + $0x294] sm:$0xf] }
 0x9f5   : > { %v5142_v55 = vld [vmem:[%s7366_s0 + $0x148] sm:$0xf0] }
 0x9f6   : > { %5063 = vmatmul.msk.bf16.vlgmr.msrb.gmra.mxu2 %vm1040_vm2, %v1844_v56 }
 0x9f7   : > { %2293 = vmatpush.bf16.msra.mxu2 %v5213_v45  ;;  %v5158_v45 = vld [vmem:[%s7366_s0 + $0x1c8] sm:$0xf0] }
 0x9fb   : > { %5065 = vmatmul.msk.bf16.vlgmr.msrb.gmra.mxu0 %vm1040_vm2, %v1911_v59  ;;  %v6257_v59 = vld [vmem:[%s7366_s0 + $0x344] sm:$0xf0] }
 0x9fc   : > { %v1725_v3 = vpop.f32.mrf.mxu2  ;;  %v5205_v61 = vor.u32 %v6257_v59, %v5204_v58  ;;  %v6236_v58 = vld [vmem:[%s7366_s0 + $0xbc] sm:$0xf0]  ;;  %v6234_v59 = vld [vmem:[%s7366_s0 + $0x84] sm:$0xf] }
 0x9fe   : > { %2322 = vmatpush.bf16.msra.mxu0 %v5205_v61  ;;  %v5118_v61 = vld [vmem:[%s7366_s0 + $0xc0] sm:$0xf0] }
 0xa68   : > { %v1793_v0 = vpop.f32.mrf.mxu0 }
 0xa70   : > { %v1795_v2 = vpop.f32.mrf.mxu0 }
 0xa71   : > { %v6613_v20 = vpack.i.bf16 %v1795_v2, %v1793_v0 }
 0xa73   : > { %6614 = vrot.lane.b32.xlu1 %v6613_v20, %s7044_s24 }
 0xa78   : > { %v1927_v17 = vpop.f32.mrf.mxu0 }
 0xa79   : > { %v1860_v4 = vpop.f32.mrf.mxu2 }
 0xa80   : > { %v1929_v5 = vpop.f32.mrf.mxu0 }
 0xa81   : > { %v6623_v6 = vpack.i.bf16 %v1929_v5, %v1927_v17  ;;  %v1862_v14 = vpop.f32.mrf.mxu2 }
 0xa82   : > { %v6618_v7 = vpack.i.bf16 %v1862_v14, %v1860_v4 }
 0xa83   : > { %6624 = vrot.lane.b32.xlu0 %v6623_v6, %s7042_s25 }
 0xa84   : > { %6619 = vrot.lane.b32.xlu1 %v6618_v7, %s7043_s27  ;;  %v5180_v7 = vld [vmem:[%s7366_s0 + $0x280] sm:$0xf] }
 0xa85   : > { %v5181_v10 = vor.u32 %v6252_v8, %v5180_v7  ;;  %v6232_v7 = vld [vmem:[%s7366_s0 + $0x3c] sm:$0xf0]  ;;  %v6230_v8 = vld [vmem:[%s7366_s0 + $0x4] sm:$0xf] }
 0xae5   : > { %v6615_v15 = vpop.permute.xlu1 %6614 }
 0xae6   : > { %v6617_v16 = vunpack.i.h.bf16 %v6615_v15  ;;  %v6616_v18 = vunpack.i.l.bf16 %v6615_v15  ;;  %v5185_v15 = vor.u32 %v6250_v9, %v5182_v11  ;;  %v5108_v11 = vld [vmem:[%s7366_s0 + $0x8] sm:$0xf] }
 0xae8   : > { %v1956_v1 = vsel %vm1019_vm0, %v1723_v63, %v6616_v18  ;;  %v1957_v22 = vsel %vm1019_vm0, %v1725_v3, %v6617_v16  ;;  %v5206_v63 = vld [vmem:[%s7366_s0 + $0x348] sm:$0xf0]  ;;  %v5189_v16 = vor.u32 %v6253_v13, %v5188_v12  ;;  %v6233_v12 = vld [vmem:[%s7366_s0 + $0x44] sm:$0xf0] }
 0xae9   : > { %v5209_v0 = vor.u32 %v6255_v60, %v5206_v63  ;;  %v6251_v18 = vld [vmem:[%s7366_s0 + $0x28c] sm:$0xf]  ;;  %v5124_v63 = vld [vmem:[%s7366_s0 + $0x88] sm:$0xf] }
 0xaea   : > { %2323 = vmatpush.bf16.msra.mxu0 %v5189_v16  ;;  %v6231_v16 = vld [vmem:[%s7366_s0 + $0xc] sm:$0xf] }
 0xaeb   : > { %2336 = vmatpush.bf16.msrb.mxu1 %v5209_v0  ;;  %v6237_v0 = vld [vmem:[%s7366_s0 + $0xc4] sm:$0xf0] }
 0xaf5   : > { %v6625_v62 = vpop.permute.xlu0 %6624 }
 0xaf6   : > { %v6620_v32 = vpop.permute.xlu1 %6619  ;;  %v6627_v23 = vunpack.i.h.bf16 %v6625_v62  ;;  %v6626_v25 = vunpack.i.l.bf16 %v6625_v62  ;;  %v5190_v62 = vld [vmem:[%s7366_s0 + $0x2c8] sm:$0xf0] }
 0xaf7   : > { %v6622_v19 = vunpack.i.h.bf16 %v6620_v32  ;;  %v6621_v21 = vunpack.i.l.bf16 %v6620_v32  ;;  %v5193_v32 = vor.u32 %v6251_v18, %v5190_v62  ;;  %v5110_v18 = vld [vmem:[%s7366_s0 + $0x48] sm:$0xf0]  ;;  %v5340_v62 = vld [vmem:[%s7366_s0 + $0x390] sm:$0xf] }
 0xaf9   : > { %v1959_v26 = vsel %vm1311_vm4, %v1957_v22, %v6622_v19  ;;  %v1958_v29 = vsel %vm1311_vm4, %v1956_v1, %v6621_v21  ;;  %v5164_v19 = vld [vmem:[%s7366_s0 + $0x200] sm:$0xf]  ;;  %v6246_v1 = vld [vmem:[%s7366_s0 + $0x204] sm:$0xf]  ;;  %2337 = vmatpush.bf16.msrb.mxu1 %v5193_v32  ;;  %v5113_v32 = vor.u32 %v6231_v16, %v5110_v18 }
 0xafa   : > { %v1960_v30 = vsel %vm1314_vm5, %v1958_v29, %v6626_v25  ;;  %v1961_v33 = vsel %vm1314_vm5, %v1959_v26, %v6627_v23  ;;  %v6248_v21 = vld [vmem:[%s7366_s0 + $0x23c] sm:$0xf0]  ;;  %v5166_v23 = vld [vmem:[%s7366_s0 + $0x240] sm:$0xf0]  ;;  %v5172_v25 = vld [vmem:[%s7366_s0 + $0x208] sm:$0xf] }
 0xafb   : > { %v1962_v34 = vpack.c.bf16 %v1961_v33, %v1960_v30  ;;  %v5165_v22 = vor.u32 %v6248_v21, %v5164_v19  ;;  %v6249_v26 = vld [vmem:[%s7366_s0 + $0x244] sm:$0xf0]  ;;  %v5169_v29 = vor.u32 %v6246_v1, %v5166_v23  ;;  %v6247_v33 = vld [vmem:[%s7366_s0 + $0x20c] sm:$0xf]  ;;  %v6324_v19 = vld [vmem:[%s7366_s0 + $0x3cc] sm:$0xf0] }
 0xafc   : > { %v5173_v30 = vor.u32 %v6249_v26, %v5172_v25  ;;  %v6322_v21 = vld [vmem:[%s7366_s0 + $0x394] sm:$0xf]  ;;  %v5348_v25 = vld [vmem:[%s7366_s0 + $0x398] sm:$0xf] }
 0xafd   : > { %2036 = vmatmul.bf16.vlgmr.msra.gmra.mxu1 %v1962_v34  ;;  %v5174_v34 = vld [vmem:[%s7366_s0 + $0x248] sm:$0xf0]  ;;  %v5342_v1 = vld [vmem:[%s7366_s0 + $0x3d0] sm:$0xf0]  ;;  %v6325_v26 = vld [vmem:[%s7366_s0 + $0x3d4] sm:$0xf0] }
 0xafe   : > { %v5177_v35 = vor.u32 %v6247_v33, %v5174_v34  ;;  %2324 = vmatpush.bf16.msra.mxu0 %v5173_v30  ;;  %v5345_v23 = vor.u32 %v6322_v21, %v5342_v1  ;;  %v5349_v30 = vor.u32 %v6325_v26, %v5348_v25  ;;  %v5350_v33 = vld [vmem:[%s7366_s0 + $0x3d8] sm:$0xf0]  ;;  %v5324_v34 = vld [vmem:[%s7366_s0 + $0x310] sm:$0xf]  ;;  %v6302_v25 = vld [vmem:[%s7366_s0 + $0x114] sm:$0xf] }
 0xaff   : > { %v5260_v21 = vld [vmem:[%s7366_s0 + $0x110] sm:$0xf]  ;;  %v5262_v26 = vld [vmem:[%s7366_s0 + $0x150] sm:$0xf0] }
 0xb00   : > { %2338 = vmatpush.bf16.msrb.mxu1 %v5177_v35  ;;  %v6320_v35 = vld [vmem:[%s7366_s0 + $0x34c] sm:$0xf0] }
 0xb7a   : > { %v2037_v54 = vpop.f32.mrf.mxu1 }
 0xb7b   : > { %v2038_v24 = vadd.f32 %v2037_v54, %v1979_v36  ;;  %v6244_v54 = vld [vmem:[%s7366_s0 + $0x1bc] sm:$0xf0] }
 0xb7d   : > { %v2042_v37 = vadd.f32 %v2038_v24, %v7585_v27  ;;  %v5217_v27 = vor.u32 %v6258_v44, %v5214_v42  ;;  %v6242_v24 = vld [vmem:[%s7366_s0 + $0x184] sm:$0xf]  ;;  %v6243_v44 = vld [vmem:[%s7366_s0 + $0x18c] sm:$0xf] }
 0xb7e   : > { %v5161_v42 = vor.u32 %v6243_v44, %v5158_v45 }
 0xb7f   : > { %2044 = vadd.xlane.f32.xlu1 %v2042_v37  ;;  %2307 = vmatpush.bf16.msrb.mxu3 %v5217_v27  ;;  %v6238_v27 = vld [vmem:[%s7366_s0 + $0x104] sm:$0xf] }
 0xb80   : > { %2339 = vmatpush.bf16.msrb.mxu1 %v5161_v42  ;;  %v5137_v52 = vor.u32 %v6238_v27, %v5134_v50  ;;  %v5308_v42 = vld [vmem:[%s7366_s0 + $0x290] sm:$0xf]  ;;  %v5316_v50 = vld [vmem:[%s7366_s0 + $0x298] sm:$0xf] }
 0xb81   : > { %v5309_v27 = vor.u32 %v6316_v46, %v5308_v42  ;;  %v6301_v42 = vld [vmem:[%s7366_s0 + $0xd4] sm:$0xf0] }
 0xb82   : > { %v2039_v38 = vpop.f32.mrf.mxu1 }
 0xb83   : > { %v2040_v39 = vadd.f32 %v2039_v38, %v1979_v36  ;;  %2308 = vmatpush.bf16.msrb.mxu3 %v5201_v57  ;;  %v5148_v36 = vld [vmem:[%s7366_s0 + $0x180] sm:$0xf]  ;;  %v5150_v38 = vld [vmem:[%s7366_s0 + $0x1c0] sm:$0xf0] }
 0xb84   : > { %v5153_v41 = vor.u32 %v6242_v24, %v5150_v38  ;;  %v5116_v57 = vld [vmem:[%s7366_s0 + $0x80] sm:$0xf]  ;;  %v6318_v24 = vld [vmem:[%s7366_s0 + $0x314] sm:$0xf]  ;;  %v5332_v38 = vld [vmem:[%s7366_s0 + $0x318] sm:$0xf] }
 0xb85   : > { %v2043_v40 = vadd.f32 %v2040_v39, %v7587_v28  ;;  %v5196_v28 = vld [vmem:[%s7366_s0 + $0x300] sm:$0xf]  ;;  %v5156_v39 = vld [vmem:[%s7366_s0 + $0x188] sm:$0xf]  ;;  %v5117_v60 = vor.u32 %v6236_v58, %v5116_v57  ;;  %v5292_v58 = vld [vmem:[%s7366_s0 + $0x210] sm:$0xf] }
 0xb86   : > { %v5197_v56 = vor.u32 %v6256_v53, %v5196_v28  ;;  %v6241_v28 = vld [vmem:[%s7366_s0 + $0x144] sm:$0xf0] }
 0xb87   : > { %2046 = vadd.xlane.f32.xlu2 %v2043_v40  ;;  %2309 = vmatpush.bf16.msrb.mxu3 %v5185_v15  ;;  %v5141_v53 = vor.u32 %v6241_v28, %v5140_v51  ;;  %v5109_v15 = vor.u32 %v6233_v12, %v5108_v11  ;;  %v6317_v51 = vld [vmem:[%s7366_s0 + $0x2d4] sm:$0xf0]  ;;  %v5278_v12 = vld [vmem:[%s7366_s0 + $0x1d0] sm:$0xf0] }
 0xb88   : > { %2294 = vmatpush.bf16.msra.mxu2 %v5197_v56  ;;  %v5145_v56 = vor.u32 %v6239_v47, %v5142_v55  ;;  %v6315_v47 = vld [vmem:[%s7366_s0 + $0x29c] sm:$0xf] }
 0xb89   : > { %v5318_v55 = vld [vmem:[%s7366_s0 + $0x2d8] sm:$0xf0] }
 0xb8a   : > { %2340 = vmatpush.bf16.msrb.mxu1 %v5145_v56  ;;  %v5321_v57 = vor.u32 %v6315_v47, %v5318_v55  ;;  %v6294_v47 = vld [vmem:[%s7366_s0 + $0x14] sm:$0xf] }
 0xb8b   : > { %2310 = vmatpush.bf16.msrb.mxu3 %v5169_v29  ;;  %v6323_v29 = vld [vmem:[%s7366_s0 + $0x39c] sm:$0xf]  ;;  %v5230_v55 = vld [vmem:[%s7366_s0 + $0x50] sm:$0xf0] }
 0xb8c   : > { %2295 = vmatpush.bf16.msra.mxu2 %v5181_v10  ;;  %v5102_v10 = vld [vmem:[%s7366_s0 + $0x40] sm:$0xf0] }
 0xb8d   : > { %v5105_v13 = vor.u32 %v6230_v8, %v5102_v10  ;;  %v5276_v8 = vld [vmem:[%s7366_s0 + $0x190] sm:$0xf]  ;;  %v6306_v10 = vld [vmem:[%s7366_s0 + $0x194] sm:$0xf] }
 0xb8e   : > { %v5281_v18 = vor.u32 %v6306_v10, %v5278_v12 }
 0xb8f   : > { %2311 = vmatpush.bf16.msrb.mxu3 %v5153_v41  ;;  %v6319_v41 = vld [vmem:[%s7366_s0 + $0x31c] sm:$0xf] }
 0xb90   : > { %2296 = vmatpush.bf16.msra.mxu2 %v5165_v22  ;;  %v5341_v22 = vor.u32 %v6324_v19, %v5340_v62  ;;  %v5286_v19 = vld [vmem:[%s7366_s0 + $0x1d8] sm:$0xf0] }
 0xb93   : > { %2312 = vmatpush.bf16.msrb.mxu3 %v5137_v52 }
 0xbf2   : > { %v2045_v2 = vpop.xlane.xlu1 %2044 }
 0xbf3   : > { %v2048_v3 = vmul.f32 %v2045_v2, %v7561_v31  ;;  %v5121_v2 = vor.u32 %v6234_v59, %v5118_v61  ;;  %v6312_v59 = vld [vmem:[%s7366_s0 + $0x24c] sm:$0xf0] }
 0xbf5   : > { %v7701_v20 = vsub.f32 %v2042_v37, %v2048_v3  ;;  %v5149_v37 = vor.u32 %v6244_v54, %v5148_v36  ;;  %v5125_v3 = vor.u32 %v6237_v0, %v5124_v63  ;;  %2313 = vmatpush.bf16.msrb.mxu3 %v5121_v2  ;;  %v5353_v36 = vor.u32 %v6323_v29, %v5350_v33  ;;  %v5294_v0 = vld [vmem:[%s7366_s0 + $0x250] sm:$0xf0]  ;;  %v5300_v2 = vld [vmem:[%s7366_s0 + $0x218] sm:$0xf]  ;;  %v6303_v33 = vld [vmem:[%s7366_s0 + $0x11c] sm:$0xf] }
 0xbf6   : > { %v5325_v54 = vor.u32 %v6320_v35, %v5324_v34  ;;  %v5293_v63 = vor.u32 %v6312_v59, %v5292_v58  ;;  %v5268_v29 = vld [vmem:[%s7366_s0 + $0x118] sm:$0xf] }
 0xbf7   : > { %v2052_v17 = vmul.f32 %v7701_v20, %v7701_v20  ;;  %2297 = vmatpush.bf16.msra.mxu2 %v5149_v37  ;;  %v5326_v37 = vld [vmem:[%s7366_s0 + $0x350] sm:$0xf0]  ;;  %v6297_v58 = vld [vmem:[%s7366_s0 + $0x54] sm:$0xf0] }
 0xbf9   : > { %2054 = vadd.xlane.f32.xlu0 %v2052_v17  ;;  %v6235_v17 = vld [vmem:[%s7366_s0 + $0x8c] sm:$0xf]  ;;  %2314 = vmatpush.bf16.msrb.mxu3 %v5105_v13  ;;  %v5284_v13 = vld [vmem:[%s7366_s0 + $0x198] sm:$0xf] }
 0xbfa   : > { %v2047_v4 = vpop.xlane.xlu2 %2046 }
 0xbfb   : > { %v2049_v5 = vmul.f32 %v2047_v4, %v7561_v31  ;;  %2298 = vmatpush.bf16.msra.mxu2 %v5133_v49  ;;  %v5126_v4 = vld [vmem:[%s7366_s0 + $0xc8] sm:$0xf0]  ;;  %v5310_v49 = vld [vmem:[%s7366_s0 + $0x2d0] sm:$0xf0] }
 0xbfc   : > { %v5313_v52 = vor.u32 %v6314_v48, %v5310_v49  ;;  %v6299_v48 = vld [vmem:[%s7366_s0 + $0x9c] sm:$0xf] }
 0xbfd   : > { %v7706_v6 = vsub.f32 %v2043_v40, %v2049_v5  ;;  %v6245_v40 = vld [vmem:[%s7366_s0 + $0x1c4] sm:$0xf0]  ;;  %v5129_v5 = vor.u32 %v6235_v17, %v5126_v4  ;;  %2641 = vmatpush.bf16.msra.mxu3 %v5345_v23  ;;  %v6313_v17 = vld [vmem:[%s7366_s0 + $0x254] sm:$0xf0]  ;;  %v6311_v4 = vld [vmem:[%s7366_s0 + $0x21c] sm:$0xf] }
 0xbfe   : > { %v5157_v43 = vor.u32 %v6245_v40, %v5156_v39  ;;  %v5329_v39 = vor.u32 %v6318_v24, %v5326_v37  ;;  %v6321_v40 = vld [vmem:[%s7366_s0 + $0x354] sm:$0xf0]  ;;  %v6304_v23 = vld [vmem:[%s7366_s0 + $0x14c] sm:$0xf0]  ;;  %v5270_v24 = vld [vmem:[%s7366_s0 + $0x158] sm:$0xf0] }
 0xbff   : > { %v2053_v14 = vmul.f32 %v7706_v6, %v7706_v6  ;;  %2299 = vmatpush.bf16.msra.mxu2 %v5117_v60  ;;  %2341 = vmatpush.bf16.msrb.mxu1 %v5129_v5  ;;  %v5333_v44 = vor.u32 %v6321_v40, %v5332_v38  ;;  %v6310_v60 = vld [vmem:[%s7366_s0 + $0x214] sm:$0xf]  ;;  %v5302_v5 = vld [vmem:[%s7366_s0 + $0x258] sm:$0xf0]  ;;  %v5244_v37 = vld [vmem:[%s7366_s0 + $0x90] sm:$0xf] }
 0xc00   : > { %2325 = vmatpush.bf16.msra.mxu0 %v5157_v43  ;;  %v5334_v43 = vld [vmem:[%s7366_s0 + $0x358] sm:$0xf0]  ;;  %v6300_v40 = vld [vmem:[%s7366_s0 + $0xcc] sm:$0xf0] }
 0xc01   : > { %2056 = vadd.xlane.f32.xlu1 %v2053_v14  ;;  %v5100_v14 = vld [vmem:[%s7366_s0] sm:$0xf]  ;;  %v5337_v45 = vor.u32 %v6319_v41, %v5334_v43  ;;  %2642 = vmatpush.bf16.msra.mxu3 %v5329_v39  ;;  %v6298_v41 = vld [vmem:[%s7366_s0 + $0x94] sm:$0xf]  ;;  %v5245_v49 = vor.u32 %v6300_v40, %v5244_v37  ;;  %v6353_v40 = vld [vmem:[%s7372_s3 + $0x1d8] sm:$0xff] }
 0xc02   : > { %v5101_v9 = vor.u32 %v6232_v7, %v5100_v14  ;;  %v5301_v14 = vor.u32 %v6313_v17, %v5300_v2  ;;  %v5305_v7 = vor.u32 %v6311_v4, %v5302_v5  ;;  %v5246_v43 = vld [vmem:[%s7366_s0 + $0xd0] sm:$0xf0]  ;;  %v6330_v37 = vld [vmem:[%s7372_s3 + $0x120] sm:$0xff] }
 0xc03   : > { %2342 = vmatpush.bf16.msrb.mxu1 %v5113_v32  ;;  %v6307_v32 = vld [vmem:[%s7366_s0 + $0x19c] sm:$0xf] }
 0xc04   : > { %2326 = vmatpush.bf16.msra.mxu0 %v5141_v53  ;;  %2300 = vmatpush.bf16.msra.mxu2 %v5101_v9  ;;  %v5317_v53 = vor.u32 %v6317_v51, %v5316_v50  ;;  %v6308_v9 = vld [vmem:[%s7366_s0 + $0x1cc] sm:$0xf0]  ;;  %v5249_v50 = vor.u32 %v6298_v41, %v5246_v43  ;;  %v6329_v41 = vld [vmem:[%s7372_s3 + $0x118] sm:$0xff] }
 0xc05   : > { %2643 = vmatpush.bf16.msra.mxu3 %v5313_v52  ;;  %v5277_v11 = vor.u32 %v6308_v9, %v5276_v8  ;;  %v5228_v51 = vld [vmem:[%s7366_s0 + $0x10] sm:$0xf]  ;;  %v6337_v43 = vld [vmem:[%s7372_s3 + $0x158] sm:$0xff] }
 0xc07   : > { %2669 = vmatpush.bf16.msra.mxu1 %v5353_v36  ;;  %v5261_v36 = vor.u32 %v6304_v23, %v5260_v21  ;;  %v6333_v23 = vld [vmem:[%s7372_s3 + $0x138] sm:$0xff] }
 0xc08   : > { %2327 = vmatpush.bf16.msra.mxu0 %v5125_v3  ;;  %2627 = vmatpush.bf16.msrb.mxu2 %v5341_v22  ;;  %v5297_v3 = vor.u32 %v6310_v60, %v5294_v0  ;;  %v5289_v22 = vor.u32 %v6307_v32, %v5286_v19  ;;  %v6295_v60 = vld [vmem:[%s7366_s0 + $0x1c] sm:$0xf] }
 0xc0a   : > { %2644 = vmatpush.bf16.msra.mxu3 %v5297_v3  ;;  %v5233_v3 = vor.u32 %v6294_v47, %v5230_v55  ;;  %v6284_v47 = vld [vmem:[%s7372_s3 + $0xb0] sm:$0xff] }
 0xc0b   : > { %2670 = vmatpush.bf16.msra.mxu1 %v5337_v45  ;;  %v5252_v45 = vld [vmem:[%s7366_s0 + $0x98] sm:$0xf]  ;;  %v6292_v55 = vld [vmem:[%s7372_s3 + $0xf0] sm:$0xff] }
 0xc0c   : > { %2328 = vmatpush.bf16.msra.mxu0 %v5109_v15  ;;  %2628 = vmatpush.bf16.msrb.mxu2 %v5325_v54  ;;  %v6309_v15 = vld [vmem:[%s7366_s0 + $0x1d4] sm:$0xf0]  ;;  %v5265_v54 = vor.u32 %v6302_v25, %v5262_v26  ;;  %v6356_v26 = vld [vmem:[%s7372_s3 + $0x1f0] sm:$0xff] }
 0xc0d   : > { %v5285_v62 = vor.u32 %v6309_v15, %v5284_v13  ;;  %v6341_v25 = vld [vmem:[%s7372_s3 + $0x178] sm:$0xff] }
 0xc0e   : > { %2645 = vmatpush.bf16.msra.mxu3 %v5281_v18 }
 0xc0f   : > { %2671 = vmatpush.bf16.msra.mxu1 %v5321_v57  ;;  %v5236_v57 = vld [vmem:[%s7366_s0 + $0x18] sm:$0xf] }
 0xc10   : > { %2655 = vmatpush.bf16.msrb.mxu0 %v5349_v30  ;;  %2629 = vmatpush.bf16.msrb.mxu2 %v5309_v27  ;;  %v6305_v30 = vld [vmem:[%s7366_s0 + $0x154] sm:$0xf0]  ;;  %v5254_v27 = vld [vmem:[%s7366_s0 + $0xd8] sm:$0xf0]  ;;  %v5237_v5 = vor.u32 %v6297_v58, %v5236_v57  ;;  %v6334_v57 = vld [vmem:[%s7372_s3 + $0x140] sm:$0xff] }
 0xc11   : > { %v5269_v39 = vor.u32 %v6305_v30, %v5268_v29  ;;  %v6332_v29 = vld [vmem:[%s7372_s3 + $0x130] sm:$0xff]  ;;  %v6269_v58 = vld [vmem:[%s7372_s3 + $0x38] sm:$0xff] }
 0xc12   : > { %2646 = vmatpush.bf16.msra.mxu3 %v5265_v54  ;;  %v6340_v30 = vld [vmem:[%s7372_s3 + $0x170] sm:$0xff]  ;;  %v6346_v54 = vld [vmem:[%s7372_s3 + $0x1a0] sm:$0xff] }
 0xc13   : > { %2672 = vmatpush.bf16.msra.mxu1 %v5305_v7 }
 0xc14   : > { %2656 = vmatpush.bf16.msrb.mxu0 %v5333_v44  ;;  %2630 = vmatpush.bf16.msrb.mxu2 %v5293_v63  ;;  %v5273_v44 = vor.u32 %v6303_v33, %v5270_v24  ;;  %v5238_v63 = vld [vmem:[%s7366_s0 + $0x58] sm:$0xf0]  ;;  %v6347_v33 = vld [vmem:[%s7372_s3 + $0x1a8] sm:$0xff]  ;;  %v6354_v24 = vld [vmem:[%s7372_s3 + $0x1e0] sm:$0xff] }
 0xc16   : > { %2647 = vmatpush.bf16.msra.mxu3 %v5249_v50  ;;  %v6350_v50 = vld [vmem:[%s7372_s3 + $0x1c0] sm:$0xff] }
 0xc17   : > { %2673 = vmatpush.bf16.msra.mxu1 %v5289_v22  ;;  %v6357_v22 = vld [vmem:[%s7372_s3 + $0x1f8] sm:$0xff] }
 0xc18   : > { %2657 = vmatpush.bf16.msrb.mxu0 %v5317_v53  ;;  %2631 = vmatpush.bf16.msrb.mxu2 %v5277_v11  ;;  %v5253_v53 = vor.u32 %v6301_v42, %v5252_v45  ;;  %v6707_v11 = vld [vmem:[%s7374_s16 + $0x8] sm:$0xff]  ;;  %v6352_v45 = vld [vmem:[%s7372_s3 + $0x1d0] sm:$0xff] }
 0xc19   : > { %v2084_v12 = vperm.slane %v6707_v11, 3  ;;  %v6343_v42 = vld [vmem:[%s7372_s3 + $0x188] sm:$0xff] }
 0xc1a   : > { %2648 = vmatpush.bf16.msra.mxu3 %v5233_v3  ;;  %v6282_v3 = vld [vmem:[%s7372_s3 + $0xa0] sm:$0xff] }
 0xc1b   : > { %2674 = vmatpush.bf16.msra.mxu1 %v5273_v44  ;;  %v6344_v44 = vld [vmem:[%s7372_s3 + $0x190] sm:$0xff] }
 0xc1c   : > { %2658 = vmatpush.bf16.msrb.mxu0 %v5301_v14  ;;  %2632 = vmatpush.bf16.msrb.mxu2 %v5261_v36  ;;  %v5241_v14 = vor.u32 %v6295_v60, %v5238_v63  ;;  %v6339_v36 = vld [vmem:[%s7372_s3 + $0x168] sm:$0xff] }
 0xc1d   : > { %v6283_v60 = vld [vmem:[%s7372_s3 + $0xa8] sm:$0xff] }
 0xc1e   : > { %v6291_v63 = vld [vmem:[%s7372_s3 + $0xe8] sm:$0xff] }
 0xc20   : > { %2659 = vmatpush.bf16.msrb.mxu0 %v5285_v62  ;;  %2633 = vmatpush.bf16.msrb.mxu2 %v5245_v49  ;;  %v6342_v49 = vld [vmem:[%s7372_s3 + $0x180] sm:$0xff] }
 0xc24   : > { %2660 = vmatpush.bf16.msrb.mxu0 %v5269_v39  ;;  %v6345_v39 = vld [vmem:[%s7372_s3 + $0x198] sm:$0xff] }
 0xc28   : > { %2661 = vmatpush.bf16.msrb.mxu0 %v5253_v53  ;;  %v6335_v53 = vld [vmem:[%s7372_s3 + $0x148] sm:$0xff] }
 0xc2c   : > { %2662 = vmatpush.bf16.msrb.mxu0 %v5237_v5  ;;  %v6275_v5 = vld [vmem:[%s7372_s3 + $0x68] sm:$0xff] }
 0xc6c   : > { %v2055_v28 = vpop.xlane.xlu0 %2054 }
 0xc6d   : > { %v2058_v56 = vmul.f32 %v2055_v28, %v7561_v31  ;;  %v6296_v28 = vld [vmem:[%s7366_s0 + $0x4c] sm:$0xf0] }
 0xc6e   : > { %v5229_v2 = vor.u32 %v6296_v28, %v5228_v51  ;;  %v6285_v51 = vld [vmem:[%s7372_s3 + $0xb8] sm:$0xff] }
 0xc6f   : > { %v7786_v61 = vadd.f32 1e-05, %v2058_v56  ;;  %v5257_v56 = vor.u32 %v6299_v48, %v5254_v27  ;;  %v6328_v48 = vld [vmem:[%s7372_s3 + $0x110] sm:$0xff]  ;;  %v6293_v28 = vld [vmem:[%s7372_s3 + $0xf8] sm:$0xff] }
 0xc70   : > { %2634 = vmatpush.bf16.msrb.mxu2 %v5229_v2  ;;  %v6336_v27 = vld [vmem:[%s7372_s3 + $0x150] sm:$0xff] }
 0xc71   : > { %6698 = vrsqrt.f32 %v7786_v61  ;;  %2675 = vmatpush.bf16.msra.mxu1 %v5257_v56  ;;  %vm2068_vm14 = vweird.f32 %v7786_v61  ;;  %v6326_v56 = vld [vmem:[%s7372_s3 + $0x100] sm:$0xff]  ;;  %v6276_v2 = vld [vmem:[%s7372_s3 + $0x70] sm:$0xff] }
 0xc74   : > { %v2057_v16 = vpop.xlane.xlu1 %2056 }
 0xc75   : > { %v2059_v1 = vmul.f32 %v2057_v16, %v7561_v31  ;;  %2676 = vmatpush.bf16.msra.mxu1 %v5241_v14  ;;  %v2087_v16 = vperm.slane %v6707_v11, 4  ;;  %v6281_v14 = vld [vmem:[%s7372_s3 + $0x98] sm:$0xff]  ;;  %v6288_v11 = vld [vmem:[%s7372_s3 + $0xd0] sm:$0xff] }
 0xc77   : > { %v7810_v34 = vpop.eup %6698  ;;  %v7812_v35 = vadd.f32 1e-05, %v2059_v1  ;;  %v6349_v1 = vld [vmem:[%s7372_s3 + $0x1b8] sm:$0xff] }
 0xc78   : > { %v2063_v38 = vmul.f32 %v7810_v34, %v7786_v61  ;;  %vm2069_vm13 = vweird.f32 %v7810_v34 }
 0xc79   : > { %6700 = vrsqrt.f32 %v7812_v35  ;;  %vm2070_vm15 = vmor %vm2068_vm14, %vm2069_vm13  ;;  %vm2078_vm1 = vweird.f32 %v7812_v35 }
 0xc7a   : > { %v2064_v46 = vmul.f32 %v7810_v34, %v2063_v38  ;;  %v6338_v38 = vld [vmem:[%s7372_s3 + $0x160] sm:$0xff] }
 0xc7c   : > { %v2065_v52 = vmul.f32 0.5, %v2064_v46  ;;  %v6351_v46 = vld [vmem:[%s7372_s3 + $0x1c8] sm:$0xff] }
 0xc7e   : > { %v2066_v59 = vsub.f32 1.5, %v2065_v52  ;;  %v6327_v52 = vld [vmem:[%s7372_s3 + $0x108] sm:$0xff] }
 0xc7f   : > { %v6701_v0 = vpop.eup %6700 }
 0xc80   : > { %v2067_v17 = vmul.f32 %v7810_v34, %v2066_v59  ;;  %v2073_v4 = vmul.f32 %v6701_v0, %v7812_v35  ;;  %vm2079_vm0 = vweird.f32 %v6701_v0  ;;  %v6331_v35 = vld [vmem:[%s7372_s3 + $0x128] sm:$0xff]  ;;  %v6277_v59 = vld [vmem:[%s7372_s3 + $0x78] sm:$0xff] }
 0xc81   : > { %vm2080_vm2 = vmor %vm2078_vm1, %vm2079_vm0 }
 0xc82   : > { %v2074_v7 = vmul.f32 %v6701_v0, %v2073_v4  ;;  %v2071_v8 = vsel %vm2070_vm15, %v7810_v34, %v2067_v17  ;;  %v6355_v34 = vld [vmem:[%s7372_s3 + $0x1e8] sm:$0xff]  ;;  %v6290_v17 = vld [vmem:[%s7372_s3 + $0xe0] sm:$0xff] }
 0xc83   : > { %v2082_v13 = vmul.f32 %v2071_v8, %v7701_v20  ;;  %v6267_v4 = vld [vmem:[%s7372_s3 + $0x28] sm:$0xff]  ;;  %v6266_v8 = vld [vmem:[%s7372_s3 + $0x20] sm:$0xff] }
 0xc84   : > { %v2075_v9 = vmul.f32 0.5, %v2074_v7  ;;  %v6289_v7 = vld [vmem:[%s7372_s3 + $0xd8] sm:$0xff] }
 0xc85   : > { %v2085_v18 = vmul.f32 %v2084_v12, %v2082_v13  ;;  %v6273_v13 = vld [vmem:[%s7372_s3 + $0x58] sm:$0xff] }
 0xc86   : > { %v2076_v10 = vsub.f32 1.5, %v2075_v9  ;;  %v6274_v9 = vld [vmem:[%s7372_s3 + $0x60] sm:$0xff] }
 0xc87   : > { %v7844_v19 = vadd.f32 %v2087_v16, %v2085_v18  ;;  %v6272_v18 = vld [vmem:[%s7372_s3 + $0x50] sm:$0xff] }
 0xc88   : > { %v2077_v61 = vmul.f32 %v6701_v0, %v2076_v10  ;;  %v6280_v10 = vld [vmem:[%s7372_s3 + $0x90] sm:$0xff] }
 0xc8a   : > { %v2081_v15 = vsel %vm2080_vm2, %v6701_v0, %v2077_v61  ;;  %v6268_v0 = vld [vmem:[%s7372_s3 + $0x30] sm:$0xff]  ;;  %v6279_v61 = vld [vmem:[%s7372_s3 + $0x88] sm:$0xff] }
 0xc8b   : > { %v2083_v62 = vmul.f32 %v2081_v15, %v7706_v6  ;;  %v6348_v6 = vld [vmem:[%s7372_s3 + $0x1b0] sm:$0xff]  ;;  %v6287_v15 = vld [vmem:[%s7372_s3 + $0xc8] sm:$0xff] }
 0xc8d   : > { %v2086_v32 = vmul.f32 %v2084_v12, %v2083_v62  ;;  %v6265_v12 = vld [vmem:[%s7372_s3 + $0x18] sm:$0xff]  ;;  %v6278_v62 = vld [vmem:[%s7372_s3 + $0x80] sm:$0xff] }
 0xc8f   : > { %v7846_v21 = vadd.f32 %v2087_v16, %v2086_v32  ;;  %v6264_v16 = vld [vmem:[%s7372_s3 + $0x10] sm:$0xff]  ;;  %v6286_v32 = vld [vmem:[%s7372_s3 + $0xc0] sm:$0xff] }
 0xc91   : > { %v7850_v20 = vpack.c.bf16 %v7846_v21, %v7844_v19 }
 0xc93   : > { %2301 = vmatmul.bf16.vlgmr.msra.gmra.mxu2 %v7850_v20  ;;  %2315 = vmatmul.bf16.vlgmr.msrb.gmra.mxu3 %v7850_v20 }
 0xc94   : > { %2329 = vmatmul.bf16.vlgmr.msra.gmra.mxu0 %v7850_v20  ;;  %2343 = vmatmul.bf16.vlgmr.msrb.gmra.mxu1 %v7850_v20 }
 0xc95   : > { %2979 = vmatpush.bf16.msra.mxu0 %v6349_v1  ;;  %2993 = vmatpush.bf16.msrb.mxu1 %v6357_v22  ;;  %v6263_v1 = vld [vmem:[%s7372_s3 + $0x8] sm:$0xff] }
 0xc96   : > { %2951 = vmatpush.bf16.msra.mxu2 %v6333_v23  ;;  %2965 = vmatpush.bf16.msrb.mxu3 %v6341_v25  ;;  %v6271_v22 = vld [vmem:[%s7372_s3 + $0x48] sm:$0xff] }
 0xc99   : > { %2980 = vmatpush.bf16.msra.mxu0 %v6348_v6  ;;  %2994 = vmatpush.bf16.msrb.mxu1 %v6356_v26  ;;  %v6262_v6 = vld [vmem:[%s7372_s3] sm:$0xff] }
 0xc9a   : > { %2952 = vmatpush.bf16.msra.mxu2 %v6332_v29  ;;  %2966 = vmatpush.bf16.msrb.mxu3 %v6340_v30  ;;  %v6270_v26 = vld [vmem:[%s7372_s3 + $0x40] sm:$0xff] }
 0xc9d   : > { %2981 = vmatpush.bf16.msra.mxu0 %v6347_v33  ;;  %2995 = vmatpush.bf16.msrb.mxu1 %v6355_v34 }
 0xc9e   : > { %2953 = vmatpush.bf16.msra.mxu2 %v6331_v35  ;;  %2967 = vmatpush.bf16.msrb.mxu3 %v6339_v36 }
 0xca1   : > { %2982 = vmatpush.bf16.msra.mxu0 %v6346_v54  ;;  %2996 = vmatpush.bf16.msrb.mxu1 %v6354_v24  ;;  %v2457_v54 = vld [vmem:[%s7390_s19 + $0x4] sm:$0xf] }
 0xca2   : > { %2954 = vmatpush.bf16.msra.mxu2 %v6330_v37  ;;  %2968 = vmatpush.bf16.msrb.mxu3 %v6338_v38  ;;  %v2461_v38 = vperm.slane %v2457_v54, 2 }
 0xca3   : > { %2635 = vmatmul.bf16.vlgmr.msrb.gmra.mxu2 %v7850_v20  ;;  %2649 = vmatmul.bf16.vlgmr.msra.gmra.mxu3 %v7850_v20 }
 0xca4   : > { %2663 = vmatmul.bf16.vlgmr.msrb.gmra.mxu0 %v7850_v20  ;;  %2677 = vmatmul.bf16.vlgmr.msra.gmra.mxu1 %v7850_v20 }
 0xca5   : > { %2983 = vmatpush.bf16.msra.mxu0 %v6345_v39  ;;  %2997 = vmatpush.bf16.msrb.mxu1 %v6353_v40  ;;  %v2462_v39 = vperm.slane %v2457_v54, 3 }
 0xca6   : > { %2955 = vmatpush.bf16.msra.mxu2 %v6329_v41  ;;  %2969 = vmatpush.bf16.msrb.mxu3 %v6337_v43 }
 0xca9   : > { %2984 = vmatpush.bf16.msra.mxu0 %v6344_v44  ;;  %2998 = vmatpush.bf16.msrb.mxu1 %v6352_v45  ;;  %v2459_v45 = vperm.slane %v2457_v54, 0 }
 0xcaa   : > { %2956 = vmatpush.bf16.msra.mxu2 %v6328_v48  ;;  %2970 = vmatpush.bf16.msrb.mxu3 %v6336_v27  ;;  %v5732_v27 = vld [vmem:[%s7366_s0 + $0x3a8] sm:$0xf] }
 0xcad   : > { %2985 = vmatpush.bf16.msra.mxu0 %v6343_v42  ;;  %2999 = vmatpush.bf16.msrb.mxu1 %v6351_v46  ;;  %v2460_v42 = vperm.slane %v2457_v54, 1  ;;  %v6379_v54 = vld [vmem:[%s7366_s0 + $0x2ac] sm:$0xf] }
 0xcae   : > { %2957 = vmatpush.bf16.msra.mxu2 %v6327_v52  ;;  %2971 = vmatpush.bf16.msrb.mxu3 %v6335_v53  ;;  %v5734_v52 = vld [vmem:[%s7366_s0 + $0x3e8] sm:$0xf0]  ;;  %v7946_v53 = vld [vmem:[%s7390_s19] sm:$0xf] }
 0xcb1   : > { %2986 = vmatpush.bf16.msra.mxu0 %v6342_v49  ;;  %3000 = vmatpush.bf16.msrb.mxu1 %v6350_v50 }
 0xcb2   : > { %2958 = vmatpush.bf16.msra.mxu2 %v6326_v56  ;;  %2972 = vmatpush.bf16.msrb.mxu3 %v6334_v57 }
 0xcb5   : > { %3227 = vmatpush.bf16.msrb.mxu0 %v6285_v51  ;;  %3241 = vmatpush.bf16.msra.mxu1 %v6293_v28  ;;  %v6389_v51 = vld [vmem:[%s7366_s0 + $0x3e4] sm:$0xf0]  ;;  %v6387_v28 = vld [vmem:[%s7366_s0 + $0x3ac] sm:$0xf] }
 0xcb6   : > { %3199 = vmatpush.bf16.msrb.mxu2 %v6269_v58  ;;  %3213 = vmatpush.bf16.msra.mxu3 %v6277_v59  ;;  %v5716_v58 = vld [vmem:[%s7366_s0 + $0x328] sm:$0xf] }
 0xcb9   : > { %3228 = vmatpush.bf16.msrb.mxu0 %v6284_v47  ;;  %3242 = vmatpush.bf16.msra.mxu1 %v6292_v55 }
 0xcba   : > { %3200 = vmatpush.bf16.msrb.mxu2 %v6268_v0  ;;  %3214 = vmatpush.bf16.msra.mxu3 %v6276_v2  ;;  %v5737_v0 = vor.u32 %v6387_v28, %v5734_v52  ;;  %v6385_v2 = vld [vmem:[%s7366_s0 + $0x364] sm:$0xf0]  ;;  %v5686_v28 = vld [vmem:[%s7366_s0 + $0x268] sm:$0xf0] }
 0xcbd   : > { %3229 = vmatpush.bf16.msrb.mxu0 %v6283_v60  ;;  %3243 = vmatpush.bf16.msra.mxu1 %v6291_v63  ;;  %v5733_v63 = vor.u32 %v6389_v51, %v5732_v27  ;;  %v6377_v51 = vld [vmem:[%s7366_s0 + $0x264] sm:$0xf0] }
 0xcbe   : > { %3201 = vmatpush.bf16.msrb.mxu2 %v6267_v4  ;;  %3215 = vmatpush.bf16.msra.mxu3 %v6275_v5 }
 0xcc1   : > { %3230 = vmatpush.bf16.msrb.mxu0 %v6282_v3  ;;  %3244 = vmatpush.bf16.msra.mxu1 %v6290_v17  ;;  %v6383_v3 = vld [vmem:[%s7366_s0 + $0x32c] sm:$0xf] }
 0xcc2   : > { %3202 = vmatpush.bf16.msrb.mxu2 %v6266_v8  ;;  %3216 = vmatpush.bf16.msra.mxu3 %v6274_v9  ;;  %v5718_v17 = vld [vmem:[%s7366_s0 + $0x368] sm:$0xf0]  ;;  %v2127_v8 = vperm.slane %v7946_v53, 2 }
 0xcc5   : > { %3231 = vmatpush.bf16.msrb.mxu0 %v6281_v14  ;;  %3245 = vmatpush.bf16.msra.mxu1 %v6289_v7 }
 0xcc6   : > { %3203 = vmatpush.bf16.msrb.mxu2 %v6265_v12  ;;  %3217 = vmatpush.bf16.msra.mxu3 %v6273_v13  ;;  %v6388_v12 = vld [vmem:[%s7366_s0 + $0x3dc] sm:$0xf0]  ;;  %v5717_v13 = vor.u32 %v6385_v2, %v5716_v58  ;;  %v2126_v58 = vperm.slane %v7946_v53, 1 }
 0xcc9   : > { %3232 = vmatpush.bf16.msrb.mxu0 %v6280_v10  ;;  %3246 = vmatpush.bf16.msra.mxu1 %v6288_v11  ;;  %v5724_v11 = vld [vmem:[%s7366_s0 + $0x3a0] sm:$0xf] }
 0xcca   : > { %3204 = vmatpush.bf16.msrb.mxu2 %v6264_v16  ;;  %3218 = vmatpush.bf16.msra.mxu3 %v6272_v18  ;;  %v5726_v16 = vld [vmem:[%s7366_s0 + $0x3e0] sm:$0xf0]  ;;  %v5700_v18 = vld [vmem:[%s7366_s0 + $0x2a8] sm:$0xf] }
 0xccd   : > { %3233 = vmatpush.bf16.msrb.mxu0 %v6279_v61  ;;  %3247 = vmatpush.bf16.msra.mxu1 %v6287_v15  ;;  %v5721_v61 = vor.u32 %v6383_v3, %v5718_v17  ;;  %v6386_v15 = vld [vmem:[%s7366_s0 + $0x3a4] sm:$0xf]  ;;  %v5668_v3 = vld [vmem:[%s7366_s0 + $0x1a8] sm:$0xf] }
 0xcce   : > { %3205 = vmatpush.bf16.msrb.mxu2 %v6263_v1  ;;  %3219 = vmatpush.bf16.msra.mxu3 %v6271_v22 }
 0xcd1   : > { %3234 = vmatpush.bf16.msrb.mxu0 %v6278_v62  ;;  %3248 = vmatpush.bf16.msra.mxu1 %v6286_v32 }
 0xcd2   : > { %3206 = vmatpush.bf16.msrb.mxu2 %v6262_v6  ;;  %3220 = vmatpush.bf16.msra.mxu3 %v6270_v26  ;;  %v6381_v6 = vld [vmem:[%s7366_s0 + $0x2e4] sm:$0xf0]  ;;  %v2128_v26 = vperm.slane %v7946_v53, 3 }
 0xd11   : > { %v7922_v23 = vpop.f32.mrf.mxu0  ;;  %v7924_v25 = vpop.f32.mrf.mxu1 }
 0xd12   : > { %v2345_v52 = vadd.f32 %v7924_v25, %v2128_v26 }
 0xd16   : > { %v7928_v29 = vpop.f32.mrf.mxu2  ;;  %v7930_v30 = vpop.f32.mrf.mxu3 }
 0xd19   : > { %v7932_v33 = vpop.f32.mrf.mxu0  ;;  %v7934_v34 = vpop.f32.mrf.mxu1 }
 0xd1a   : > { %v2347_v27 = vadd.f32 %v7934_v34, %v2128_v26 }
 0xd1e   : > { %v7936_v35 = vpop.f32.mrf.mxu2  ;;  %v7938_v36 = vpop.f32.mrf.mxu3 }
 0xd21   : > { %v2664_v24 = vpop.f32.mrf.mxu0  ;;  %v2678_v37 = vpop.f32.mrf.mxu1 }
 0xd22   : > { %v2665_v43 = vadd.f32 %v2664_v24, %v2461_v38  ;;  %v2679_v44 = vadd.f32 %v2678_v37, %v2462_v39  ;;  %v5702_v24 = vld [vmem:[%s7366_s0 + $0x2e8] sm:$0xf0] }
 0xd24   : > { %v2685_v47 = vmax.f32 %v2665_v43, 0.0  ;;  %v2686_v55 = vmax.f32 %v2679_v44, 0.0  ;;  %v2331_v43 = vadd.f32 %v7922_v23, %v2127_v8  ;;  %v5701_v44 = vor.u32 %v6381_v6, %v5700_v18  ;;  %v6375_v23 = vld [vmem:[%s7366_s0 + $0x22c] sm:$0xf] }
 0xd25   : > { %v5689_v2 = vor.u32 %v6375_v23, %v5686_v28  ;;  %v6368_v23 = vld [vmem:[%s7366_s0 + $0x15c] sm:$0xf0]  ;;  %v6366_v28 = vld [vmem:[%s7366_s0 + $0x124] sm:$0xf] }
 0xd26   : > { %v2636_v40 = vpop.f32.mrf.mxu2  ;;  %v2650_v41 = vpop.f32.mrf.mxu3 }
 0xd27   : > { %v2637_v59 = vadd.f32 %v2636_v40, %v2459_v45  ;;  %v2651_v60 = vadd.f32 %v2650_v41, %v2460_v42  ;;  %v5729_v40 = vor.u32 %v6386_v15, %v5726_v16  ;;  %v5708_v41 = vld [vmem:[%s7366_s0 + $0x320] sm:$0xf]  ;;  %v2317_v15 = vadd.f32 %v7930_v30, %v2126_v58 }
 0xd29   : > { %v2666_v46 = vpop.f32.mrf.mxu0  ;;  %v2680_v48 = vpop.f32.mrf.mxu1  ;;  %v2683_v62 = vmax.f32 %v2637_v59, 0.0  ;;  %v2684_v32 = vmax.f32 %v2651_v60, 0.0  ;;  %v6378_v59 = vld [vmem:[%s7366_s0 + $0x2a4] sm:$0xf] }
 0xd2a   : > { %v2667_v49 = vadd.f32 %v2666_v46, %v2461_v38  ;;  %v2681_v50 = vadd.f32 %v2680_v48, %v2462_v39  ;;  %v5725_v39 = vor.u32 %v6388_v12, %v5724_v11  ;;  %v5710_v46 = vld [vmem:[%s7366_s0 + $0x360] sm:$0xf0]  ;;  %v2333_v48 = vadd.f32 %v7932_v33, %v2127_v8  ;;  %v6376_v12 = vld [vmem:[%s7366_s0 + $0x25c] sm:$0xf0] }
 0xd2b   : > { %v5694_v60 = vld [vmem:[%s7366_s0 + $0x2e0] sm:$0xf0]  ;;  %v2319_v8 = vadd.f32 %v7938_v36, %v2126_v58  ;;  %v5652_v36 = vld [vmem:[%s7366_s0 + $0x128] sm:$0xf] }
 0xd2c   : > { %v2689_v56 = vmax.f32 %v2667_v49, 0.0  ;;  %v2690_v57 = vmax.f32 %v2681_v50, 0.0  ;;  %v5705_v49 = vor.u32 %v6379_v54, %v5702_v24  ;;  %v5684_v50 = vld [vmem:[%s7366_s0 + $0x228] sm:$0xf]  ;;  %v5660_v54 = vld [vmem:[%s7366_s0 + $0x1a0] sm:$0xf] }
 0xd2d   : > { %v5685_v25 = vor.u32 %v6377_v51, %v5684_v50  ;;  %v2354_v6 = vmax.f32 %v2319_v8, 0.0  ;;  %v6372_v24 = vld [vmem:[%s7366_s0 + $0x1dc] sm:$0xf0] }
 0xd2e   : > { %v2693_v4 = vpack.c.bf16 %v2689_v56, %v2685_v47  ;;  %v2694_v5 = vpack.c.bf16 %v2690_v57, %v2686_v55  ;;  %v2638_v14 = vpop.f32.mrf.mxu2  ;;  %v2652_v7 = vpop.f32.mrf.mxu3  ;;  %v2125_v47 = vperm.slane %v7946_v53, 0  ;;  %v5692_v55 = vld [vmem:[%s7366_s0 + $0x2a0] sm:$0xf]  ;;  %v2351_v57 = vmax.f32 %v2331_v43, 0.0 }
 0xd2f   : > { %v2639_v9 = vadd.f32 %v2638_v14, %v2459_v45  ;;  %v2653_v10 = vadd.f32 %v2652_v7, %v2460_v42  ;;  %v6384_v45 = vld [vmem:[%s7366_s0 + $0x35c] sm:$0xf0]  ;;  %v6382_v42 = vld [vmem:[%s7366_s0 + $0x324] sm:$0xf]  ;;  %v5670_v14 = vld [vmem:[%s7366_s0 + $0x1e8] sm:$0xf0] }
 0xd30   : > { %2987 = vmatmul.bf16.vlgmr.msra.gmra.mxu0 %v2693_v4  ;;  %3001 = vmatmul.bf16.vlgmr.msrb.gmra.mxu1 %v2694_v5  ;;  %v5709_v33 = vor.u32 %v6384_v45, %v5708_v41  ;;  %v5713_v34 = vor.u32 %v6382_v42, %v5710_v46  ;;  %v6380_v56 = vld [vmem:[%s7366_s0 + $0x2dc] sm:$0xf0]  ;;  %v6373_v4 = vld [vmem:[%s7366_s0 + $0x1e4] sm:$0xf0]  ;;  %v6371_v5 = vld [vmem:[%s7366_s0 + $0x1ac] sm:$0xf]  ;;  %v2305_v53 = vadd.f32 %v7936_v35, %v2125_v47 }
 0xd31   : > { %v2687_v1 = vmax.f32 %v2639_v9, 0.0  ;;  %v2688_v22 = vmax.f32 %v2653_v10, 0.0  ;;  %3485 = vmatpush.bf16.msra.mxu0 %v5733_v63  ;;  %3499 = vmatpush.bf16.msrb.mxu1 %v5737_v0  ;;  %v2355_v63 = vmax.f32 %v2333_v48, 0.0  ;;  %v2356_v0 = vmax.f32 %v2347_v27, 0.0  ;;  %v5676_v10 = vld [vmem:[%s7366_s0 + $0x220] sm:$0xf] }
 0xd32   : > { %v5693_v17 = vor.u32 %v6380_v56, %v5692_v55  ;;  %v2352_v7 = vmax.f32 %v2345_v52, 0.0  ;;  %v5697_v9 = vor.u32 %v6378_v59, %v5694_v60  ;;  %v2303_v11 = vadd.f32 %v7928_v29, %v2125_v47  ;;  %v6365_v45 = vld [vmem:[%s7366_s0 + $0xe4] sm:$0xf0]  ;;  %v6363_v42 = vld [vmem:[%s7366_s0 + $0xac] sm:$0xf] }
 0xd33   : > { %v2691_v37 = vpack.c.bf16 %v2687_v1, %v2683_v62  ;;  %v2692_v38 = vpack.c.bf16 %v2688_v22, %v2684_v32  ;;  %v5669_v35 = vor.u32 %v6373_v4, %v5668_v3  ;;  %v5673_v16 = vor.u32 %v6371_v5, %v5670_v14  ;;  %v6369_v32 = vld [vmem:[%s7366_s0 + $0x164] sm:$0xf0]  ;;  %v6367_v1 = vld [vmem:[%s7366_s0 + $0x12c] sm:$0xf]  ;;  %v5646_v52 = vld [vmem:[%s7366_s0 + $0x160] sm:$0xf0] }
 0xd34   : > { %v2359_v18 = vpack.c.bf16 %v2355_v63, %v2351_v57  ;;  %v2360_v62 = vpack.c.bf16 %v2356_v0, %v2352_v7  ;;  %v5654_v22 = vld [vmem:[%s7366_s0 + $0x168] sm:$0xf0]  ;;  %v2353_v29 = vmax.f32 %v2305_v53, 0.0  ;;  %v5677_v30 = vor.u32 %v6376_v12, %v5676_v10  ;;  %v6361_v55 = vld [vmem:[%s7366_s0 + $0x64] sm:$0xf0]  ;;  %v6413_v10 = vld [vmem:[%s7372_s3 + $0x2b8] sm:$0xff] }
 0xd35   : > { %3486 = vmatpush.bf16.msra.mxu0 %v5717_v13  ;;  %3500 = vmatpush.bf16.msrb.mxu1 %v5721_v61  ;;  %v6374_v13 = vld [vmem:[%s7366_s0 + $0x224] sm:$0xf]  ;;  %v5653_v41 = vor.u32 %v6369_v32, %v5652_v36  ;;  %v5657_v43 = vor.u32 %v6367_v1, %v5654_v22  ;;  %v5638_v46 = vld [vmem:[%s7366_s0 + $0xe8] sm:$0xf0]  ;;  %v5661_v48 = vor.u32 %v6372_v24, %v5660_v54  ;;  %v5628_v60 = vld [vmem:[%s7366_s0 + $0xa0] sm:$0xf] }
 0xd36   : > { %2959 = vmatmul.bf16.vlgmr.msra.gmra.mxu2 %v2691_v37  ;;  %2973 = vmatmul.bf16.vlgmr.msrb.gmra.mxu3 %v2692_v38  ;;  %v5678_v61 = vld [vmem:[%s7366_s0 + $0x260] sm:$0xf0]  ;;  %v6359_v56 = vld [vmem:[%s7366_s0 + $0x2c] sm:$0xf]  ;;  %v5649_v59 = vor.u32 %v6366_v28, %v5646_v52  ;;  %v6364_v63 = vld [vmem:[%s7366_s0 + $0xdc] sm:$0xf0] }
 0xd37   : > { %3457 = vmatpush.bf16.msra.mxu2 %v5725_v39  ;;  %3471 = vmatpush.bf16.msrb.mxu3 %v5729_v40  ;;  %v5681_v26 = vor.u32 %v6374_v13, %v5678_v61  ;;  %v6370_v37 = vld [vmem:[%s7366_s0 + $0x1a4] sm:$0xf]  ;;  %v2349_v39 = vmax.f32 %v2303_v11, 0.0  ;;  %v2350_v40 = vmax.f32 %v2317_v15, 0.0  ;;  %v5622_v57 = vld [vmem:[%s7366_s0 + $0x68] sm:$0xf0] }
 0xd38   : > { %v5662_v38 = vld [vmem:[%s7366_s0 + $0x1e0] sm:$0xf0]  ;;  %v5625_v3 = vor.u32 %v6359_v56, %v5622_v57  ;;  %v5612_v5 = vld [vmem:[%s7366_s0 + $0x20] sm:$0xf]  ;;  %v6421_v11 = vld [vmem:[%s7372_s3 + $0x2f8] sm:$0xff] }
 0xd39   : > { %3487 = vmatpush.bf16.msra.mxu0 %v5701_v44  ;;  %3501 = vmatpush.bf16.msrb.mxu1 %v5705_v49  ;;  %v5636_v44 = vld [vmem:[%s7366_s0 + $0xa8] sm:$0xf]  ;;  %v5665_v27 = vor.u32 %v6370_v37, %v5662_v38  ;;  %v5644_v49 = vld [vmem:[%s7366_s0 + $0x120] sm:$0xf]  ;;  %v2357_v50 = vpack.c.bf16 %v2353_v29, %v2349_v39  ;;  %v2358_v51 = vpack.c.bf16 %v2354_v6, %v2350_v40  ;;  %v6362_v0 = vld [vmem:[%s7366_s0 + $0xa4] sm:$0xf] }
 0xd3a   : > { %v5637_v47 = vor.u32 %v6365_v45, %v5636_v44  ;;  %v5645_v58 = vor.u32 %v6368_v23, %v5644_v49  ;;  %v6360_v14 = vld [vmem:[%s7366_s0 + $0x5c] sm:$0xf0]  ;;  %v6358_v7 = vld [vmem:[%s7366_s0 + $0x24] sm:$0xf]  ;;  %v6412_v12 = vld [vmem:[%s7372_s3 + $0x2b0] sm:$0xff] }
 0xd3b   : > { %3458 = vmatpush.bf16.msra.mxu2 %v5709_v33  ;;  %3472 = vmatpush.bf16.msrb.mxu3 %v5713_v34  ;;  %v5641_v33 = vor.u32 %v6363_v42, %v5638_v46  ;;  %v5620_v34 = vld [vmem:[%s7366_s0 + $0x28] sm:$0xf]  ;;  %v5614_v53 = vld [vmem:[%s7366_s0 + $0x60] sm:$0xf0]  ;;  %v5613_v8 = vor.u32 %v6360_v14, %v5612_v5  ;;  %v6420_v13 = vld [vmem:[%s7372_s3 + $0x2f0] sm:$0xff] }
 0xd3c   : > { %v6411_v61 = vld [vmem:[%s7372_s3 + $0x2a8] sm:$0xff]  ;;  %v6410_v36 = vld [vmem:[%s7372_s3 + $0x2a0] sm:$0xff]  ;;  %v6404_v32 = vld [vmem:[%s7372_s3 + $0x270] sm:$0xff] }
 0xd3d   : > { %3488 = vmatpush.bf16.msra.mxu0 %v5685_v25  ;;  %3502 = vmatpush.bf16.msrb.mxu1 %v5689_v2  ;;  %v5630_v25 = vld [vmem:[%s7366_s0 + $0xe0] sm:$0xf0]  ;;  %v5621_v2 = vor.u32 %v6361_v55, %v5620_v34  ;;  %v6419_v15 = vld [vmem:[%s7372_s3 + $0x2e8] sm:$0xff]  ;;  %v6409_v1 = vld [vmem:[%s7372_s3 + $0x298] sm:$0xff] }
 0xd3e   : > { %v5633_v4 = vor.u32 %v6362_v0, %v5630_v25  ;;  %v6417_v22 = vld [vmem:[%s7372_s3 + $0x2d8] sm:$0xff]  ;;  %v6395_v29 = vld [vmem:[%s7372_s3 + $0x228] sm:$0xff]  ;;  %v6394_v54 = vld [vmem:[%s7372_s3 + $0x220] sm:$0xff] }
 0xd3f   : > { %3459 = vmatpush.bf16.msra.mxu2 %v5693_v17  ;;  %3473 = vmatpush.bf16.msrb.mxu3 %v5697_v9  ;;  %v5629_v17 = vor.u32 %v6364_v63, %v5628_v60  ;;  %v5617_v9 = vor.u32 %v6358_v7, %v5614_v53  ;;  %v6403_v6 = vld [vmem:[%s7372_s3 + $0x268] sm:$0xff]  ;;  %v6402_v24 = vld [vmem:[%s7372_s3 + $0x260] sm:$0xff]  ;;  %v6393_v39 = vld [vmem:[%s7372_s3 + $0x218] sm:$0xff] }
 0xd40   : > { %3235 = vmatmul.bf16.vlgmr.msrb.gmra.mxu0 %v2359_v18  ;;  %3249 = vmatmul.bf16.vlgmr.msra.gmra.mxu1 %v2360_v62  ;;  %v6418_v18 = vld [vmem:[%s7372_s3 + $0x2e0] sm:$0xff]  ;;  %v6396_v62 = vld [vmem:[%s7372_s3 + $0x230] sm:$0xff]  ;;  %v6407_v37 = vld [vmem:[%s7372_s3 + $0x288] sm:$0xff] }
 0xd41   : > { %3489 = vmatpush.bf16.msra.mxu0 %v5669_v35  ;;  %3503 = vmatpush.bf16.msrb.mxu1 %v5673_v16  ;;  %v6397_v35 = vld [vmem:[%s7372_s3 + $0x238] sm:$0xff]  ;;  %v6415_v38 = vld [vmem:[%s7372_s3 + $0x2c8] sm:$0xff]  ;;  %v6400_v23 = vld [vmem:[%s7372_s3 + $0x250] sm:$0xff] }
 0xd42   : > { %v6405_v16 = vld [vmem:[%s7372_s3 + $0x278] sm:$0xff]  ;;  %v6391_v56 = vld [vmem:[%s7372_s3 + $0x208] sm:$0xff]  ;;  %v5980_v5 = vld [vmem:[%s7366_s0 + $0x3b0] sm:$0xf] }
 0xd43   : > { %3460 = vmatpush.bf16.msra.mxu2 %v5677_v30  ;;  %3474 = vmatpush.bf16.msrb.mxu3 %v5681_v26  ;;  %v6408_v30 = vld [vmem:[%s7372_s3 + $0x290] sm:$0xff]  ;;  %v6401_v40 = vld [vmem:[%s7372_s3 + $0x258] sm:$0xff]  ;;  %v6399_v57 = vld [vmem:[%s7372_s3 + $0x248] sm:$0xff] }
 0xd44   : > { %v6416_v26 = vld [vmem:[%s7372_s3 + $0x2d0] sm:$0xff]  ;;  %v5988_v44 = vld [vmem:[%s7366_s0 + $0x3b8] sm:$0xf]  ;;  %v6451_v42 = vld [vmem:[%s7366_s0 + $0x3bc] sm:$0xf] }
 0xd45   : > { %3490 = vmatpush.bf16.msra.mxu0 %v5653_v41  ;;  %3504 = vmatpush.bf16.msrb.mxu1 %v5657_v43  ;;  %v6406_v41 = vld [vmem:[%s7372_s3 + $0x280] sm:$0xff]  ;;  %v6453_v45 = vld [vmem:[%s7366_s0 + $0x3f4] sm:$0xf0]  ;;  %v5990_v49 = vld [vmem:[%s7366_s0 + $0x3f8] sm:$0xf0] }
 0xd46   : > { %3207 = vmatmul.bf16.vlgmr.msrb.gmra.mxu2 %v2357_v50  ;;  %3221 = vmatmul.bf16.vlgmr.msra.gmra.mxu3 %v2358_v51  ;;  %v6414_v43 = vld [vmem:[%s7372_s3 + $0x2c0] sm:$0xff]  ;;  %v5993_v50 = vor.u32 %v6451_v42, %v5990_v49  ;;  %v6392_v51 = vld [vmem:[%s7372_s3 + $0x210] sm:$0xff]  ;;  %v5972_v28 = vld [vmem:[%s7366_s0 + $0x338] sm:$0xf] }
 0xd47   : > { %3461 = vmatpush.bf16.msra.mxu2 %v5661_v48  ;;  %3475 = vmatpush.bf16.msrb.mxu3 %v5665_v27  ;;  %v5989_v27 = vor.u32 %v6453_v45, %v5988_v44  ;;  %v6449_v52 = vld [vmem:[%s7366_s0 + $0x374] sm:$0xf0]  ;;  %v6443_v60 = vld [vmem:[%s7366_s0 + $0x2bc] sm:$0xf]  ;;  %v6452_v14 = vld [vmem:[%s7366_s0 + $0x3ec] sm:$0xf0] }
 0xd48   : > { %v5973_v34 = vor.u32 %v6449_v52, %v5972_v28  ;;  %v5958_v63 = vld [vmem:[%s7366_s0 + $0x2f8] sm:$0xf0]  ;;  %v6450_v7 = vld [vmem:[%s7366_s0 + $0x3b4] sm:$0xf]  ;;  %v6444_v44 = vld [vmem:[%s7366_s0 + $0x2ec] sm:$0xf0] }
 0xd49   : > { %3491 = vmatpush.bf16.msra.mxu0 %v5637_v47  ;;  %3505 = vmatpush.bf16.msrb.mxu1 %v5641_v33  ;;  %v6447_v47 = vld [vmem:[%s7366_s0 + $0x33c] sm:$0xf]  ;;  %v5961_v25 = vor.u32 %v6443_v60, %v5958_v63  ;;  %v5982_v53 = vld [vmem:[%s7366_s0 + $0x3f0] sm:$0xf0]  ;;  %v6433_v49 = vld [vmem:[%s7366_s0 + $0x174] sm:$0xf0] }
 0xd4a   : > { %v5974_v33 = vld [vmem:[%s7366_s0 + $0x378] sm:$0xf0]  ;;  %v6442_v45 = vld [vmem:[%s7366_s0 + $0x2b4] sm:$0xf]  ;;  %v6429_v60 = vld [vmem:[%s7366_s0 + $0xf4] sm:$0xf0] }
 0xd4b   : > { %3462 = vmatpush.bf16.msra.mxu2 %v5645_v58  ;;  %3476 = vmatpush.bf16.msrb.mxu3 %v5649_v59  ;;  %v5977_v55 = vor.u32 %v6447_v47, %v5974_v33  ;;  %v5956_v58 = vld [vmem:[%s7366_s0 + $0x2b8] sm:$0xf] }
 0xd4c   : > { %v6445_v59 = vld [vmem:[%s7366_s0 + $0x2f4] sm:$0xf0] }
 0xd4d   : > { %3492 = vmatpush.bf16.msra.mxu0 %v5621_v2  ;;  %3506 = vmatpush.bf16.msrb.mxu1 %v5625_v3  ;;  %v5957_v0 = vor.u32 %v6445_v59, %v5956_v58  ;;  %v5934_v58 = vld [vmem:[%s7366_s0 + $0x270] sm:$0xf0]  ;;  %v5892_v59 = vld [vmem:[%s7366_s0 + $0xb8] sm:$0xf] }
 0xd4f   : > { %3463 = vmatpush.bf16.msra.mxu2 %v5629_v17  ;;  %3477 = vmatpush.bf16.msrb.mxu3 %v5633_v4  ;;  %v6390_v17 = vld [vmem:[%s7372_s3 + $0x200] sm:$0xff] }
 0xd50   : > { %3493 = vmatmul.bf16.vlgmr.msra.gmra.mxu0 %v7850_v20  ;;  %3507 = vmatmul.bf16.vlgmr.msrb.gmra.mxu1 %v7850_v20  ;;  %v6398_v4 = vld [vmem:[%s7372_s3 + $0x240] sm:$0xff] }
 0xd51   : > { %3809 = vmatpush.bf16.msrb.mxu0 %v6413_v10  ;;  %3823 = vmatpush.bf16.msra.mxu1 %v6421_v11  ;;  %v5940_v10 = vld [vmem:[%s7366_s0 + $0x238] sm:$0xf] }
 0xd52   : > { %v6441_v11 = vld [vmem:[%s7366_s0 + $0x274] sm:$0xf0] }
 0xd53   : > { %3464 = vmatpush.bf16.msra.mxu2 %v5613_v8  ;;  %3478 = vmatpush.bf16.msrb.mxu3 %v5617_v9  ;;  %v5981_v8 = vor.u32 %v6452_v14, %v5980_v5  ;;  %v5985_v9 = vor.u32 %v6450_v7, %v5982_v53 }
 0xd55   : > { %3810 = vmatpush.bf16.msrb.mxu0 %v6412_v12  ;;  %3824 = vmatpush.bf16.msra.mxu1 %v6420_v13 }
 0xd56   : > { %3465 = vmatmul.bf16.vlgmr.msra.gmra.mxu2 %v7850_v20  ;;  %3479 = vmatmul.bf16.vlgmr.msrb.gmra.mxu3 %v7850_v20 }
 0xd57   : > { %3781 = vmatpush.bf16.msrb.mxu2 %v6397_v35  ;;  %3795 = vmatpush.bf16.msra.mxu3 %v6405_v16  ;;  %v5942_v35 = vld [vmem:[%s7366_s0 + $0x278] sm:$0xf0] }
 0xd59   : > { %3811 = vmatpush.bf16.msrb.mxu0 %v6411_v61  ;;  %3825 = vmatpush.bf16.msra.mxu1 %v6419_v15  ;;  %v5941_v61 = vor.u32 %v6441_v11, %v5940_v10  ;;  %v6439_v15 = vld [vmem:[%s7366_s0 + $0x23c] sm:$0xf]  ;;  %v5918_v11 = vld [vmem:[%s7366_s0 + $0x1f0] sm:$0xf0] }
 0xd5b   : > { %3782 = vmatpush.bf16.msrb.mxu2 %v6396_v62  ;;  %3796 = vmatpush.bf16.msra.mxu3 %v6404_v32  ;;  %v6448_v62 = vld [vmem:[%s7366_s0 + $0x36c] sm:$0xf0]  ;;  %v6446_v32 = vld [vmem:[%s7366_s0 + $0x334] sm:$0xf] }
 0xd5d   : > { %3812 = vmatpush.bf16.msrb.mxu0 %v6410_v36  ;;  %3826 = vmatpush.bf16.msra.mxu1 %v6418_v18  ;;  %v5945_v36 = vor.u32 %v6439_v15, %v5942_v35  ;;  %v5964_v18 = vld [vmem:[%s7366_s0 + $0x330] sm:$0xf]  ;;  %v6423_v35 = vld [vmem:[%s7366_s0 + $0x3c] sm:$0xf] }
 0xd5f   : > { %3783 = vmatpush.bf16.msrb.mxu2 %v6395_v29  ;;  %3797 = vmatpush.bf16.msra.mxu3 %v6403_v6  ;;  %v5924_v29 = vld [vmem:[%s7366_s0 + $0x1b8] sm:$0xf] }
 0xd60   : > { %v6437_v6 = vld [vmem:[%s7366_s0 + $0x1f4] sm:$0xf0] }
 0xd61   : > { %3813 = vmatpush.bf16.msrb.mxu0 %v6409_v1  ;;  %3827 = vmatpush.bf16.msra.mxu1 %v6417_v22  ;;  %v5965_v1 = vor.u32 %v6448_v62, %v5964_v18  ;;  %v5966_v22 = vld [vmem:[%s7366_s0 + $0x370] sm:$0xf0] }
 0xd63   : > { %3784 = vmatpush.bf16.msrb.mxu2 %v6394_v54  ;;  %3798 = vmatpush.bf16.msra.mxu3 %v6402_v24  ;;  %v5925_v54 = vor.u32 %v6437_v6, %v5924_v29  ;;  %v6435_v24 = vld [vmem:[%s7366_s0 + $0x1bc] sm:$0xf]  ;;  %v3287_v29 = vld [vmem:[%s7390_s19 + $0x8] sm:$0xf] }
 0xd65   : > { %3814 = vmatpush.bf16.msrb.mxu0 %v6408_v30  ;;  %3828 = vmatpush.bf16.msra.mxu1 %v6416_v26  ;;  %v5969_v26 = vor.u32 %v6446_v32, %v5966_v22  ;;  %v5900_v32 = vld [vmem:[%s7366_s0 + $0x130] sm:$0xf]  ;;  %v6430_v22 = vld [vmem:[%s7366_s0 + $0x134] sm:$0xf] }
 0xd67   : > { %3785 = vmatpush.bf16.msrb.mxu2 %v6393_v39  ;;  %3799 = vmatpush.bf16.msra.mxu3 %v6401_v40 }
 0xd69   : > { %3815 = vmatpush.bf16.msrb.mxu0 %v6407_v37  ;;  %3829 = vmatpush.bf16.msra.mxu1 %v6415_v38  ;;  %v5926_v37 = vld [vmem:[%s7366_s0 + $0x1f8] sm:$0xf0] }
 0xd6a   : > { %v5929_v40 = vor.u32 %v6435_v24, %v5926_v37  ;;  %v5884_v24 = vld [vmem:[%s7366_s0 + $0xb0] sm:$0xf] }
 0xd6b   : > { %3786 = vmatpush.bf16.msrb.mxu2 %v6392_v51  ;;  %3800 = vmatpush.bf16.msra.mxu3 %v6400_v23  ;;  %v5910_v23 = vld [vmem:[%s7366_s0 + $0x178] sm:$0xf0]  ;;  %v6428_v37 = vld [vmem:[%s7366_s0 + $0xec] sm:$0xf0] }
 0xd6d   : > { %3816 = vmatpush.bf16.msrb.mxu0 %v6406_v41  ;;  %3830 = vmatpush.bf16.msra.mxu1 %v6414_v43  ;;  %v5948_v43 = vld [vmem:[%s7366_s0 + $0x2b0] sm:$0xf] }
 0xd6e   : > { %v5949_v42 = vor.u32 %v6444_v44, %v5948_v43  ;;  %v5886_v44 = vld [vmem:[%s7366_s0 + $0xf0] sm:$0xf0] }
 0xd6f   : > { %3787 = vmatpush.bf16.msrb.mxu2 %v6391_v56  ;;  %3801 = vmatpush.bf16.msra.mxu3 %v6399_v57  ;;  %v6438_v56 = vld [vmem:[%s7366_s0 + $0x234] sm:$0xf] }
 0xd71   : > { %4069 = vmatpush.bf16.msra.mxu0 %v5989_v27  ;;  %4083 = vmatpush.bf16.msrb.mxu1 %v5993_v50  ;;  %v5908_v27 = vld [vmem:[%s7366_s0 + $0x138] sm:$0xf] }
 0xd72   : > { %v5909_v51 = vor.u32 %v6433_v49, %v5908_v27  ;;  %v5868_v27 = vld [vmem:[%s7366_s0 + $0x30] sm:$0xf] }
 0xd73   : > { %3788 = vmatpush.bf16.msrb.mxu2 %v6390_v17  ;;  %3802 = vmatpush.bf16.msra.mxu3 %v6398_v4  ;;  %v6427_v17 = vld [vmem:[%s7366_s0 + $0xbc] sm:$0xf] }
 0xd74   : > { %v5894_v4 = vld [vmem:[%s7366_s0 + $0xf8] sm:$0xf0] }
 0xd75   : > { %4070 = vmatpush.bf16.msra.mxu0 %v5973_v34  ;;  %4084 = vmatpush.bf16.msrb.mxu1 %v5977_v55  ;;  %v5932_v34 = vld [vmem:[%s7366_s0 + $0x230] sm:$0xf]  ;;  %v5897_v7 = vor.u32 %v6427_v17, %v5894_v4 }
 0xd76   : > { %v6440_v55 = vld [vmem:[%s7366_s0 + $0x26c] sm:$0xf0] }
 0xd77   : > { %4041 = vmatpush.bf16.msra.mxu2 %v5981_v8  ;;  %4055 = vmatpush.bf16.msrb.mxu3 %v5985_v9  ;;  %v5933_v57 = vor.u32 %v6440_v55, %v5932_v34  ;;  %v6436_v8 = vld [vmem:[%s7366_s0 + $0x1ec] sm:$0xf0]  ;;  %v6434_v9 = vld [vmem:[%s7366_s0 + $0x1b4] sm:$0xf] }
 0xd79   : > { %4071 = vmatpush.bf16.msra.mxu0 %v5957_v0  ;;  %4085 = vmatpush.bf16.msrb.mxu1 %v5961_v25  ;;  %v5937_v0 = vor.u32 %v6438_v56, %v5934_v58  ;;  %v5893_v25 = vor.u32 %v6429_v60, %v5892_v59 }
 0xd7b   : > { %4042 = vmatpush.bf16.msra.mxu2 %v5965_v1  ;;  %4056 = vmatpush.bf16.msrb.mxu3 %v5969_v26  ;;  %v6432_v1 = vld [vmem:[%s7366_s0 + $0x16c] sm:$0xf0] }
 0xd7c   : > { %v5901_v6 = vor.u32 %v6432_v1, %v5900_v32  ;;  %v6477_v32 = vld [vmem:[%s7372_s3 + $0x3b8] sm:$0xff] }
 0xd7d   : > { %4072 = vmatpush.bf16.msra.mxu0 %v5941_v61  ;;  %4086 = vmatpush.bf16.msrb.mxu1 %v5945_v36  ;;  %v5921_v61 = vor.u32 %v6434_v9, %v5918_v11  ;;  %v3290_v11 = vperm.slane %v3287_v29, 1  ;;  %v6485_v1 = vld [vmem:[%s7372_s3 + $0x3f8] sm:$0xff] }
 0xd7f   : > { %4043 = vmatpush.bf16.msra.mxu2 %v5949_v42  ;;  %v3291_v42 = vperm.slane %v3287_v29, 2 }
 0xd81   : > { %4073 = vmatpush.bf16.msra.mxu0 %v5925_v54  ;;  %4087 = vmatpush.bf16.msrb.mxu1 %v5929_v40  ;;  %v6426_v40 = vld [vmem:[%s7366_s0 + $0xb4] sm:$0xf] }
 0xd82   : > { %v5889_v49 = vor.u32 %v6426_v40, %v5886_v44  ;;  %v6469_v40 = vld [vmem:[%s7372_s3 + $0x378] sm:$0xff]  ;;  %v6460_v44 = vld [vmem:[%s7372_s3 + $0x330] sm:$0xff] }
 0xd83   : > { %4044 = vmatpush.bf16.msra.mxu2 %v5933_v57 }
 0xd85   : > { %4074 = vmatpush.bf16.msra.mxu0 %v5909_v51  ;;  %v6422_v51 = vld [vmem:[%s7366_s0 + $0x34] sm:$0xf] }
 0xd89   : > { %4075 = vmatpush.bf16.msra.mxu0 %v5893_v25 }
 0xdad   : > { %v8053_v46 = vpop.f32.mrf.mxu0  ;;  %v8055_v48 = vpop.f32.mrf.mxu1 }
 0xdb5   : > { %v8070_v2 = vpop.f32.mrf.mxu0  ;;  %v8072_v3 = vpop.f32.mrf.mxu1 }
 0xdb9   : > { %v2960_v12 = vpop.f32.mrf.mxu2  ;;  %v2974_v13 = vpop.f32.mrf.mxu3 }
 0xdba   : > { %v2975_v16 = vadd.f32 %v2974_v13, %v2960_v12  ;;  %v5876_v12 = vld [vmem:[%s7366_s0 + $0x38] sm:$0xf] }
 0xdbb   : > { %v6425_v13 = vld [vmem:[%s7366_s0 + $0x74] sm:$0xf0] }
 0xdbc   : > { %v2989_v30 = vadd.f32 %v8053_v46, %v2975_v16  ;;  %v5950_v46 = vld [vmem:[%s7366_s0 + $0x2f0] sm:$0xf0]  ;;  %v5877_v15 = vor.u32 %v6425_v13, %v5876_v12 }
 0xdbd   : > { %v8093_v38 = vpop.f32.mrf.mxu0  ;;  %v8095_v39 = vpop.f32.mrf.mxu1  ;;  %v5953_v50 = vor.u32 %v6442_v45, %v5950_v46  ;;  %v5885_v46 = vor.u32 %v6428_v37, %v5884_v24  ;;  %v6481_v24 = vld [vmem:[%s7372_s3 + $0x3d8] sm:$0xff] }
 0xdbe   : > { %v3003_v41 = vadd.f32 %v8055_v48, %v2989_v30  ;;  %v6431_v48 = vld [vmem:[%s7366_s0 + $0x13c] sm:$0xf]  ;;  %4076 = vmatpush.bf16.msra.mxu0 %v5877_v15  ;;  %v5902_v30 = vld [vmem:[%s7366_s0 + $0x170] sm:$0xf0] }
 0xdbf   : > { %v5913_v47 = vor.u32 %v6431_v48, %v5910_v23  ;;  %4057 = vmatpush.bf16.msrb.mxu3 %v5953_v50  ;;  %v5905_v54 = vor.u32 %v6430_v22, %v5902_v30  ;;  %v6424_v50 = vld [vmem:[%s7366_s0 + $0x6c] sm:$0xf0]  ;;  %v5870_v48 = vld [vmem:[%s7366_s0 + $0x70] sm:$0xf0]  ;;  %v6483_v30 = vld [vmem:[%s7372_s3 + $0x3e8] sm:$0xff] }
 0xdc0   : > { %v5869_v34 = vor.u32 %v6424_v50, %v5868_v27  ;;  %v6476_v22 = vld [vmem:[%s7372_s3 + $0x3b0] sm:$0xff]  ;;  %v6461_v37 = vld [vmem:[%s7372_s3 + $0x338] sm:$0xff]  ;;  %v6459_v27 = vld [vmem:[%s7372_s3 + $0x328] sm:$0xff] }
 0xdc1   : > { %v2962_v28 = vpop.f32.mrf.mxu2  ;;  %v2976_v52 = vpop.f32.mrf.mxu3  ;;  %4088 = vmatpush.bf16.msrb.mxu1 %v5913_v47  ;;  %v6470_v50 = vld [vmem:[%s7372_s3 + $0x380] sm:$0xff] }
 0xdc2   : > { %v2977_v33 = vadd.f32 %v2976_v52, %v2962_v28  ;;  %v3292_v28 = vperm.slane %v3287_v29, 3 }
 0xdc3   : > { %4058 = vmatpush.bf16.msrb.mxu3 %v5937_v0 }
 0xdc4   : > { %v2991_v63 = vadd.f32 %v8070_v2, %v2977_v33  ;;  %v5916_v2 = vld [vmem:[%s7366_s0 + $0x1b0] sm:$0xf] }
 0xdc5   : > { %v8115_v5 = vpop.f32.mrf.mxu0  ;;  %v8117_v14 = vpop.f32.mrf.mxu1  ;;  %v5917_v10 = vor.u32 %v6436_v8, %v5916_v2  ;;  %4089 = vmatpush.bf16.msrb.mxu1 %v5897_v7 }
 0xdc6   : > { %v3005_v53 = vadd.f32 %v8072_v3, %v2991_v63  ;;  %v5878_v3 = vld [vmem:[%s7366_s0 + $0x78] sm:$0xf0] }
 0xdc7   : > { %v5881_v18 = vor.u32 %v6423_v35, %v5878_v3  ;;  %4045 = vmatpush.bf16.msra.mxu2 %v5917_v10  ;;  %4059 = vmatpush.bf16.msrb.mxu3 %v5921_v61  ;;  %v3289_v10 = vperm.slane %v3287_v29, 0  ;;  %v6484_v29 = vld [vmem:[%s7372_s3 + $0x3f0] sm:$0xff] }
 0xdc9   : > { %v3208_v16 = vpop.f32.mrf.mxu2  ;;  %v3222_v36 = vpop.f32.mrf.mxu3  ;;  %4090 = vmatpush.bf16.msrb.mxu1 %v5881_v18 }
 0xdca   : > { %v3209_v62 = vadd.f32 %v3208_v16, %v3003_v41 }
 0xdcb   : > { %4046 = vmatpush.bf16.msra.mxu2 %v5901_v6  ;;  %4060 = vmatpush.bf16.msrb.mxu3 %v5905_v54  ;;  %v6475_v6 = vld [vmem:[%s7372_s3 + $0x3a8] sm:$0xff]  ;;  %v6473_v54 = vld [vmem:[%s7372_s3 + $0x398] sm:$0xff] }
 0xdcc   : > { %v3223_v26 = vadd.f32 %v3222_v36, %v3209_v62 }
 0xdcd   : > { %v3494_v41 = vpop.f32.mrf.mxu0  ;;  %v3508_v43 = vpop.f32.mrf.mxu1 }
 0xdce   : > { %v3237_v45 = vadd.f32 %v8093_v38, %v3223_v26  ;;  %v5873_v38 = vor.u32 %v6422_v51, %v5870_v48  ;;  %v3495_v55 = vadd.f32 %v3494_v41, %v3291_v42  ;;  %v3509_v56 = vadd.f32 %v3508_v43, %v3292_v28  ;;  %v6474_v26 = vld [vmem:[%s7372_s3 + $0x3a0] sm:$0xff]  ;;  %v6472_v41 = vld [vmem:[%s7372_s3 + $0x390] sm:$0xff] }
 0xdcf   : > { %4047 = vmatpush.bf16.msra.mxu2 %v5885_v46  ;;  %4061 = vmatpush.bf16.msrb.mxu3 %v5889_v49  ;;  %v6480_v43 = vld [vmem:[%s7372_s3 + $0x3d0] sm:$0xff]  ;;  %v6479_v46 = vld [vmem:[%s7372_s3 + $0x3c8] sm:$0xff]  ;;  %v6478_v51 = vld [vmem:[%s7372_s3 + $0x3c0] sm:$0xff] }
 0xdd0   : > { %v8143_v23 = vadd.f32 %v8095_v39, %v3237_v45  ;;  %v3515_v39 = vmax.f32 %v3495_v55, 0.0  ;;  %v3516_v25 = vmax.f32 %v3509_v56, 0.0  ;;  %v6468_v45 = vld [vmem:[%s7372_s3 + $0x370] sm:$0xff]  ;;  %v6467_v49 = vld [vmem:[%s7372_s3 + $0x368] sm:$0xff]  ;;  %v6458_v48 = vld [vmem:[%s7372_s3 + $0x320] sm:$0xff] }
 0xdd1   : > { %v3210_v52 = vpop.f32.mrf.mxu2  ;;  %v3224_v47 = vpop.f32.mrf.mxu3  ;;  %v6464_v55 = vld [vmem:[%s7372_s3 + $0x350] sm:$0xff] }
 0xdd2   : > { %v3211_v33 = vadd.f32 %v3210_v52, %v3005_v53 }
 0xdd3   : > { %4048 = vmatpush.bf16.msra.mxu2 %v5869_v34  ;;  %4062 = vmatpush.bf16.msrb.mxu3 %v5873_v38  ;;  %v6465_v34 = vld [vmem:[%s7372_s3 + $0x358] sm:$0xff]  ;;  %v6456_v38 = vld [vmem:[%s7372_s3 + $0x310] sm:$0xff] }
 0xdd4   : > { %v3225_v57 = vadd.f32 %v3224_v47, %v3211_v33  ;;  %v6457_v33 = vld [vmem:[%s7372_s3 + $0x318] sm:$0xff] }
 0xdd5   : > { %v3496_v58 = vpop.f32.mrf.mxu0  ;;  %v3510_v59 = vpop.f32.mrf.mxu1 }
 0xdd6   : > { %v3239_v60 = vadd.f32 %v8115_v5, %v3225_v57  ;;  %v3497_v63 = vadd.f32 %v3496_v58, %v3291_v42  ;;  %v3511_v0 = vadd.f32 %v3510_v59, %v3292_v28  ;;  %v6471_v42 = vld [vmem:[%s7372_s3 + $0x388] sm:$0xff]  ;;  %v6466_v28 = vld [vmem:[%s7372_s3 + $0x360] sm:$0xff] }
 0xdd7   : > { %v6455_v58 = vld [vmem:[%s7372_s3 + $0x308] sm:$0xff] }
 0xdd8   : > { %v8147_v17 = vadd.f32 %v8117_v14, %v3239_v60  ;;  %v3519_v4 = vmax.f32 %v3497_v63, 0.0  ;;  %v3520_v7 = vmax.f32 %v3511_v0, 0.0  ;;  %v6463_v59 = vld [vmem:[%s7372_s3 + $0x348] sm:$0xff]  ;;  %v6454_v60 = vld [vmem:[%s7372_s3 + $0x300] sm:$0xff] }
 0xdd9   : > { %v3466_v53 = vpop.f32.mrf.mxu2  ;;  %v3480_v2 = vpop.f32.mrf.mxu3  ;;  %v6462_v63 = vld [vmem:[%s7372_s3 + $0x340] sm:$0xff]  ;;  %v3871_v0 = vld [vmem:[%s7390_s19 + $0xc] sm:$0xf] }
 0xdda   : > { %v3523_v8 = vpack.c.bf16 %v3519_v4, %v3515_v39  ;;  %v3524_v9 = vpack.c.bf16 %v3520_v7, %v3516_v25  ;;  %v3467_v5 = vadd.f32 %v3466_v53, %v3289_v10  ;;  %v3481_v12 = vadd.f32 %v3480_v2, %v3290_v11 }
 0xddb   : > { %v3875_v4 = vperm.slane %v3871_v0, 2  ;;  %v3876_v2 = vperm.slane %v3871_v0, 3 }
 0xddc   : > { %3817 = vmatmul.bf16.vlgmr.msrb.gmra.mxu0 %v3523_v8  ;;  %3831 = vmatmul.bf16.vlgmr.msra.gmra.mxu1 %v3524_v9  ;;  %v3513_v14 = vmax.f32 %v3467_v5, 0.0  ;;  %v3514_v3 = vmax.f32 %v3481_v12, 0.0 }
 0xddd   : > { %4393 = vmatpush.bf16.msrb.mxu0 %v6477_v32  ;;  %4407 = vmatpush.bf16.msra.mxu1 %v6485_v1 }
 0xde1   : > { %v3468_v13 = vpop.f32.mrf.mxu2  ;;  %v3482_v61 = vpop.f32.mrf.mxu3  ;;  %4394 = vmatpush.bf16.msrb.mxu0 %v6476_v22  ;;  %4408 = vmatpush.bf16.msra.mxu1 %v6484_v29 }
 0xde2   : > { %v3469_v15 = vadd.f32 %v3468_v13, %v3289_v10  ;;  %v3483_v35 = vadd.f32 %v3482_v61, %v3290_v11 }
 0xde4   : > { %v3517_v16 = vmax.f32 %v3469_v15, 0.0  ;;  %v3518_v36 = vmax.f32 %v3483_v35, 0.0 }
 0xde5   : > { %4395 = vmatpush.bf16.msrb.mxu0 %v6475_v6  ;;  %4409 = vmatpush.bf16.msra.mxu1 %v6483_v30 }
 0xde6   : > { %v3521_v18 = vpack.c.bf16 %v3517_v16, %v3513_v14  ;;  %v3522_v62 = vpack.c.bf16 %v3518_v36, %v3514_v3 }
 0xde8   : > { %3789 = vmatmul.bf16.vlgmr.msrb.gmra.mxu2 %v3521_v18  ;;  %3803 = vmatmul.bf16.vlgmr.msra.gmra.mxu3 %v3522_v62 }
 0xde9   : > { %4396 = vmatpush.bf16.msrb.mxu0 %v6474_v26  ;;  %4365 = vmatpush.bf16.msrb.mxu2 %v6461_v37 }
 0xdea   : > { %4379 = vmatpush.bf16.msra.mxu3 %v6469_v40 }
 0xdec   : > { %4077 = vmatmul.bf16.vlgmr.msra.gmra.mxu0 %v7850_v20  ;;  %4091 = vmatmul.bf16.vlgmr.msrb.gmra.mxu1 %v7850_v20 }
 0xded   : > { %4397 = vmatpush.bf16.msrb.mxu0 %v6473_v54  ;;  %4366 = vmatpush.bf16.msrb.mxu2 %v6460_v44  ;;  %v3874_v54 = vperm.slane %v3871_v0, 1 }
 0xdee   : > { %4380 = vmatpush.bf16.msra.mxu3 %v6468_v45 }
 0xdf1   : > { %4398 = vmatpush.bf16.msrb.mxu0 %v6472_v41  ;;  %4367 = vmatpush.bf16.msrb.mxu2 %v6459_v27 }
 0xdf2   : > { %4381 = vmatpush.bf16.msra.mxu3 %v6467_v49 }
 0xdf5   : > { %4399 = vmatpush.bf16.msrb.mxu0 %v6471_v42  ;;  %4368 = vmatpush.bf16.msrb.mxu2 %v6458_v48 }
 0xdf6   : > { %4382 = vmatpush.bf16.msra.mxu3 %v6466_v28 }
 0xdf8   : > { %4049 = vmatmul.bf16.vlgmr.msra.gmra.mxu2 %v7850_v20  ;;  %4063 = vmatmul.bf16.vlgmr.msrb.gmra.mxu3 %v7850_v20  ;;  %v6482_v20 = vld [vmem:[%s7372_s3 + $0x3e0] sm:$0xff] }
 0xdf9   : > { %4410 = vmatpush.bf16.msra.mxu1 %v6482_v20  ;;  %4400 = vmatpush.bf16.msrb.mxu0 %v6470_v50 }
 0xdfa   : > { %4369 = vmatpush.bf16.msrb.mxu2 %v6457_v33  ;;  %4383 = vmatpush.bf16.msra.mxu3 %v6465_v34  ;;  %v8189_v34 = vld [vmem:[%s7374_s16 + $0x8] sm:$0xff] }
 0xdfd   : > { %4411 = vmatpush.bf16.msra.mxu1 %v6481_v24 }
 0xdfe   : > { %4370 = vmatpush.bf16.msrb.mxu2 %v6456_v38  ;;  %4384 = vmatpush.bf16.msra.mxu3 %v6464_v55  ;;  %v4423_v38 = vperm.slane %v8189_v34, 0 }
 0xe01   : > { %4412 = vmatpush.bf16.msra.mxu1 %v6480_v43 }
 0xe02   : > { %4371 = vmatpush.bf16.msrb.mxu2 %v6455_v58  ;;  %4385 = vmatpush.bf16.msra.mxu3 %v6463_v59 }
 0xe05   : > { %4413 = vmatpush.bf16.msra.mxu1 %v6479_v46 }
 0xe06   : > { %4372 = vmatpush.bf16.msrb.mxu2 %v6454_v60  ;;  %4386 = vmatpush.bf16.msra.mxu3 %v6462_v63 }
 0xe09   : > { %4414 = vmatpush.bf16.msra.mxu1 %v6478_v51 }
 0xe59   : > { %v3818_v52 = vpop.f32.mrf.mxu0  ;;  %v3832_v47 = vpop.f32.mrf.mxu1 }
 0xe61   : > { %v3820_v56 = vpop.f32.mrf.mxu0  ;;  %v3834_v57 = vpop.f32.mrf.mxu1 }
 0xe69   : > { %v4078_v39 = vpop.f32.mrf.mxu0  ;;  %v4092_v25 = vpop.f32.mrf.mxu1 }
 0xe6a   : > { %v4079_v10 = vadd.f32 %v4078_v39, %v3875_v4  ;;  %v4093_v11 = vadd.f32 %v4092_v25, %v3876_v2 }
 0xe6b   : > { %v3790_v7 = vpop.f32.mrf.mxu2  ;;  %v3804_v53 = vpop.f32.mrf.mxu3 }
 0xe6c   : > { %v3805_v8 = vadd.f32 %v3804_v53, %v3790_v7  ;;  %v4099_v14 = vmax.f32 %v4079_v10, 0.0  ;;  %v4100_v36 = vmax.f32 %v4093_v11, 0.0 }
 0xe6e   : > { %v3819_v9 = vadd.f32 %v3818_v52, %v3805_v8 }
 0xe70   : > { %v3833_v5 = vadd.f32 %v3832_v47, %v3819_v9 }
 0xe71   : > { %v4080_v12 = vpop.f32.mrf.mxu0  ;;  %v4094_v13 = vpop.f32.mrf.mxu1 }
 0xe72   : > { %v3837_v61 = vadd.f32 %v3833_v5, %v8143_v23  ;;  %v4081_v15 = vadd.f32 %v4080_v12, %v3875_v4  ;;  %v4095_v35 = vadd.f32 %v4094_v13, %v3876_v2  ;;  %v3873_v23 = vperm.slane %v3871_v0, 0 }
 0xe73   : > { %v3792_v3 = vpop.f32.mrf.mxu2  ;;  %v3806_v16 = vpop.f32.mrf.mxu3 }
 0xe74   : > { %v4103_v18 = vmax.f32 %v4081_v15, 0.0  ;;  %v4104_v62 = vmax.f32 %v4095_v35, 0.0  ;;  %v3807_v32 = vadd.f32 %v3806_v16, %v3792_v3 }
 0xe76   : > { %v4107_v1 = vpack.c.bf16 %v4103_v18, %v4099_v14  ;;  %v4108_v22 = vpack.c.bf16 %v4104_v62, %v4100_v36  ;;  %v3821_v29 = vadd.f32 %v3820_v56, %v3807_v32 }
 0xe78   : > { %v3835_v6 = vadd.f32 %v3834_v57, %v3821_v29  ;;  %4401 = vmatmul.bf16.vlgmr.msrb.gmra.mxu0 %v4107_v1  ;;  %4415 = vmatmul.bf16.vlgmr.msra.gmra.mxu1 %v4108_v22  ;;  %v4468_v29 = vperm.slane %v8189_v34, 5 }
 0xe7a   : > { %v3838_v30 = vadd.f32 %v3835_v6, %v8147_v17 }
 0xe7b   : > { %v4050_v26 = vpop.f32.mrf.mxu2  ;;  %v4064_v20 = vpop.f32.mrf.mxu3 }
 0xe7c   : > { %v4051_v24 = vadd.f32 %v4050_v26, %v3873_v23  ;;  %v4065_v37 = vadd.f32 %v4064_v20, %v3874_v54  ;;  %v4471_v26 = vperm.slane %v8189_v34, 6 }
 0xe7e   : > { %v4097_v45 = vmax.f32 %v4051_v24, 0.0  ;;  %v4098_v42 = vmax.f32 %v4065_v37, 0.0 }
 0xe83   : > { %v4052_v40 = vpop.f32.mrf.mxu2  ;;  %v4066_v41 = vpop.f32.mrf.mxu3 }
 0xe84   : > { %v4053_v43 = vadd.f32 %v4052_v40, %v3873_v23  ;;  %v4067_v44 = vadd.f32 %v4066_v41, %v3874_v54 }
 0xe86   : > { %v4101_v46 = vmax.f32 %v4053_v43, 0.0  ;;  %v4102_v27 = vmax.f32 %v4067_v44, 0.0 }
 0xe88   : > { %v4105_v49 = vpack.c.bf16 %v4101_v46, %v4097_v45  ;;  %v4106_v50 = vpack.c.bf16 %v4102_v27, %v4098_v42 }
 0xe8a   : > { %4373 = vmatmul.bf16.vlgmr.msrb.gmra.mxu2 %v4105_v49  ;;  %4387 = vmatmul.bf16.vlgmr.msra.gmra.mxu3 %v4106_v50 }
 0xef5   : > { %v4402_v17 = vpop.f32.mrf.mxu0  ;;  %v4416_v52 = vpop.f32.mrf.mxu1 }
 0xefd   : > { %v4404_v60 = vpop.f32.mrf.mxu0  ;;  %v4418_v39 = vpop.f32.mrf.mxu1 }
 0xf0d   : > { %v4374_v51 = vpop.f32.mrf.mxu2  ;;  %v4388_v48 = vpop.f32.mrf.mxu3 }
 0xf0e   : > { %v4389_v28 = vadd.f32 %v4388_v48, %v4374_v51 }
 0xf10   : > { %v4403_v47 = vadd.f32 %v4402_v17, %v4389_v28 }
 0xf12   : > { %v4417_v33 = vadd.f32 %v4416_v52, %v4403_v47 }
 0xf14   : > { %v4421_v55 = vadd.f32 %v4417_v33, %v3837_v61 }
 0xf15   : > { %v4376_v56 = vpop.f32.mrf.mxu2  ;;  %v4390_v57 = vpop.f32.mrf.mxu3 }
 0xf16   : > { %v4391_v58 = vadd.f32 %v4390_v57, %v4376_v56  ;;  %v4424_v59 = vadd.f32 %v4423_v38, %v4421_v55 }
 0xf18   : > { %v4405_v63 = vadd.f32 %v4404_v60, %v4391_v58  ;;  %v4426_v0 = vadd.f32 %v4424_v59, %v7844_v19 }
 0xf1a   : > { %v4419_v25 = vadd.f32 %v4418_v39, %v4405_v63  ;;  %4428 = vadd.xlane.f32.xlu2 %v4426_v0 }
 0xf1c   : > { %v4422_v4 = vadd.f32 %v4419_v25, %v3838_v30 }
 0xf1e   : > { %v4425_v7 = vadd.f32 %v4423_v38, %v4422_v4 }
 0xf20   : > { %v4427_v53 = vadd.f32 %v4425_v7, %v7846_v21 }
 0xf22   : > { %4430 = vadd.xlane.f32.xlu0 %v4427_v53 }
 0xf8d   : > { %v4429_v2 = vpop.xlane.xlu2 %4428 }
 0xf8e   : > { %v4432_v8 = vmul.f32 %v4429_v2, %v7561_v31 }
 0xf90   : > { %v4434_v9 = vsub.f32 %v4426_v0, %v4432_v8 }
 0xf92   : > { %v4436_v10 = vmul.f32 %v4434_v9, %v4434_v9 }
 0xf94   : > { %4438 = vadd.xlane.f32.xlu1 %v4436_v10 }
 0xf95   : > { %v4431_v11 = vpop.xlane.xlu0 %4430 }
 0xf96   : > { %v4433_v5 = vmul.f32 %v4431_v11, %v7561_v31 }
 0xf98   : > { %v4435_v12 = vsub.f32 %v4427_v53, %v4433_v5 }
 0xf9a   : > { %v4437_v13 = vmul.f32 %v4435_v12, %v4435_v12 }
 0xf9c   : > { %4440 = vadd.xlane.f32.xlu2 %v4437_v13 }
0x1007   : > { %v4439_v19 = vpop.xlane.xlu1 %4438 }
0x1008   : > { %v4442_v61 = vmul.f32 %v4439_v19, %v7561_v31 }
0x100a   : > { %v4444_v15 = vadd.f32 1e-05, %v4442_v61 }
0x100c   : > { %6702 = vrsqrt.f32 %v4444_v15  ;;  %vm4452_vm4 = vweird.f32 %v4444_v15 }
0x100f   : > { %v4441_v35 = vpop.xlane.xlu2 %4440 }
0x1010   : > { %v4443_v21 = vmul.f32 %v4441_v35, %v7561_v31 }
0x1012   : > { %v6703_v14 = vpop.eup %6702  ;;  %v4445_v3 = vadd.f32 1e-05, %v4443_v21 }
0x1013   : > { %v4447_v16 = vmul.f32 %v6703_v14, %v4444_v15  ;;  %vm4453_vm3 = vweird.f32 %v6703_v14 }
0x1014   : > { %6704 = vrsqrt.f32 %v4445_v3  ;;  %vm4454_vm5 = vmor %vm4452_vm4, %vm4453_vm3  ;;  %vm4462_vm7 = vweird.f32 %v4445_v3 }
0x1015   : > { %v4448_v36 = vmul.f32 %v6703_v14, %v4447_v16 }
0x1017   : > { %v4449_v18 = vmul.f32 0.5, %v4448_v36 }
0x1019   : > { %v4450_v62 = vsub.f32 1.5, %v4449_v18 }
0x101a   : > { %v6705_v32 = vpop.eup %6704 }
0x101b   : > { %v4451_v1 = vmul.f32 %v6703_v14, %v4450_v62  ;;  %v4457_v22 = vmul.f32 %v6705_v32, %v4445_v3  ;;  %vm4463_vm6 = vweird.f32 %v6705_v32 }
0x101c   : > { %vm4464_vm8 = vmor %vm4462_vm7, %vm4463_vm6 }
0x101d   : > { %v4455_v6 = vsel %vm4454_vm5, %v6703_v14, %v4451_v1  ;;  %v4458_v30 = vmul.f32 %v6705_v32, %v4457_v22 }
0x101e   : > { %v4466_v31 = vmul.f32 %v4455_v6, %v4434_v9 }
0x101f   : > { %v4459_v20 = vmul.f32 0.5, %v4458_v30 }
0x1020   : > { %v4469_v23 = vmul.f32 %v4468_v29, %v4466_v31 }
0x1021   : > { %v4460_v54 = vsub.f32 1.5, %v4459_v20 }
0x1022   : > { %v4472_v24 = vadd.f32 %v4471_v26, %v4469_v23 }
0x1023   : > { %v4461_v37 = vmul.f32 %v6705_v32, %v4460_v54 }
0x1024   : > { %4474 = vst [vmem:[#allocation2] sm:$0xff] %v4472_v24 }
0x1025   : > { %v4465_v40 = vsel %vm4464_vm8, %v6705_v32, %v4461_v37 }
0x1026   : > { %v4467_v41 = vmul.f32 %v4465_v40, %v4435_v12 }
0x1028   : > { %v4470_v43 = vmul.f32 %v4468_v29, %v4467_v41  ;;  %4479 = sbr.rel (%p6122_p7) target bundleno = 4310 (0x10d6), region = 112 }
0x102a   : > { %v4473_v44 = vadd.f32 %v4471_v26, %v4470_v43 }
0x102c   : > { %4475 = vst [vmem:[#allocation2 + $0x8] sm:$0xff] %v4473_v44 }
0x102d   : > { %v6493_v45 = vld [vmem:[%s8310_s30 + $0x38] sm:$0xff]  ;;  %v6492_v42 = vld [vmem:[%s8310_s30 + $0x30] sm:$0xff]  ;;  %v6491_v46 = vld [vmem:[%s8310_s30 + $0x28] sm:$0xff]  ;;  %v4480_v48 = vpack.c.bf16 %v4473_v44, %v4472_v24 }
0x102e   : > { %4549 = vmatpush.bf16.msra.mxu0 %v6493_v45  ;;  %v6490_v27 = vld [vmem:[%s8310_s30 + $0x20] sm:$0xff]  ;;  %v6489_v49 = vld [vmem:[%s8310_s30 + $0x18] sm:$0xff]  ;;  %v6488_v50 = vld [vmem:[%s8310_s30 + $0x10] sm:$0xff] }
0x102f   : > { %v6487_v17 = vld [vmem:[%s8310_s30 + $0x8] sm:$0xff]  ;;  %v6486_v51 = vld [vmem:[%s8310_s30] sm:$0xff] }
0x1030   : > { %v6709_v28 = vld [vmem:[%s8311_s1] ss:$0 sm:$0xff] }
0x1032   : > { %4550 = vmatpush.bf16.msra.mxu0 %v6492_v42 }
0x1036   : > { %4551 = vmatpush.bf16.msra.mxu0 %v6491_v46 }
0x103a   : > { %4552 = vmatpush.bf16.msra.mxu0 %v6490_v27 }
0x103e   : > { %4553 = vmatpush.bf16.msra.mxu0 %v6489_v49 }
0x1042   : > { %4554 = vmatpush.bf16.msra.mxu0 %v6488_v50 }
0x1046   : > { %4555 = vmatpush.bf16.msra.mxu0 %v6487_v17 }
0x104a   : > { %4556 = vmatpush.bf16.msra.mxu0 %v6486_v51 }
0x104d   : > { %4557 = vmatmul.bf16.vlgmr.msra.gmra.mxu0 %v4480_v48 }
0x10ca   : > { %v4558_v52 = vpop.f32.mrf.mxu0 }
0x10cb   : > { %v4559_v47 = vadd.f32 %v6709_v28, %v4558_v52 }
0x10cd   : > { %4563 = vst [vmem:[#allocation17] sm:$0xff] %v4559_v47 }
0x10d2   : > { %v4560_v33 = vpop.f32.mrf.mxu0 }
0x10d3   : > { %v4561_v34 = vadd.f32 %v6709_v28, %v4560_v33 }
0x10d5   : > { %4564 = vst [vmem:[#allocation17 + $0x8] sm:$0xff] %v4561_v34 }
0x10d6 PF: > { %p6548_p2 = scmp.eq.s32.totalorder %s7235_s23, 1  ;;  %s7047_s22 = smov [#allocation17]  }
0x10d7   : > { %s4570_s12 = sshll.u32 %s7047_s22, 4  ;;  %s8312_s24 = sld [smem:[#allocation38_spill]]  ;;  %s4571_s12 = int_to_ptr.vmem [resolvable:$true] %s4570_s12 }
0x10d8   : > { %s7048_s11 = smov 128   ;;  %s7049_s0 = smov 8  }
0x10dd   : > { %s4572_s5 = sshll.u32 %s8312_s24, 4  ;;  %s4573_s5 = int_to_ptr.hbm [resolvable:$true] %s4572_s5 }
0x10de   : > { %6516 = dma.vmem_to_hbm [thread:$0]  (%p6548_p2), %s4571_s12, 256, %s4573_s5, [#allocation5], %s7048_s11, %s7048_s11, %s7049_s0  }
0x10df   : > { %7015 = dma.done.wait (%p6548_p2), [#allocation5], 256  }
0x10e0   : > { %7017 = vsyncadd (%p6548_p2), [#allocation5], 4294967040 }
0x10e1 PF: > { %s8313_s28 = sld [smem:[#allocation25_spill]]  ;;  %s8316_s25 = smov %s7024_s26 }
0x10e2   : > { %s8314_s3 = sld [smem:[#allocation24_spill]] }
0x10e3   : > { %s8315_s27 = sld [smem:[#allocation26_spill]] }
0x10e7   : > { %p34_p8 = scmp.ge.s32.totalorder %s8313_s28, 4  }
0x10e8   : > { %s8317_s26 = smov %s8314_s3 }
0x10e9   :  { %36 = sbr.rel (!%p34_p8) target bundleno = 23 (0x17), region = 200 }
0x10ee   :  { %4589 = vsyncpa [#allocation4], 1 }
0x10ef   :  { %4591 = vsyncpa [#allocation4 + $0x1], 1 }
0x10f0   :  { %4592 = vsyncpa [#allocation7], 1 }
0x10f1   :  { %4594 = vsyncpa [#allocation7 + $0x1], 1 }
0x10f2   :  { %4595 = vsyncpa [#allocation10], 1 }
0x10f3   :  { %4597 = vsyncpa [#allocation10 + $0x1], 1 }
0x10f4   :  { %4598 = vsyncpa [#allocation13], 1 }
0x10f5   :  { %4600 = vsyncpa [#allocation13 + $0x1], 1 }
0x10f6   :  { %4601 = vsyncpa [#allocation16], 1 }
0x10f7   :  { %4603 = vsyncpa [#allocation16 + $0x1], 1 }
0x10f8   :  { %4604 = vsyncpa [#allocation5], 1 }
0x10f9   :  { %4606 = vsyncpa [#allocation5 + $0x1], 1 }

</bundles_post_ra>
